<compile_context>
chip_gen: v7x
topology: tpu7x:2x2x1
jax: 0.10.0
libtpu: 0.0.40
codegen_flags: <defaults>
</compile_context>

<pallas_src>
import jax
import jax.numpy as jnp
from jax.experimental import pallas as pl
from jax.experimental.pallas import tpu as pltpu

EMBED_SIZE = 32
HIDDEN_SIZE = 32
VOCAB_SIZE = 64
VOCAB_PAD = 128        # lane-dense logits width (multiple of 128)
NUM_LAYERS = 2
SEQ_T = 8              # caption length T (packed sequence has up to T+1 rows)
BATCH = 1


def decoder_kernel(ids_ref, featg_ref, etab_ref, w_ih_ref, w_hh_ref, b_ref,
                   lw_ref, lb_ref, out_ref):
  """Fused decoder forward over one packed sequence of L_pad time steps.

  ids_ref:   VMEM (L_pad, 1) int32       shifted token ids: row t>=1 holds
                                         captions[t-1]; row 0 / tail rows = -1.
  featg_ref: VMEM (1, 4H)  f32           features @ W_ih0 + b0 (step-0 gates).
  etab_ref:  VMEM (V, 4H)  f32           embed_w @ W_ih0 + b0 (fused table).
  w_ih_ref:  VMEM (NUM_LAYERS-1, H, 4H)  input->gate weights, layers >= 1.
  w_hh_ref:  VMEM (NUM_LAYERS,   H, 4H)  hidden->gate weights.
  b_ref:     VMEM (NUM_LAYERS-1, 1, 4H)  b_ih + b_hh, layers >= 1.
  lw_ref:    VMEM (H, VOCAB_PAD) f32     vocab projection weight (0-padded).
  lb_ref:    VMEM (1, VOCAB_PAD) f32     vocab projection bias   (0-padded).
  out_ref:   VMEM (L_pad, VOCAB_PAD)     logits; rows >= true L are don't-care.

  The g-gate columns (2H:3H) of every weight/bias were pre-scaled by 2 in the
  wrapper so tanh(g) == 2 * sigmoid(g_scaled) - 1.
  """
  H = HIDDEN_SIZE
  L_pad = out_ref.shape[0]
  V = etab_ref.shape[0]

  lane = jax.lax.broadcasted_iota(jnp.int32, (1, 4 * H), 1)
  g_mask = (lane >= 2 * H) & (lane < 3 * H)                  # g-gate quarter
  row_iota = jax.lax.broadcasted_iota(jnp.int32, (L_pad, 1), 0)

  def assemble(rows):
    # Stack L_pad vreg-resident (1, H) rows into an (L_pad, H) slab with
    # row-masked selects (VPU only; no VMEM round trip, no unaligned
    # sublane concatenation).
    acc = jnp.zeros((L_pad, H), jnp.float32)
    for t in range(L_pad):
      acc = jnp.where(row_iota == t, rows[t], acc)
    return acc

  # ---- layer-0 input gates: fused-embedding gather as one one-hot MXU matmul
  # (lane-dense, no dynamic indexing, off the serial recurrence chain).
  col = jax.lax.broadcasted_iota(jnp.int32, (L_pad, V), 1)
  onehot = jnp.where(col == ids_ref[...], 1.0, 0.0)          # (L_pad, V)
  feat_row = jnp.where(row_iota == 0, 1.0, 0.0)              # (L_pad, 1)
  gates_x = (jnp.dot(onehot, etab_ref[...],
                     preferred_element_type=jnp.float32)
             + feat_row * featg_ref[...])                    # (L_pad, 4H)

  hs = None
  for layer in range(NUM_LAYERS):
    if layer > 0:
      # Hoisted input projection: one (L_pad, H) @ (H, 4H) MXU matmul per
      # layer, fed straight from the vreg-resident previous-layer outputs.
      gates_x = (jnp.dot(assemble(hs), w_ih_ref[layer - 1],
                         preferred_element_type=jnp.float32)
                 + b_ref[layer - 1])
    w_hh = w_hh_ref[layer]                                   # (H, 4H)
    # TODO(synk): stage w_hh in the MXU across the step loop
    # (pltpu.matmul_push_rhs / matmul_acc_lhs) to skip per-step RHS re-pushes.

    h = jnp.zeros((1, H), jnp.float32)
    c = jnp.zeros((1, H), jnp.float32)
    hs = []
    # Static unroll: L_pad <= 16 here; switch to lax.fori_loop(..., unroll=8)
    # if the sequence length ever grows past ~64 (vreg pressure).
    for t in range(L_pad):
      g = gates_x[t:t + 1, :] + jnp.dot(h, w_hh,
                                        preferred_element_type=jnp.float32)
      sig = jax.nn.sigmoid(g)                      # 1 EUP pass covers i,f,g,o
      act = jnp.where(g_mask, 2.0 * sig - 1.0, sig)  # g quarter -> tanh (VPU)
      i_g = act[:, 0 * H:1 * H]
      f_g = act[:, 1 * H:2 * H]
      g_g = act[:, 2 * H:3 * H]
      o_g = act[:, 3 * H:4 * H]
      c = f_g * c + i_g * g_g
      h = o_g * jnp.tanh(c)                        # 2nd (and last) EUP pass
      hs.append(h)                                 # stays in vregs

  # ---- vocab projection: one hoisted matmul + one lane-dense slab store.
  out_ref[...] = (jnp.dot(assemble(hs), lw_ref[...],
                          preferred_element_type=jnp.float32) + lb_ref[...])


def init_params(key):
  """Deterministic parameter init mirroring DecoderRNN.init_weights / nn.LSTM."""
  ks = list(jax.random.split(key, 2 + 4 * NUM_LAYERS))
  embed_w = jax.random.uniform(ks[0], (VOCAB_SIZE, EMBED_SIZE),
                               minval=-0.1, maxval=0.1, dtype=jnp.float32)
  lin_w = jax.random.uniform(ks[1], (VOCAB_SIZE, HIDDEN_SIZE),
                             minval=-0.1, maxval=0.1,
                             dtype=jnp.float32).T             # (H, V), x @ W
  lin_b = jnp.zeros((1, VOCAB_SIZE), jnp.float32)

  k = 1.0 / jnp.sqrt(HIDDEN_SIZE)
  w_ih, w_hh, bias = [], [], []
  for l in range(NUM_LAYERS):
    in_dim = EMBED_SIZE if l == 0 else HIDDEN_SIZE
    wi = jax.random.uniform(ks[2 + 4 * l + 0], (4 * HIDDEN_SIZE, in_dim),
                            minval=-k, maxval=k, dtype=jnp.float32)
    wh = jax.random.uniform(ks[2 + 4 * l + 1], (4 * HIDDEN_SIZE, HIDDEN_SIZE),
                            minval=-k, maxval=k, dtype=jnp.float32)
    bi = jax.random.uniform(ks[2 + 4 * l + 2], (4 * HIDDEN_SIZE,),
                            minval=-k, maxval=k, dtype=jnp.float32)
    bh = jax.random.uniform(ks[2 + 4 * l + 3], (4 * HIDDEN_SIZE,),
                            minval=-k, maxval=k, dtype=jnp.float32)
    w_ih.append(wi.T)                    # (in_dim, 4H), x @ W layout
    w_hh.append(wh.T)                    # (H, 4H)
    bias.append((bi + bh)[None, :])      # (1, 4H)
  return (embed_w, tuple(w_ih), jnp.stack(w_hh), jnp.stack(bias), lin_w, lin_b)


@jax.jit
def _decoder_core(features, captions, embed_w, w_ih0, w_ih_rest, w_hh, bias,
                  lin_w, lin_b):
  """Weight folding + the fused Pallas kernel.

  Returns the full (L_pad, VOCAB_PAD) logits slab.  All shapes depend only on
  T = captions.shape[1], so a single compile serves every caption length L.
  """
  H = HIDDEN_SIZE
  T = captions.shape[1]
  L_pad = max(8, pl.cdiv(T + 1, 8) * 8)           # single static length bucket

  # Pre-scale the g-gate columns by 2 (tanh(x) = 2*sigmoid(2x) - 1 in-kernel).
  gscale = jnp.ones((4 * H,), jnp.float32).at[2 * H:3 * H].set(2.0)
  w_ih0_s = w_ih0 * gscale
  w_ih_rest_s = w_ih_rest * gscale
  w_hh_s = w_hh * gscale
  bias_s = bias * gscale

  # Fold embedding + layer-0 input projection + bias into one (V, 4H) table
  # and precompute the image feature's step-0 gate row.
  etab = embed_w @ w_ih0_s + bias_s[0]                           # (V, 4H)
  featg = features @ w_ih0_s + bias_s[0]                         # (1, 4H)

  # Shifted ids: row 0 and rows > T select nothing (-1); row t>=1 -> token t-1.
  ids = jnp.full((L_pad, 1), -1, jnp.int32)
  ids = ids.at[1:T + 1, 0].set(captions[0].astype(jnp.int32))

  # Lane-dense padded vocab projection (V -> VOCAB_PAD zero-padded columns).
  lw_pad = jnp.zeros((H, VOCAB_PAD), jnp.float32).at[:, :VOCAB_SIZE].set(lin_w)
  lb_pad = jnp.zeros((1, VOCAB_PAD), jnp.float32).at[:, :VOCAB_SIZE].set(lin_b)

  vmem = pl.BlockSpec(memory_space=pltpu.MemorySpace.VMEM)
  return pl.pallas_call(
      decoder_kernel,
      out_shape=jax.ShapeDtypeStruct((L_pad, VOCAB_PAD), jnp.float32),
      in_specs=[vmem] * 8,
      out_specs=vmem,
  )(ids, featg, etab, w_ih_rest_s, w_hh_s, bias_s[1:], lw_pad, lb_pad)


def decoder_forward(features, captions, lengths, params):
  """Mirrors DecoderRNN.forward for batch == 1.

  features: (1, E) f32, captions: (1, T) int32, lengths: python list [L] with
  L <= T + 1.  Returns packed logits of shape (L, VOCAB_SIZE).
  """
  # TODO(synk): true multi-batch pack_padded_sequence interleaving is not
  # modeled (forward's unsqueeze(0)+cat is only shape-consistent at batch 1).
  embed_w, w_ih, w_hh, bias, lin_w, lin_b = params
  L = int(lengths[0])
  assert L <= captions.shape[1] + 1
  w_ih_rest = jnp.stack(list(w_ih[1:]))            # (NUM_LAYERS-1, H, 4H)
  out = _decoder_core(features, captions, embed_w, w_ih[0], w_ih_rest,
                      w_hh, bias, lin_w, lin_b)
  # Rows >= L ran on empty gate rows; the LSTM is causal so rows < L are exact.
  return out[:L, :VOCAB_SIZE]


def reference_forward(features, captions, lengths, params):
  """Pure-JAX reference of the same math (standard LSTM formulation)."""
  embed_w, w_ih, w_hh, bias, lin_w, lin_b = params
  emb = embed_w[captions]                                       # (1, T, E)
  full = jnp.concatenate([features[:, None, :], emb], axis=1)   # (1, T+1, E)
  L = int(lengths[0])
  x = full[0, :L]
  H = HIDDEN_SIZE
  for layer in range(NUM_LAYERS):
    h = jnp.zeros((H,), jnp.float32)
    c = jnp.zeros((H,), jnp.float32)
    outs = []
    for t in range(L):
      g = x[t] @ w_ih[layer] + h @ w_hh[layer] + bias[layer, 0]
      i_g = jax.nn.sigmoid(g[0 * H:1 * H])
      f_g = jax.nn.sigmoid(g[1 * H:2 * H])
      g_g = jnp.tanh(g[2 * H:3 * H])
      o_g = jax.nn.sigmoid(g[3 * H:4 * H])
      c = f_g * c + i_g * g_g
      h = o_g * jnp.tanh(c)
      outs.append(h)
    x = jnp.stack(outs)
  return x @ lin_w + lin_b


if __name__ == "__main__":
  key = jax.random.PRNGKey(0)
  k_param, k_feat, k_cap = jax.random.split(key, 3)

  params = init_params(k_param)
  features = jax.random.normal(k_feat, (BATCH, EMBED_SIZE), jnp.float32)
  captions = jax.random.randint(k_cap, (BATCH, SEQ_T), 0, VOCAB_SIZE,
                                dtype=jnp.int32)
  lengths = [7]                              # L <= T + 1

  out = decoder_forward(features, captions, lengths, params)
  out = jax.block_until_ready(out)

  ref = reference_forward(features, captions, lengths, params)
  assert out.shape == (lengths[0], VOCAB_SIZE)
  assert jnp.allclose(out, ref, atol=1e-4, rtol=1e-4), "mismatch vs reference"

  print("KERNEL_OK")
</pallas_src>

<mosaic_0001>
module attributes {stable_mosaic.version = 11 : i64} {
  func.func @decoder_kernel(%arg0: memref<16x1xi32, #tpu.memory_space<vmem>>, %arg1: memref<1x128xf32, #tpu.memory_space<vmem>>, %arg2: memref<64x128xf32, #tpu.memory_space<vmem>>, %arg3: memref<1x32x128xf32, #tpu.memory_space<vmem>>, %arg4: memref<2x32x128xf32, #tpu.memory_space<vmem>>, %arg5: memref<1x1x128xf32, #tpu.memory_space<vmem>>, %arg6: memref<32x128xf32, #tpu.memory_space<vmem>>, %arg7: memref<1x128xf32, #tpu.memory_space<vmem>>, %arg8: memref<16x128xf32, #tpu.memory_space<vmem>>) attributes {dimension_semantics = [], scalar_prefetch = 0 : i64, scratch_operands = 0 : i64, tpu.core_type = #tpu.core_type<tc>} {
    %0 = tpu.iota {dimensions = array<i32: 1>} : vector<1x128xi32>
    %c64_i32 = arith.constant 64 : i32
    %1 = vector.broadcast %c64_i32 : i32 to vector<1x128xi32>
    %2 = arith.cmpi sge, %0, %1 : vector<1x128xi32>
    %c96_i32 = arith.constant 96 : i32
    %3 = vector.broadcast %c96_i32 : i32 to vector<1x128xi32>
    %4 = arith.cmpi slt, %0, %3 : vector<1x128xi32>
    %5 = arith.andi %2, %4 : vector<1x128xi1>
    %6 = tpu.iota {dimensions = array<i32: 0>} : vector<16x1xi32>
    %7 = tpu.iota {dimensions = array<i32: 1>} : vector<16x64xi32>
    %c0 = arith.constant 0 : index
    %c0_0 = arith.constant 0 : index
    %8 = vector.load %arg0[%c0, %c0_0] : memref<16x1xi32, #tpu.memory_space<vmem>>, vector<16x1xi32>
    %9 = vector.broadcast %8 : vector<16x1xi32> to vector<16x64xi32>
    %10 = arith.cmpi eq, %7, %9 : vector<16x64xi32>
    %cst = arith.constant 1.000000e+00 : f32
    %cst_1 = arith.constant 0.000000e+00 : f32
    %11 = vector.broadcast %cst : f32 to vector<16x64xf32>
    %12 = vector.broadcast %cst_1 : f32 to vector<16x64xf32>
    %13 = arith.select %10, %11, %12 : vector<16x64xi1>, vector<16x64xf32>
    %c0_i32 = arith.constant 0 : i32
    %14 = vector.broadcast %c0_i32 : i32 to vector<16x1xi32>
    %15 = arith.cmpi eq, %6, %14 : vector<16x1xi32>
    %cst_2 = arith.constant 1.000000e+00 : f32
    %cst_3 = arith.constant 0.000000e+00 : f32
    %16 = vector.broadcast %cst_2 : f32 to vector<16x1xf32>
    %17 = vector.broadcast %cst_3 : f32 to vector<16x1xf32>
    %18 = arith.select %15, %16, %17 : vector<16x1xi1>, vector<16x1xf32>
    %c0_4 = arith.constant 0 : index
    %c0_5 = arith.constant 0 : index
    %19 = vector.load %arg2[%c0_4, %c0_5] : memref<64x128xf32, #tpu.memory_space<vmem>>, vector<64x128xf32>
    %cst_6 = arith.constant dense<0.000000e+00> : vector<16x128xf32>
    %20 = tpu.matmul %13, %19, %cst_6 {dimension_numbers = #tpu.dot_dimension_numbers<[1], [0], [0], [1], [0, 0, 1, 1], [], []>} : vector<16x64xf32>, vector<64x128xf32>, vector<16x128xf32> -> vector<16x128xf32>
    %c0_7 = arith.constant 0 : index
    %c0_8 = arith.constant 0 : index
    %21 = vector.load %arg1[%c0_7, %c0_8] : memref<1x128xf32, #tpu.memory_space<vmem>>, vector<1x128xf32>
    %22 = vector.broadcast %18 : vector<16x1xf32> to vector<16x128xf32>
    %23 = vector.broadcast %21 : vector<1x128xf32> to vector<16x128xf32>
    %24 = arith.mulf %22, %23 : vector<16x128xf32>
    %25 = arith.addf %20, %24 : vector<16x128xf32>
    %c0_9 = arith.constant 0 : index
    %c0_10 = arith.constant 0 : index
    %c0_11 = arith.constant 0 : index
    %26 = vector.load %arg4[%c0_9, %c0_10, %c0_11] : memref<2x32x128xf32, #tpu.memory_space<vmem>>, vector<1x32x128xf32>
    %27 = vector.shape_cast %26 : vector<1x32x128xf32> to vector<32x128xf32>
    %cst_12 = arith.constant 0.000000e+00 : f32
    %28 = vector.broadcast %cst_12 : f32 to vector<1x32xf32>
    %cst_13 = arith.constant 0.000000e+00 : f32
    %29 = vector.broadcast %cst_13 : f32 to vector<1x32xf32>
    %30 = vector.extract_strided_slice %25 {offsets = [0, 0], sizes = [1, 128], strides = [1, 1]} : vector<16x128xf32> to vector<1x128xf32>
    %cst_14 = arith.constant dense<0.000000e+00> : vector<1x128xf32>
    %31 = tpu.matmul %28, %27, %cst_14 {dimension_numbers = #tpu.dot_dimension_numbers<[1], [0], [0], [1], [0, 0, 1, 1], [], []>} : vector<1x32xf32>, vector<32x128xf32>, vector<1x128xf32> -> vector<1x128xf32>
    %32 = arith.addf %30, %31 : vector<1x128xf32>
    %33 = arith.negf %32 : vector<1x128xf32>
    %34 = math.exp %33 : vector<1x128xf32>
    %cst_15 = arith.constant 1.000000e+00 : f32
    %35 = vector.broadcast %cst_15 : f32 to vector<1x128xf32>
    %36 = arith.addf %35, %34 : vector<1x128xf32>
    %37 = arith.divf %35, %36 : vector<1x128xf32>
    %cst_16 = arith.constant 2.000000e+00 : f32
    %38 = vector.broadcast %cst_16 : f32 to vector<1x128xf32>
    %39 = arith.mulf %38, %37 : vector<1x128xf32>
    %cst_17 = arith.constant 1.000000e+00 : f32
    %40 = vector.broadcast %cst_17 : f32 to vector<1x128xf32>
    %41 = arith.subf %39, %40 : vector<1x128xf32>
    %42 = arith.select %5, %41, %37 : vector<1x128xi1>, vector<1x128xf32>
    %43 = vector.extract_strided_slice %42 {offsets = [0, 0], sizes = [1, 32], strides = [1, 1]} : vector<1x128xf32> to vector<1x32xf32>
    %44 = vector.extract_strided_slice %42 {offsets = [0, 32], sizes = [1, 32], strides = [1, 1]} : vector<1x128xf32> to vector<1x32xf32>
    %45 = vector.extract_strided_slice %42 {offsets = [0, 64], sizes = [1, 32], strides = [1, 1]} : vector<1x128xf32> to vector<1x32xf32>
    %46 = vector.extract_strided_slice %42 {offsets = [0, 96], sizes = [1, 32], strides = [1, 1]} : vector<1x128xf32> to vector<1x32xf32>
    %47 = arith.mulf %44, %29 : vector<1x32xf32>
    %48 = arith.mulf %43, %45 : vector<1x32xf32>
    %49 = arith.addf %47, %48 : vector<1x32xf32>
    %50 = math.tanh %49 : vector<1x32xf32>
    %51 = arith.mulf %46, %50 : vector<1x32xf32>
    %52 = vector.extract_strided_slice %25 {offsets = [1, 0], sizes = [1, 128], strides = [1, 1]} : vector<16x128xf32> to vector<1x128xf32>
    %cst_18 = arith.constant dense<0.000000e+00> : vector<1x128xf32>
    %53 = tpu.matmul %51, %27, %cst_18 {dimension_numbers = #tpu.dot_dimension_numbers<[1], [0], [0], [1], [0, 0, 1, 1], [], []>} : vector<1x32xf32>, vector<32x128xf32>, vector<1x128xf32> -> vector<1x128xf32>
    %54 = arith.addf %52, %53 : vector<1x128xf32>
    %55 = arith.negf %54 : vector<1x128xf32>
    %56 = math.exp %55 : vector<1x128xf32>
    %cst_19 = arith.constant 1.000000e+00 : f32
    %57 = vector.broadcast %cst_19 : f32 to vector<1x128xf32>
    %58 = arith.addf %57, %56 : vector<1x128xf32>
    %59 = arith.divf %57, %58 : vector<1x128xf32>
    %cst_20 = arith.constant 2.000000e+00 : f32
    %60 = vector.broadcast %cst_20 : f32 to vector<1x128xf32>
    %61 = arith.mulf %60, %59 : vector<1x128xf32>
    %cst_21 = arith.constant 1.000000e+00 : f32
    %62 = vector.broadcast %cst_21 : f32 to vector<1x128xf32>
    %63 = arith.subf %61, %62 : vector<1x128xf32>
    %64 = arith.select %5, %63, %59 : vector<1x128xi1>, vector<1x128xf32>
    %65 = vector.extract_strided_slice %64 {offsets = [0, 0], sizes = [1, 32], strides = [1, 1]} : vector<1x128xf32> to vector<1x32xf32>
    %66 = vector.extract_strided_slice %64 {offsets = [0, 32], sizes = [1, 32], strides = [1, 1]} : vector<1x128xf32> to vector<1x32xf32>
    %67 = vector.extract_strided_slice %64 {offsets = [0, 64], sizes = [1, 32], strides = [1, 1]} : vector<1x128xf32> to vector<1x32xf32>
    %68 = vector.extract_strided_slice %64 {offsets = [0, 96], sizes = [1, 32], strides = [1, 1]} : vector<1x128xf32> to vector<1x32xf32>
    %69 = arith.mulf %66, %49 : vector<1x32xf32>
    %70 = arith.mulf %65, %67 : vector<1x32xf32>
    %71 = arith.addf %69, %70 : vector<1x32xf32>
    %72 = math.tanh %71 : vector<1x32xf32>
    %73 = arith.mulf %68, %72 : vector<1x32xf32>
    %74 = vector.extract_strided_slice %25 {offsets = [2, 0], sizes = [1, 128], strides = [1, 1]} : vector<16x128xf32> to vector<1x128xf32>
    %cst_22 = arith.constant dense<0.000000e+00> : vector<1x128xf32>
    %75 = tpu.matmul %73, %27, %cst_22 {dimension_numbers = #tpu.dot_dimension_numbers<[1], [0], [0], [1], [0, 0, 1, 1], [], []>} : vector<1x32xf32>, vector<32x128xf32>, vector<1x128xf32> -> vector<1x128xf32>
    %76 = arith.addf %74, %75 : vector<1x128xf32>
    %77 = arith.negf %76 : vector<1x128xf32>
    %78 = math.exp %77 : vector<1x128xf32>
    %cst_23 = arith.constant 1.000000e+00 : f32
    %79 = vector.broadcast %cst_23 : f32 to vector<1x128xf32>
    %80 = arith.addf %79, %78 : vector<1x128xf32>
    %81 = arith.divf %79, %80 : vector<1x128xf32>
    %cst_24 = arith.constant 2.000000e+00 : f32
    %82 = vector.broadcast %cst_24 : f32 to vector<1x128xf32>
    %83 = arith.mulf %82, %81 : vector<1x128xf32>
    %cst_25 = arith.constant 1.000000e+00 : f32
    %84 = vector.broadcast %cst_25 : f32 to vector<1x128xf32>
    %85 = arith.subf %83, %84 : vector<1x128xf32>
    %86 = arith.select %5, %85, %81 : vector<1x128xi1>, vector<1x128xf32>
    %87 = vector.extract_strided_slice %86 {offsets = [0, 0], sizes = [1, 32], strides = [1, 1]} : vector<1x128xf32> to vector<1x32xf32>
    %88 = vector.extract_strided_slice %86 {offsets = [0, 32], sizes = [1, 32], strides = [1, 1]} : vector<1x128xf32> to vector<1x32xf32>
    %89 = vector.extract_strided_slice %86 {offsets = [0, 64], sizes = [1, 32], strides = [1, 1]} : vector<1x128xf32> to vector<1x32xf32>
    %90 = vector.extract_strided_slice %86 {offsets = [0, 96], sizes = [1, 32], strides = [1, 1]} : vector<1x128xf32> to vector<1x32xf32>
    %91 = arith.mulf %88, %71 : vector<1x32xf32>
    %92 = arith.mulf %87, %89 : vector<1x32xf32>
    %93 = arith.addf %91, %92 : vector<1x32xf32>
    %94 = math.tanh %93 : vector<1x32xf32>
    %95 = arith.mulf %90, %94 : vector<1x32xf32>
    %96 = vector.extract_strided_slice %25 {offsets = [3, 0], sizes = [1, 128], strides = [1, 1]} : vector<16x128xf32> to vector<1x128xf32>
    %cst_26 = arith.constant dense<0.000000e+00> : vector<1x128xf32>
    %97 = tpu.matmul %95, %27, %cst_26 {dimension_numbers = #tpu.dot_dimension_numbers<[1], [0], [0], [1], [0, 0, 1, 1], [], []>} : vector<1x32xf32>, vector<32x128xf32>, vector<1x128xf32> -> vector<1x128xf32>
    %98 = arith.addf %96, %97 : vector<1x128xf32>
    %99 = arith.negf %98 : vector<1x128xf32>
    %100 = math.exp %99 : vector<1x128xf32>
    %cst_27 = arith.constant 1.000000e+00 : f32
    %101 = vector.broadcast %cst_27 : f32 to vector<1x128xf32>
    %102 = arith.addf %101, %100 : vector<1x128xf32>
    %103 = arith.divf %101, %102 : vector<1x128xf32>
    %cst_28 = arith.constant 2.000000e+00 : f32
    %104 = vector.broadcast %cst_28 : f32 to vector<1x128xf32>
    %105 = arith.mulf %104, %103 : vector<1x128xf32>
    %cst_29 = arith.constant 1.000000e+00 : f32
    %106 = vector.broadcast %cst_29 : f32 to vector<1x128xf32>
    %107 = arith.subf %105, %106 : vector<1x128xf32>
    %108 = arith.select %5, %107, %103 : vector<1x128xi1>, vector<1x128xf32>
    %109 = vector.extract_strided_slice %108 {offsets = [0, 0], sizes = [1, 32], strides = [1, 1]} : vector<1x128xf32> to vector<1x32xf32>
    %110 = vector.extract_strided_slice %108 {offsets = [0, 32], sizes = [1, 32], strides = [1, 1]} : vector<1x128xf32> to vector<1x32xf32>
    %111 = vector.extract_strided_slice %108 {offsets = [0, 64], sizes = [1, 32], strides = [1, 1]} : vector<1x128xf32> to vector<1x32xf32>
    %112 = vector.extract_strided_slice %108 {offsets = [0, 96], sizes = [1, 32], strides = [1, 1]} : vector<1x128xf32> to vector<1x32xf32>
    %113 = arith.mulf %110, %93 : vector<1x32xf32>
    %114 = arith.mulf %109, %111 : vector<1x32xf32>
    %115 = arith.addf %113, %114 : vector<1x32xf32>
    %116 = math.tanh %115 : vector<1x32xf32>
    %117 = arith.mulf %112, %116 : vector<1x32xf32>
    %118 = vector.extract_strided_slice %25 {offsets = [4, 0], sizes = [1, 128], strides = [1, 1]} : vector<16x128xf32> to vector<1x128xf32>
    %cst_30 = arith.constant dense<0.000000e+00> : vector<1x128xf32>
    %119 = tpu.matmul %117, %27, %cst_30 {dimension_numbers = #tpu.dot_dimension_numbers<[1], [0], [0], [1], [0, 0, 1, 1], [], []>} : vector<1x32xf32>, vector<32x128xf32>, vector<1x128xf32> -> vector<1x128xf32>
    %120 = arith.addf %118, %119 : vector<1x128xf32>
    %121 = arith.negf %120 : vector<1x128xf32>
    %122 = math.exp %121 : vector<1x128xf32>
    %cst_31 = arith.constant 1.000000e+00 : f32
    %123 = vector.broadcast %cst_31 : f32 to vector<1x128xf32>
    %124 = arith.addf %123, %122 : vector<1x128xf32>
    %125 = arith.divf %123, %124 : vector<1x128xf32>
    %cst_32 = arith.constant 2.000000e+00 : f32
    %126 = vector.broadcast %cst_32 : f32 to vector<1x128xf32>
    %127 = arith.mulf %126, %125 : vector<1x128xf32>
    %cst_33 = arith.constant 1.000000e+00 : f32
    %128 = vector.broadcast %cst_33 : f32 to vector<1x128xf32>
    %129 = arith.subf %127, %128 : vector<1x128xf32>
    %130 = arith.select %5, %129, %125 : vector<1x128xi1>, vector<1x128xf32>
    %131 = vector.extract_strided_slice %130 {offsets = [0, 0], sizes = [1, 32], strides = [1, 1]} : vector<1x128xf32> to vector<1x32xf32>
    %132 = vector.extract_strided_slice %130 {offsets = [0, 32], sizes = [1, 32], strides = [1, 1]} : vector<1x128xf32> to vector<1x32xf32>
    %133 = vector.extract_strided_slice %130 {offsets = [0, 64], sizes = [1, 32], strides = [1, 1]} : vector<1x128xf32> to vector<1x32xf32>
    %134 = vector.extract_strided_slice %130 {offsets = [0, 96], sizes = [1, 32], strides = [1, 1]} : vector<1x128xf32> to vector<1x32xf32>
    %135 = arith.mulf %132, %115 : vector<1x32xf32>
    %136 = arith.mulf %131, %133 : vector<1x32xf32>
    %137 = arith.addf %135, %136 : vector<1x32xf32>
    %138 = math.tanh %137 : vector<1x32xf32>
    %139 = arith.mulf %134, %138 : vector<1x32xf32>
    %140 = vector.extract_strided_slice %25 {offsets = [5, 0], sizes = [1, 128], strides = [1, 1]} : vector<16x128xf32> to vector<1x128xf32>
    %cst_34 = arith.constant dense<0.000000e+00> : vector<1x128xf32>
    %141 = tpu.matmul %139, %27, %cst_34 {dimension_numbers = #tpu.dot_dimension_numbers<[1], [0], [0], [1], [0, 0, 1, 1], [], []>} : vector<1x32xf32>, vector<32x128xf32>, vector<1x128xf32> -> vector<1x128xf32>
    %142 = arith.addf %140, %141 : vector<1x128xf32>
    %143 = arith.negf %142 : vector<1x128xf32>
    %144 = math.exp %143 : vector<1x128xf32>
    %cst_35 = arith.constant 1.000000e+00 : f32
    %145 = vector.broadcast %cst_35 : f32 to vector<1x128xf32>
    %146 = arith.addf %145, %144 : vector<1x128xf32>
    %147 = arith.divf %145, %146 : vector<1x128xf32>
    %cst_36 = arith.constant 2.000000e+00 : f32
    %148 = vector.broadcast %cst_36 : f32 to vector<1x128xf32>
    %149 = arith.mulf %148, %147 : vector<1x128xf32>
    %cst_37 = arith.constant 1.000000e+00 : f32
    %150 = vector.broadcast %cst_37 : f32 to vector<1x128xf32>
    %151 = arith.subf %149, %150 : vector<1x128xf32>
    %152 = arith.select %5, %151, %147 : vector<1x128xi1>, vector<1x128xf32>
    %153 = vector.extract_strided_slice %152 {offsets = [0, 0], sizes = [1, 32], strides = [1, 1]} : vector<1x128xf32> to vector<1x32xf32>
    %154 = vector.extract_strided_slice %152 {offsets = [0, 32], sizes = [1, 32], strides = [1, 1]} : vector<1x128xf32> to vector<1x32xf32>
    %155 = vector.extract_strided_slice %152 {offsets = [0, 64], sizes = [1, 32], strides = [1, 1]} : vector<1x128xf32> to vector<1x32xf32>
    %156 = vector.extract_strided_slice %152 {offsets = [0, 96], sizes = [1, 32], strides = [1, 1]} : vector<1x128xf32> to vector<1x32xf32>
    %157 = arith.mulf %154, %137 : vector<1x32xf32>
    %158 = arith.mulf %153, %155 : vector<1x32xf32>
    %159 = arith.addf %157, %158 : vector<1x32xf32>
    %160 = math.tanh %159 : vector<1x32xf32>
    %161 = arith.mulf %156, %160 : vector<1x32xf32>
    %162 = vector.extract_strided_slice %25 {offsets = [6, 0], sizes = [1, 128], strides = [1, 1]} : vector<16x128xf32> to vector<1x128xf32>
    %cst_38 = arith.constant dense<0.000000e+00> : vector<1x128xf32>
    %163 = tpu.matmul %161, %27, %cst_38 {dimension_numbers = #tpu.dot_dimension_numbers<[1], [0], [0], [1], [0, 0, 1, 1], [], []>} : vector<1x32xf32>, vector<32x128xf32>, vector<1x128xf32> -> vector<1x128xf32>
    %164 = arith.addf %162, %163 : vector<1x128xf32>
    %165 = arith.negf %164 : vector<1x128xf32>
    %166 = math.exp %165 : vector<1x128xf32>
    %cst_39 = arith.constant 1.000000e+00 : f32
    %167 = vector.broadcast %cst_39 : f32 to vector<1x128xf32>
    %168 = arith.addf %167, %166 : vector<1x128xf32>
    %169 = arith.divf %167, %168 : vector<1x128xf32>
    %cst_40 = arith.constant 2.000000e+00 : f32
    %170 = vector.broadcast %cst_40 : f32 to vector<1x128xf32>
    %171 = arith.mulf %170, %169 : vector<1x128xf32>
    %cst_41 = arith.constant 1.000000e+00 : f32
    %172 = vector.broadcast %cst_41 : f32 to vector<1x128xf32>
    %173 = arith.subf %171, %172 : vector<1x128xf32>
    %174 = arith.select %5, %173, %169 : vector<1x128xi1>, vector<1x128xf32>
    %175 = vector.extract_strided_slice %174 {offsets = [0, 0], sizes = [1, 32], strides = [1, 1]} : vector<1x128xf32> to vector<1x32xf32>
    %176 = vector.extract_strided_slice %174 {offsets = [0, 32], sizes = [1, 32], strides = [1, 1]} : vector<1x128xf32> to vector<1x32xf32>
    %177 = vector.extract_strided_slice %174 {offsets = [0, 64], sizes = [1, 32], strides = [1, 1]} : vector<1x128xf32> to vector<1x32xf32>
    %178 = vector.extract_strided_slice %174 {offsets = [0, 96], sizes = [1, 32], strides = [1, 1]} : vector<1x128xf32> to vector<1x32xf32>
    %179 = arith.mulf %176, %159 : vector<1x32xf32>
    %180 = arith.mulf %175, %177 : vector<1x32xf32>
    %181 = arith.addf %179, %180 : vector<1x32xf32>
    %182 = math.tanh %181 : vector<1x32xf32>
    %183 = arith.mulf %178, %182 : vector<1x32xf32>
    %184 = vector.extract_strided_slice %25 {offsets = [7, 0], sizes = [1, 128], strides = [1, 1]} : vector<16x128xf32> to vector<1x128xf32>
    %cst_42 = arith.constant dense<0.000000e+00> : vector<1x128xf32>
    %185 = tpu.matmul %183, %27, %cst_42 {dimension_numbers = #tpu.dot_dimension_numbers<[1], [0], [0], [1], [0, 0, 1, 1], [], []>} : vector<1x32xf32>, vector<32x128xf32>, vector<1x128xf32> -> vector<1x128xf32>
    %186 = arith.addf %184, %185 : vector<1x128xf32>
    %187 = arith.negf %186 : vector<1x128xf32>
    %188 = math.exp %187 : vector<1x128xf32>
    %cst_43 = arith.constant 1.000000e+00 : f32
    %189 = vector.broadcast %cst_43 : f32 to vector<1x128xf32>
    %190 = arith.addf %189, %188 : vector<1x128xf32>
    %191 = arith.divf %189, %190 : vector<1x128xf32>
    %cst_44 = arith.constant 2.000000e+00 : f32
    %192 = vector.broadcast %cst_44 : f32 to vector<1x128xf32>
    %193 = arith.mulf %192, %191 : vector<1x128xf32>
    %cst_45 = arith.constant 1.000000e+00 : f32
    %194 = vector.broadcast %cst_45 : f32 to vector<1x128xf32>
    %195 = arith.subf %193, %194 : vector<1x128xf32>
    %196 = arith.select %5, %195, %191 : vector<1x128xi1>, vector<1x128xf32>
    %197 = vector.extract_strided_slice %196 {offsets = [0, 0], sizes = [1, 32], strides = [1, 1]} : vector<1x128xf32> to vector<1x32xf32>
    %198 = vector.extract_strided_slice %196 {offsets = [0, 32], sizes = [1, 32], strides = [1, 1]} : vector<1x128xf32> to vector<1x32xf32>
    %199 = vector.extract_strided_slice %196 {offsets = [0, 64], sizes = [1, 32], strides = [1, 1]} : vector<1x128xf32> to vector<1x32xf32>
    %200 = vector.extract_strided_slice %196 {offsets = [0, 96], sizes = [1, 32], strides = [1, 1]} : vector<1x128xf32> to vector<1x32xf32>
    %201 = arith.mulf %198, %181 : vector<1x32xf32>
    %202 = arith.mulf %197, %199 : vector<1x32xf32>
    %203 = arith.addf %201, %202 : vector<1x32xf32>
    %204 = math.tanh %203 : vector<1x32xf32>
    %205 = arith.mulf %200, %204 : vector<1x32xf32>
    %206 = vector.extract_strided_slice %25 {offsets = [8, 0], sizes = [1, 128], strides = [1, 1]} : vector<16x128xf32> to vector<1x128xf32>
    %cst_46 = arith.constant dense<0.000000e+00> : vector<1x128xf32>
    %207 = tpu.matmul %205, %27, %cst_46 {dimension_numbers = #tpu.dot_dimension_numbers<[1], [0], [0], [1], [0, 0, 1, 1], [], []>} : vector<1x32xf32>, vector<32x128xf32>, vector<1x128xf32> -> vector<1x128xf32>
    %208 = arith.addf %206, %207 : vector<1x128xf32>
    %209 = arith.negf %208 : vector<1x128xf32>
    %210 = math.exp %209 : vector<1x128xf32>
    %cst_47 = arith.constant 1.000000e+00 : f32
    %211 = vector.broadcast %cst_47 : f32 to vector<1x128xf32>
    %212 = arith.addf %211, %210 : vector<1x128xf32>
    %213 = arith.divf %211, %212 : vector<1x128xf32>
    %cst_48 = arith.constant 2.000000e+00 : f32
    %214 = vector.broadcast %cst_48 : f32 to vector<1x128xf32>
    %215 = arith.mulf %214, %213 : vector<1x128xf32>
    %cst_49 = arith.constant 1.000000e+00 : f32
    %216 = vector.broadcast %cst_49 : f32 to vector<1x128xf32>
    %217 = arith.subf %215, %216 : vector<1x128xf32>
    %218 = arith.select %5, %217, %213 : vector<1x128xi1>, vector<1x128xf32>
    %219 = vector.extract_strided_slice %218 {offsets = [0, 0], sizes = [1, 32], strides = [1, 1]} : vector<1x128xf32> to vector<1x32xf32>
    %220 = vector.extract_strided_slice %218 {offsets = [0, 32], sizes = [1, 32], strides = [1, 1]} : vector<1x128xf32> to vector<1x32xf32>
    %221 = vector.extract_strided_slice %218 {offsets = [0, 64], sizes = [1, 32], strides = [1, 1]} : vector<1x128xf32> to vector<1x32xf32>
    %222 = vector.extract_strided_slice %218 {offsets = [0, 96], sizes = [1, 32], strides = [1, 1]} : vector<1x128xf32> to vector<1x32xf32>
    %223 = arith.mulf %220, %203 : vector<1x32xf32>
    %224 = arith.mulf %219, %221 : vector<1x32xf32>
    %225 = arith.addf %223, %224 : vector<1x32xf32>
    %226 = math.tanh %225 : vector<1x32xf32>
    %227 = arith.mulf %222, %226 : vector<1x32xf32>
    %228 = vector.extract_strided_slice %25 {offsets = [9, 0], sizes = [1, 128], strides = [1, 1]} : vector<16x128xf32> to vector<1x128xf32>
    %cst_50 = arith.constant dense<0.000000e+00> : vector<1x128xf32>
    %229 = tpu.matmul %227, %27, %cst_50 {dimension_numbers = #tpu.dot_dimension_numbers<[1], [0], [0], [1], [0, 0, 1, 1], [], []>} : vector<1x32xf32>, vector<32x128xf32>, vector<1x128xf32> -> vector<1x128xf32>
    %230 = arith.addf %228, %229 : vector<1x128xf32>
    %231 = arith.negf %230 : vector<1x128xf32>
    %232 = math.exp %231 : vector<1x128xf32>
    %cst_51 = arith.constant 1.000000e+00 : f32
    %233 = vector.broadcast %cst_51 : f32 to vector<1x128xf32>
    %234 = arith.addf %233, %232 : vector<1x128xf32>
    %235 = arith.divf %233, %234 : vector<1x128xf32>
    %cst_52 = arith.constant 2.000000e+00 : f32
    %236 = vector.broadcast %cst_52 : f32 to vector<1x128xf32>
    %237 = arith.mulf %236, %235 : vector<1x128xf32>
    %cst_53 = arith.constant 1.000000e+00 : f32
    %238 = vector.broadcast %cst_53 : f32 to vector<1x128xf32>
    %239 = arith.subf %237, %238 : vector<1x128xf32>
    %240 = arith.select %5, %239, %235 : vector<1x128xi1>, vector<1x128xf32>
    %241 = vector.extract_strided_slice %240 {offsets = [0, 0], sizes = [1, 32], strides = [1, 1]} : vector<1x128xf32> to vector<1x32xf32>
    %242 = vector.extract_strided_slice %240 {offsets = [0, 32], sizes = [1, 32], strides = [1, 1]} : vector<1x128xf32> to vector<1x32xf32>
    %243 = vector.extract_strided_slice %240 {offsets = [0, 64], sizes = [1, 32], strides = [1, 1]} : vector<1x128xf32> to vector<1x32xf32>
    %244 = vector.extract_strided_slice %240 {offsets = [0, 96], sizes = [1, 32], strides = [1, 1]} : vector<1x128xf32> to vector<1x32xf32>
    %245 = arith.mulf %242, %225 : vector<1x32xf32>
    %246 = arith.mulf %241, %243 : vector<1x32xf32>
    %247 = arith.addf %245, %246 : vector<1x32xf32>
    %248 = math.tanh %247 : vector<1x32xf32>
    %249 = arith.mulf %244, %248 : vector<1x32xf32>
    %250 = vector.extract_strided_slice %25 {offsets = [10, 0], sizes = [1, 128], strides = [1, 1]} : vector<16x128xf32> to vector<1x128xf32>
    %cst_54 = arith.constant dense<0.000000e+00> : vector<1x128xf32>
    %251 = tpu.matmul %249, %27, %cst_54 {dimension_numbers = #tpu.dot_dimension_numbers<[1], [0], [0], [1], [0, 0, 1, 1], [], []>} : vector<1x32xf32>, vector<32x128xf32>, vector<1x128xf32> -> vector<1x128xf32>
    %252 = arith.addf %250, %251 : vector<1x128xf32>
    %253 = arith.negf %252 : vector<1x128xf32>
    %254 = math.exp %253 : vector<1x128xf32>
    %cst_55 = arith.constant 1.000000e+00 : f32
    %255 = vector.broadcast %cst_55 : f32 to vector<1x128xf32>
    %256 = arith.addf %255, %254 : vector<1x128xf32>
    %257 = arith.divf %255, %256 : vector<1x128xf32>
    %cst_56 = arith.constant 2.000000e+00 : f32
    %258 = vector.broadcast %cst_56 : f32 to vector<1x128xf32>
    %259 = arith.mulf %258, %257 : vector<1x128xf32>
    %cst_57 = arith.constant 1.000000e+00 : f32
    %260 = vector.broadcast %cst_57 : f32 to vector<1x128xf32>
    %261 = arith.subf %259, %260 : vector<1x128xf32>
    %262 = arith.select %5, %261, %257 : vector<1x128xi1>, vector<1x128xf32>
    %263 = vector.extract_strided_slice %262 {offsets = [0, 0], sizes = [1, 32], strides = [1, 1]} : vector<1x128xf32> to vector<1x32xf32>
    %264 = vector.extract_strided_slice %262 {offsets = [0, 32], sizes = [1, 32], strides = [1, 1]} : vector<1x128xf32> to vector<1x32xf32>
    %265 = vector.extract_strided_slice %262 {offsets = [0, 64], sizes = [1, 32], strides = [1, 1]} : vector<1x128xf32> to vector<1x32xf32>
    %266 = vector.extract_strided_slice %262 {offsets = [0, 96], sizes = [1, 32], strides = [1, 1]} : vector<1x128xf32> to vector<1x32xf32>
    %267 = arith.mulf %264, %247 : vector<1x32xf32>
    %268 = arith.mulf %263, %265 : vector<1x32xf32>
    %269 = arith.addf %267, %268 : vector<1x32xf32>
    %270 = math.tanh %269 : vector<1x32xf32>
    %271 = arith.mulf %266, %270 : vector<1x32xf32>
    %272 = vector.extract_strided_slice %25 {offsets = [11, 0], sizes = [1, 128], strides = [1, 1]} : vector<16x128xf32> to vector<1x128xf32>
    %cst_58 = arith.constant dense<0.000000e+00> : vector<1x128xf32>
    %273 = tpu.matmul %271, %27, %cst_58 {dimension_numbers = #tpu.dot_dimension_numbers<[1], [0], [0], [1], [0, 0, 1, 1], [], []>} : vector<1x32xf32>, vector<32x128xf32>, vector<1x128xf32> -> vector<1x128xf32>
    %274 = arith.addf %272, %273 : vector<1x128xf32>
    %275 = arith.negf %274 : vector<1x128xf32>
    %276 = math.exp %275 : vector<1x128xf32>
    %cst_59 = arith.constant 1.000000e+00 : f32
    %277 = vector.broadcast %cst_59 : f32 to vector<1x128xf32>
    %278 = arith.addf %277, %276 : vector<1x128xf32>
    %279 = arith.divf %277, %278 : vector<1x128xf32>
    %cst_60 = arith.constant 2.000000e+00 : f32
    %280 = vector.broadcast %cst_60 : f32 to vector<1x128xf32>
    %281 = arith.mulf %280, %279 : vector<1x128xf32>
    %cst_61 = arith.constant 1.000000e+00 : f32
    %282 = vector.broadcast %cst_61 : f32 to vector<1x128xf32>
    %283 = arith.subf %281, %282 : vector<1x128xf32>
    %284 = arith.select %5, %283, %279 : vector<1x128xi1>, vector<1x128xf32>
    %285 = vector.extract_strided_slice %284 {offsets = [0, 0], sizes = [1, 32], strides = [1, 1]} : vector<1x128xf32> to vector<1x32xf32>
    %286 = vector.extract_strided_slice %284 {offsets = [0, 32], sizes = [1, 32], strides = [1, 1]} : vector<1x128xf32> to vector<1x32xf32>
    %287 = vector.extract_strided_slice %284 {offsets = [0, 64], sizes = [1, 32], strides = [1, 1]} : vector<1x128xf32> to vector<1x32xf32>
    %288 = vector.extract_strided_slice %284 {offsets = [0, 96], sizes = [1, 32], strides = [1, 1]} : vector<1x128xf32> to vector<1x32xf32>
    %289 = arith.mulf %286, %269 : vector<1x32xf32>
    %290 = arith.mulf %285, %287 : vector<1x32xf32>
    %291 = arith.addf %289, %290 : vector<1x32xf32>
    %292 = math.tanh %291 : vector<1x32xf32>
    %293 = arith.mulf %288, %292 : vector<1x32xf32>
    %294 = vector.extract_strided_slice %25 {offsets = [12, 0], sizes = [1, 128], strides = [1, 1]} : vector<16x128xf32> to vector<1x128xf32>
    %cst_62 = arith.constant dense<0.000000e+00> : vector<1x128xf32>
    %295 = tpu.matmul %293, %27, %cst_62 {dimension_numbers = #tpu.dot_dimension_numbers<[1], [0], [0], [1], [0, 0, 1, 1], [], []>} : vector<1x32xf32>, vector<32x128xf32>, vector<1x128xf32> -> vector<1x128xf32>
    %296 = arith.addf %294, %295 : vector<1x128xf32>
    %297 = arith.negf %296 : vector<1x128xf32>
    %298 = math.exp %297 : vector<1x128xf32>
    %cst_63 = arith.constant 1.000000e+00 : f32
    %299 = vector.broadcast %cst_63 : f32 to vector<1x128xf32>
    %300 = arith.addf %299, %298 : vector<1x128xf32>
    %301 = arith.divf %299, %300 : vector<1x128xf32>
    %cst_64 = arith.constant 2.000000e+00 : f32
    %302 = vector.broadcast %cst_64 : f32 to vector<1x128xf32>
    %303 = arith.mulf %302, %301 : vector<1x128xf32>
    %cst_65 = arith.constant 1.000000e+00 : f32
    %304 = vector.broadcast %cst_65 : f32 to vector<1x128xf32>
    %305 = arith.subf %303, %304 : vector<1x128xf32>
    %306 = arith.select %5, %305, %301 : vector<1x128xi1>, vector<1x128xf32>
    %307 = vector.extract_strided_slice %306 {offsets = [0, 0], sizes = [1, 32], strides = [1, 1]} : vector<1x128xf32> to vector<1x32xf32>
    %308 = vector.extract_strided_slice %306 {offsets = [0, 32], sizes = [1, 32], strides = [1, 1]} : vector<1x128xf32> to vector<1x32xf32>
    %309 = vector.extract_strided_slice %306 {offsets = [0, 64], sizes = [1, 32], strides = [1, 1]} : vector<1x128xf32> to vector<1x32xf32>
    %310 = vector.extract_strided_slice %306 {offsets = [0, 96], sizes = [1, 32], strides = [1, 1]} : vector<1x128xf32> to vector<1x32xf32>
    %311 = arith.mulf %308, %291 : vector<1x32xf32>
    %312 = arith.mulf %307, %309 : vector<1x32xf32>
    %313 = arith.addf %311, %312 : vector<1x32xf32>
    %314 = math.tanh %313 : vector<1x32xf32>
    %315 = arith.mulf %310, %314 : vector<1x32xf32>
    %316 = vector.extract_strided_slice %25 {offsets = [13, 0], sizes = [1, 128], strides = [1, 1]} : vector<16x128xf32> to vector<1x128xf32>
    %cst_66 = arith.constant dense<0.000000e+00> : vector<1x128xf32>
    %317 = tpu.matmul %315, %27, %cst_66 {dimension_numbers = #tpu.dot_dimension_numbers<[1], [0], [0], [1], [0, 0, 1, 1], [], []>} : vector<1x32xf32>, vector<32x128xf32>, vector<1x128xf32> -> vector<1x128xf32>
    %318 = arith.addf %316, %317 : vector<1x128xf32>
    %319 = arith.negf %318 : vector<1x128xf32>
    %320 = math.exp %319 : vector<1x128xf32>
    %cst_67 = arith.constant 1.000000e+00 : f32
    %321 = vector.broadcast %cst_67 : f32 to vector<1x128xf32>
    %322 = arith.addf %321, %320 : vector<1x128xf32>
    %323 = arith.divf %321, %322 : vector<1x128xf32>
    %cst_68 = arith.constant 2.000000e+00 : f32
    %324 = vector.broadcast %cst_68 : f32 to vector<1x128xf32>
    %325 = arith.mulf %324, %323 : vector<1x128xf32>
    %cst_69 = arith.constant 1.000000e+00 : f32
    %326 = vector.broadcast %cst_69 : f32 to vector<1x128xf32>
    %327 = arith.subf %325, %326 : vector<1x128xf32>
    %328 = arith.select %5, %327, %323 : vector<1x128xi1>, vector<1x128xf32>
    %329 = vector.extract_strided_slice %328 {offsets = [0, 0], sizes = [1, 32], strides = [1, 1]} : vector<1x128xf32> to vector<1x32xf32>
    %330 = vector.extract_strided_slice %328 {offsets = [0, 32], sizes = [1, 32], strides = [1, 1]} : vector<1x128xf32> to vector<1x32xf32>
    %331 = vector.extract_strided_slice %328 {offsets = [0, 64], sizes = [1, 32], strides = [1, 1]} : vector<1x128xf32> to vector<1x32xf32>
    %332 = vector.extract_strided_slice %328 {offsets = [0, 96], sizes = [1, 32], strides = [1, 1]} : vector<1x128xf32> to vector<1x32xf32>
    %333 = arith.mulf %330, %313 : vector<1x32xf32>
    %334 = arith.mulf %329, %331 : vector<1x32xf32>
    %335 = arith.addf %333, %334 : vector<1x32xf32>
    %336 = math.tanh %335 : vector<1x32xf32>
    %337 = arith.mulf %332, %336 : vector<1x32xf32>
    %338 = vector.extract_strided_slice %25 {offsets = [14, 0], sizes = [1, 128], strides = [1, 1]} : vector<16x128xf32> to vector<1x128xf32>
    %cst_70 = arith.constant dense<0.000000e+00> : vector<1x128xf32>
    %339 = tpu.matmul %337, %27, %cst_70 {dimension_numbers = #tpu.dot_dimension_numbers<[1], [0], [0], [1], [0, 0, 1, 1], [], []>} : vector<1x32xf32>, vector<32x128xf32>, vector<1x128xf32> -> vector<1x128xf32>
    %340 = arith.addf %338, %339 : vector<1x128xf32>
    %341 = arith.negf %340 : vector<1x128xf32>
    %342 = math.exp %341 : vector<1x128xf32>
    %cst_71 = arith.constant 1.000000e+00 : f32
    %343 = vector.broadcast %cst_71 : f32 to vector<1x128xf32>
    %344 = arith.addf %343, %342 : vector<1x128xf32>
    %345 = arith.divf %343, %344 : vector<1x128xf32>
    %cst_72 = arith.constant 2.000000e+00 : f32
    %346 = vector.broadcast %cst_72 : f32 to vector<1x128xf32>
    %347 = arith.mulf %346, %345 : vector<1x128xf32>
    %cst_73 = arith.constant 1.000000e+00 : f32
    %348 = vector.broadcast %cst_73 : f32 to vector<1x128xf32>
    %349 = arith.subf %347, %348 : vector<1x128xf32>
    %350 = arith.select %5, %349, %345 : vector<1x128xi1>, vector<1x128xf32>
    %351 = vector.extract_strided_slice %350 {offsets = [0, 0], sizes = [1, 32], strides = [1, 1]} : vector<1x128xf32> to vector<1x32xf32>
    %352 = vector.extract_strided_slice %350 {offsets = [0, 32], sizes = [1, 32], strides = [1, 1]} : vector<1x128xf32> to vector<1x32xf32>
    %353 = vector.extract_strided_slice %350 {offsets = [0, 64], sizes = [1, 32], strides = [1, 1]} : vector<1x128xf32> to vector<1x32xf32>
    %354 = vector.extract_strided_slice %350 {offsets = [0, 96], sizes = [1, 32], strides = [1, 1]} : vector<1x128xf32> to vector<1x32xf32>
    %355 = arith.mulf %352, %335 : vector<1x32xf32>
    %356 = arith.mulf %351, %353 : vector<1x32xf32>
    %357 = arith.addf %355, %356 : vector<1x32xf32>
    %358 = math.tanh %357 : vector<1x32xf32>
    %359 = arith.mulf %354, %358 : vector<1x32xf32>
    %360 = vector.extract_strided_slice %25 {offsets = [15, 0], sizes = [1, 128], strides = [1, 1]} : vector<16x128xf32> to vector<1x128xf32>
    %cst_74 = arith.constant dense<0.000000e+00> : vector<1x128xf32>
    %361 = tpu.matmul %359, %27, %cst_74 {dimension_numbers = #tpu.dot_dimension_numbers<[1], [0], [0], [1], [0, 0, 1, 1], [], []>} : vector<1x32xf32>, vector<32x128xf32>, vector<1x128xf32> -> vector<1x128xf32>
    %362 = arith.addf %360, %361 : vector<1x128xf32>
    %363 = arith.negf %362 : vector<1x128xf32>
    %364 = math.exp %363 : vector<1x128xf32>
    %cst_75 = arith.constant 1.000000e+00 : f32
    %365 = vector.broadcast %cst_75 : f32 to vector<1x128xf32>
    %366 = arith.addf %365, %364 : vector<1x128xf32>
    %367 = arith.divf %365, %366 : vector<1x128xf32>
    %cst_76 = arith.constant 2.000000e+00 : f32
    %368 = vector.broadcast %cst_76 : f32 to vector<1x128xf32>
    %369 = arith.mulf %368, %367 : vector<1x128xf32>
    %cst_77 = arith.constant 1.000000e+00 : f32
    %370 = vector.broadcast %cst_77 : f32 to vector<1x128xf32>
    %371 = arith.subf %369, %370 : vector<1x128xf32>
    %372 = arith.select %5, %371, %367 : vector<1x128xi1>, vector<1x128xf32>
    %373 = vector.extract_strided_slice %372 {offsets = [0, 0], sizes = [1, 32], strides = [1, 1]} : vector<1x128xf32> to vector<1x32xf32>
    %374 = vector.extract_strided_slice %372 {offsets = [0, 32], sizes = [1, 32], strides = [1, 1]} : vector<1x128xf32> to vector<1x32xf32>
    %375 = vector.extract_strided_slice %372 {offsets = [0, 64], sizes = [1, 32], strides = [1, 1]} : vector<1x128xf32> to vector<1x32xf32>
    %376 = vector.extract_strided_slice %372 {offsets = [0, 96], sizes = [1, 32], strides = [1, 1]} : vector<1x128xf32> to vector<1x32xf32>
    %377 = arith.mulf %374, %357 : vector<1x32xf32>
    %378 = arith.mulf %373, %375 : vector<1x32xf32>
    %379 = arith.addf %377, %378 : vector<1x32xf32>
    %380 = math.tanh %379 : vector<1x32xf32>
    %381 = arith.mulf %376, %380 : vector<1x32xf32>
    %cst_78 = arith.constant 0.000000e+00 : f32
    %382 = vector.broadcast %cst_78 : f32 to vector<16x32xf32>
    %c0_i32_79 = arith.constant 0 : i32
    %383 = vector.broadcast %c0_i32_79 : i32 to vector<16x1xi32>
    %384 = arith.cmpi eq, %6, %383 : vector<16x1xi32>
    %385 = vector.shape_cast %384 : vector<16x1xi1> to vector<16x1xi1>
    %386 = vector.broadcast %385 : vector<16x1xi1> to vector<16x32xi1>
    %387 = vector.shape_cast %51 : vector<1x32xf32> to vector<1x32xf32>
    %388 = vector.broadcast %387 : vector<1x32xf32> to vector<16x32xf32>
    %389 = arith.select %386, %388, %382 : vector<16x32xi1>, vector<16x32xf32>
    %c1_i32 = arith.constant 1 : i32
    %390 = vector.broadcast %c1_i32 : i32 to vector<16x1xi32>
    %391 = arith.cmpi eq, %6, %390 : vector<16x1xi32>
    %392 = vector.shape_cast %391 : vector<16x1xi1> to vector<16x1xi1>
    %393 = vector.broadcast %392 : vector<16x1xi1> to vector<16x32xi1>
    %394 = vector.shape_cast %73 : vector<1x32xf32> to vector<1x32xf32>
    %395 = vector.broadcast %394 : vector<1x32xf32> to vector<16x32xf32>
    %396 = arith.select %393, %395, %389 : vector<16x32xi1>, vector<16x32xf32>
    %c2_i32 = arith.constant 2 : i32
    %397 = vector.broadcast %c2_i32 : i32 to vector<16x1xi32>
    %398 = arith.cmpi eq, %6, %397 : vector<16x1xi32>
    %399 = vector.shape_cast %398 : vector<16x1xi1> to vector<16x1xi1>
    %400 = vector.broadcast %399 : vector<16x1xi1> to vector<16x32xi1>
    %401 = vector.shape_cast %95 : vector<1x32xf32> to vector<1x32xf32>
    %402 = vector.broadcast %401 : vector<1x32xf32> to vector<16x32xf32>
    %403 = arith.select %400, %402, %396 : vector<16x32xi1>, vector<16x32xf32>
    %c3_i32 = arith.constant 3 : i32
    %404 = vector.broadcast %c3_i32 : i32 to vector<16x1xi32>
    %405 = arith.cmpi eq, %6, %404 : vector<16x1xi32>
    %406 = vector.shape_cast %405 : vector<16x1xi1> to vector<16x1xi1>
    %407 = vector.broadcast %406 : vector<16x1xi1> to vector<16x32xi1>
    %408 = vector.shape_cast %117 : vector<1x32xf32> to vector<1x32xf32>
    %409 = vector.broadcast %408 : vector<1x32xf32> to vector<16x32xf32>
    %410 = arith.select %407, %409, %403 : vector<16x32xi1>, vector<16x32xf32>
    %c4_i32 = arith.constant 4 : i32
    %411 = vector.broadcast %c4_i32 : i32 to vector<16x1xi32>
    %412 = arith.cmpi eq, %6, %411 : vector<16x1xi32>
    %413 = vector.shape_cast %412 : vector<16x1xi1> to vector<16x1xi1>
    %414 = vector.broadcast %413 : vector<16x1xi1> to vector<16x32xi1>
    %415 = vector.shape_cast %139 : vector<1x32xf32> to vector<1x32xf32>
    %416 = vector.broadcast %415 : vector<1x32xf32> to vector<16x32xf32>
    %417 = arith.select %414, %416, %410 : vector<16x32xi1>, vector<16x32xf32>
    %c5_i32 = arith.constant 5 : i32
    %418 = vector.broadcast %c5_i32 : i32 to vector<16x1xi32>
    %419 = arith.cmpi eq, %6, %418 : vector<16x1xi32>
    %420 = vector.shape_cast %419 : vector<16x1xi1> to vector<16x1xi1>
    %421 = vector.broadcast %420 : vector<16x1xi1> to vector<16x32xi1>
    %422 = vector.shape_cast %161 : vector<1x32xf32> to vector<1x32xf32>
    %423 = vector.broadcast %422 : vector<1x32xf32> to vector<16x32xf32>
    %424 = arith.select %421, %423, %417 : vector<16x32xi1>, vector<16x32xf32>
    %c6_i32 = arith.constant 6 : i32
    %425 = vector.broadcast %c6_i32 : i32 to vector<16x1xi32>
    %426 = arith.cmpi eq, %6, %425 : vector<16x1xi32>
    %427 = vector.shape_cast %426 : vector<16x1xi1> to vector<16x1xi1>
    %428 = vector.broadcast %427 : vector<16x1xi1> to vector<16x32xi1>
    %429 = vector.shape_cast %183 : vector<1x32xf32> to vector<1x32xf32>
    %430 = vector.broadcast %429 : vector<1x32xf32> to vector<16x32xf32>
    %431 = arith.select %428, %430, %424 : vector<16x32xi1>, vector<16x32xf32>
    %c7_i32 = arith.constant 7 : i32
    %432 = vector.broadcast %c7_i32 : i32 to vector<16x1xi32>
    %433 = arith.cmpi eq, %6, %432 : vector<16x1xi32>
    %434 = vector.shape_cast %433 : vector<16x1xi1> to vector<16x1xi1>
    %435 = vector.broadcast %434 : vector<16x1xi1> to vector<16x32xi1>
    %436 = vector.shape_cast %205 : vector<1x32xf32> to vector<1x32xf32>
    %437 = vector.broadcast %436 : vector<1x32xf32> to vector<16x32xf32>
    %438 = arith.select %435, %437, %431 : vector<16x32xi1>, vector<16x32xf32>
    %c8_i32 = arith.constant 8 : i32
    %439 = vector.broadcast %c8_i32 : i32 to vector<16x1xi32>
    %440 = arith.cmpi eq, %6, %439 : vector<16x1xi32>
    %441 = vector.shape_cast %440 : vector<16x1xi1> to vector<16x1xi1>
    %442 = vector.broadcast %441 : vector<16x1xi1> to vector<16x32xi1>
    %443 = vector.shape_cast %227 : vector<1x32xf32> to vector<1x32xf32>
    %444 = vector.broadcast %443 : vector<1x32xf32> to vector<16x32xf32>
    %445 = arith.select %442, %444, %438 : vector<16x32xi1>, vector<16x32xf32>
    %c9_i32 = arith.constant 9 : i32
    %446 = vector.broadcast %c9_i32 : i32 to vector<16x1xi32>
    %447 = arith.cmpi eq, %6, %446 : vector<16x1xi32>
    %448 = vector.shape_cast %447 : vector<16x1xi1> to vector<16x1xi1>
    %449 = vector.broadcast %448 : vector<16x1xi1> to vector<16x32xi1>
    %450 = vector.shape_cast %249 : vector<1x32xf32> to vector<1x32xf32>
    %451 = vector.broadcast %450 : vector<1x32xf32> to vector<16x32xf32>
    %452 = arith.select %449, %451, %445 : vector<16x32xi1>, vector<16x32xf32>
    %c10_i32 = arith.constant 10 : i32
    %453 = vector.broadcast %c10_i32 : i32 to vector<16x1xi32>
    %454 = arith.cmpi eq, %6, %453 : vector<16x1xi32>
    %455 = vector.shape_cast %454 : vector<16x1xi1> to vector<16x1xi1>
    %456 = vector.broadcast %455 : vector<16x1xi1> to vector<16x32xi1>
    %457 = vector.shape_cast %271 : vector<1x32xf32> to vector<1x32xf32>
    %458 = vector.broadcast %457 : vector<1x32xf32> to vector<16x32xf32>
    %459 = arith.select %456, %458, %452 : vector<16x32xi1>, vector<16x32xf32>
    %c11_i32 = arith.constant 11 : i32
    %460 = vector.broadcast %c11_i32 : i32 to vector<16x1xi32>
    %461 = arith.cmpi eq, %6, %460 : vector<16x1xi32>
    %462 = vector.shape_cast %461 : vector<16x1xi1> to vector<16x1xi1>
    %463 = vector.broadcast %462 : vector<16x1xi1> to vector<16x32xi1>
    %464 = vector.shape_cast %293 : vector<1x32xf32> to vector<1x32xf32>
    %465 = vector.broadcast %464 : vector<1x32xf32> to vector<16x32xf32>
    %466 = arith.select %463, %465, %459 : vector<16x32xi1>, vector<16x32xf32>
    %c12_i32 = arith.constant 12 : i32
    %467 = vector.broadcast %c12_i32 : i32 to vector<16x1xi32>
    %468 = arith.cmpi eq, %6, %467 : vector<16x1xi32>
    %469 = vector.shape_cast %468 : vector<16x1xi1> to vector<16x1xi1>
    %470 = vector.broadcast %469 : vector<16x1xi1> to vector<16x32xi1>
    %471 = vector.shape_cast %315 : vector<1x32xf32> to vector<1x32xf32>
    %472 = vector.broadcast %471 : vector<1x32xf32> to vector<16x32xf32>
    %473 = arith.select %470, %472, %466 : vector<16x32xi1>, vector<16x32xf32>
    %c13_i32 = arith.constant 13 : i32
    %474 = vector.broadcast %c13_i32 : i32 to vector<16x1xi32>
    %475 = arith.cmpi eq, %6, %474 : vector<16x1xi32>
    %476 = vector.shape_cast %475 : vector<16x1xi1> to vector<16x1xi1>
    %477 = vector.broadcast %476 : vector<16x1xi1> to vector<16x32xi1>
    %478 = vector.shape_cast %337 : vector<1x32xf32> to vector<1x32xf32>
    %479 = vector.broadcast %478 : vector<1x32xf32> to vector<16x32xf32>
    %480 = arith.select %477, %479, %473 : vector<16x32xi1>, vector<16x32xf32>
    %c14_i32 = arith.constant 14 : i32
    %481 = vector.broadcast %c14_i32 : i32 to vector<16x1xi32>
    %482 = arith.cmpi eq, %6, %481 : vector<16x1xi32>
    %483 = vector.shape_cast %482 : vector<16x1xi1> to vector<16x1xi1>
    %484 = vector.broadcast %483 : vector<16x1xi1> to vector<16x32xi1>
    %485 = vector.shape_cast %359 : vector<1x32xf32> to vector<1x32xf32>
    %486 = vector.broadcast %485 : vector<1x32xf32> to vector<16x32xf32>
    %487 = arith.select %484, %486, %480 : vector<16x32xi1>, vector<16x32xf32>
    %c15_i32 = arith.constant 15 : i32
    %488 = vector.broadcast %c15_i32 : i32 to vector<16x1xi32>
    %489 = arith.cmpi eq, %6, %488 : vector<16x1xi32>
    %490 = vector.shape_cast %489 : vector<16x1xi1> to vector<16x1xi1>
    %491 = vector.broadcast %490 : vector<16x1xi1> to vector<16x32xi1>
    %492 = vector.shape_cast %381 : vector<1x32xf32> to vector<1x32xf32>
    %493 = vector.broadcast %492 : vector<1x32xf32> to vector<16x32xf32>
    %494 = arith.select %491, %493, %487 : vector<16x32xi1>, vector<16x32xf32>
    %c0_80 = arith.constant 0 : index
    %c0_81 = arith.constant 0 : index
    %c0_82 = arith.constant 0 : index
    %495 = vector.load %arg3[%c0_80, %c0_81, %c0_82] : memref<1x32x128xf32, #tpu.memory_space<vmem>>, vector<1x32x128xf32>
    %496 = vector.shape_cast %495 : vector<1x32x128xf32> to vector<32x128xf32>
    %cst_83 = arith.constant dense<0.000000e+00> : vector<16x128xf32>
    %497 = tpu.matmul %494, %496, %cst_83 {dimension_numbers = #tpu.dot_dimension_numbers<[1], [0], [0], [1], [0, 0, 1, 1], [], []>} : vector<16x32xf32>, vector<32x128xf32>, vector<16x128xf32> -> vector<16x128xf32>
    %c0_84 = arith.constant 0 : index
    %c0_85 = arith.constant 0 : index
    %c0_86 = arith.constant 0 : index
    %498 = vector.load %arg5[%c0_84, %c0_85, %c0_86] : memref<1x1x128xf32, #tpu.memory_space<vmem>>, vector<1x1x128xf32>
    %499 = vector.shape_cast %498 : vector<1x1x128xf32> to vector<1x128xf32>
    %500 = vector.broadcast %499 : vector<1x128xf32> to vector<16x128xf32>
    %501 = arith.addf %497, %500 : vector<16x128xf32>
    %c1 = arith.constant 1 : index
    %c0_87 = arith.constant 0 : index
    %c0_88 = arith.constant 0 : index
    %502 = vector.load %arg4[%c1, %c0_87, %c0_88] : memref<2x32x128xf32, #tpu.memory_space<vmem>>, vector<1x32x128xf32>
    %503 = vector.shape_cast %502 : vector<1x32x128xf32> to vector<32x128xf32>
    %cst_89 = arith.constant 0.000000e+00 : f32
    %504 = vector.broadcast %cst_89 : f32 to vector<1x32xf32>
    %cst_90 = arith.constant 0.000000e+00 : f32
    %505 = vector.broadcast %cst_90 : f32 to vector<1x32xf32>
    %506 = vector.extract_strided_slice %501 {offsets = [0, 0], sizes = [1, 128], strides = [1, 1]} : vector<16x128xf32> to vector<1x128xf32>
    %cst_91 = arith.constant dense<0.000000e+00> : vector<1x128xf32>
    %507 = tpu.matmul %504, %503, %cst_91 {dimension_numbers = #tpu.dot_dimension_numbers<[1], [0], [0], [1], [0, 0, 1, 1], [], []>} : vector<1x32xf32>, vector<32x128xf32>, vector<1x128xf32> -> vector<1x128xf32>
    %508 = arith.addf %506, %507 : vector<1x128xf32>
    %509 = arith.negf %508 : vector<1x128xf32>
    %510 = math.exp %509 : vector<1x128xf32>
    %cst_92 = arith.constant 1.000000e+00 : f32
    %511 = vector.broadcast %cst_92 : f32 to vector<1x128xf32>
    %512 = arith.addf %511, %510 : vector<1x128xf32>
    %513 = arith.divf %511, %512 : vector<1x128xf32>
    %cst_93 = arith.constant 2.000000e+00 : f32
    %514 = vector.broadcast %cst_93 : f32 to vector<1x128xf32>
    %515 = arith.mulf %514, %513 : vector<1x128xf32>
    %cst_94 = arith.constant 1.000000e+00 : f32
    %516 = vector.broadcast %cst_94 : f32 to vector<1x128xf32>
    %517 = arith.subf %515, %516 : vector<1x128xf32>
    %518 = arith.select %5, %517, %513 : vector<1x128xi1>, vector<1x128xf32>
    %519 = vector.extract_strided_slice %518 {offsets = [0, 0], sizes = [1, 32], strides = [1, 1]} : vector<1x128xf32> to vector<1x32xf32>
    %520 = vector.extract_strided_slice %518 {offsets = [0, 32], sizes = [1, 32], strides = [1, 1]} : vector<1x128xf32> to vector<1x32xf32>
    %521 = vector.extract_strided_slice %518 {offsets = [0, 64], sizes = [1, 32], strides = [1, 1]} : vector<1x128xf32> to vector<1x32xf32>
    %522 = vector.extract_strided_slice %518 {offsets = [0, 96], sizes = [1, 32], strides = [1, 1]} : vector<1x128xf32> to vector<1x32xf32>
    %523 = arith.mulf %520, %505 : vector<1x32xf32>
    %524 = arith.mulf %519, %521 : vector<1x32xf32>
    %525 = arith.addf %523, %524 : vector<1x32xf32>
    %526 = math.tanh %525 : vector<1x32xf32>
    %527 = arith.mulf %522, %526 : vector<1x32xf32>
    %528 = vector.extract_strided_slice %501 {offsets = [1, 0], sizes = [1, 128], strides = [1, 1]} : vector<16x128xf32> to vector<1x128xf32>
    %cst_95 = arith.constant dense<0.000000e+00> : vector<1x128xf32>
    %529 = tpu.matmul %527, %503, %cst_95 {dimension_numbers = #tpu.dot_dimension_numbers<[1], [0], [0], [1], [0, 0, 1, 1], [], []>} : vector<1x32xf32>, vector<32x128xf32>, vector<1x128xf32> -> vector<1x128xf32>
    %530 = arith.addf %528, %529 : vector<1x128xf32>
    %531 = arith.negf %530 : vector<1x128xf32>
    %532 = math.exp %531 : vector<1x128xf32>
    %cst_96 = arith.constant 1.000000e+00 : f32
    %533 = vector.broadcast %cst_96 : f32 to vector<1x128xf32>
    %534 = arith.addf %533, %532 : vector<1x128xf32>
    %535 = arith.divf %533, %534 : vector<1x128xf32>
    %cst_97 = arith.constant 2.000000e+00 : f32
    %536 = vector.broadcast %cst_97 : f32 to vector<1x128xf32>
    %537 = arith.mulf %536, %535 : vector<1x128xf32>
    %cst_98 = arith.constant 1.000000e+00 : f32
    %538 = vector.broadcast %cst_98 : f32 to vector<1x128xf32>
    %539 = arith.subf %537, %538 : vector<1x128xf32>
    %540 = arith.select %5, %539, %535 : vector<1x128xi1>, vector<1x128xf32>
    %541 = vector.extract_strided_slice %540 {offsets = [0, 0], sizes = [1, 32], strides = [1, 1]} : vector<1x128xf32> to vector<1x32xf32>
    %542 = vector.extract_strided_slice %540 {offsets = [0, 32], sizes = [1, 32], strides = [1, 1]} : vector<1x128xf32> to vector<1x32xf32>
    %543 = vector.extract_strided_slice %540 {offsets = [0, 64], sizes = [1, 32], strides = [1, 1]} : vector<1x128xf32> to vector<1x32xf32>
    %544 = vector.extract_strided_slice %540 {offsets = [0, 96], sizes = [1, 32], strides = [1, 1]} : vector<1x128xf32> to vector<1x32xf32>
    %545 = arith.mulf %542, %525 : vector<1x32xf32>
    %546 = arith.mulf %541, %543 : vector<1x32xf32>
    %547 = arith.addf %545, %546 : vector<1x32xf32>
    %548 = math.tanh %547 : vector<1x32xf32>
    %549 = arith.mulf %544, %548 : vector<1x32xf32>
    %550 = vector.extract_strided_slice %501 {offsets = [2, 0], sizes = [1, 128], strides = [1, 1]} : vector<16x128xf32> to vector<1x128xf32>
    %cst_99 = arith.constant dense<0.000000e+00> : vector<1x128xf32>
    %551 = tpu.matmul %549, %503, %cst_99 {dimension_numbers = #tpu.dot_dimension_numbers<[1], [0], [0], [1], [0, 0, 1, 1], [], []>} : vector<1x32xf32>, vector<32x128xf32>, vector<1x128xf32> -> vector<1x128xf32>
    %552 = arith.addf %550, %551 : vector<1x128xf32>
    %553 = arith.negf %552 : vector<1x128xf32>
    %554 = math.exp %553 : vector<1x128xf32>
    %cst_100 = arith.constant 1.000000e+00 : f32
    %555 = vector.broadcast %cst_100 : f32 to vector<1x128xf32>
    %556 = arith.addf %555, %554 : vector<1x128xf32>
    %557 = arith.divf %555, %556 : vector<1x128xf32>
    %cst_101 = arith.constant 2.000000e+00 : f32
    %558 = vector.broadcast %cst_101 : f32 to vector<1x128xf32>
    %559 = arith.mulf %558, %557 : vector<1x128xf32>
    %cst_102 = arith.constant 1.000000e+00 : f32
    %560 = vector.broadcast %cst_102 : f32 to vector<1x128xf32>
    %561 = arith.subf %559, %560 : vector<1x128xf32>
    %562 = arith.select %5, %561, %557 : vector<1x128xi1>, vector<1x128xf32>
    %563 = vector.extract_strided_slice %562 {offsets = [0, 0], sizes = [1, 32], strides = [1, 1]} : vector<1x128xf32> to vector<1x32xf32>
    %564 = vector.extract_strided_slice %562 {offsets = [0, 32], sizes = [1, 32], strides = [1, 1]} : vector<1x128xf32> to vector<1x32xf32>
    %565 = vector.extract_strided_slice %562 {offsets = [0, 64], sizes = [1, 32], strides = [1, 1]} : vector<1x128xf32> to vector<1x32xf32>
    %566 = vector.extract_strided_slice %562 {offsets = [0, 96], sizes = [1, 32], strides = [1, 1]} : vector<1x128xf32> to vector<1x32xf32>
    %567 = arith.mulf %564, %547 : vector<1x32xf32>
    %568 = arith.mulf %563, %565 : vector<1x32xf32>
    %569 = arith.addf %567, %568 : vector<1x32xf32>
    %570 = math.tanh %569 : vector<1x32xf32>
    %571 = arith.mulf %566, %570 : vector<1x32xf32>
    %572 = vector.extract_strided_slice %501 {offsets = [3, 0], sizes = [1, 128], strides = [1, 1]} : vector<16x128xf32> to vector<1x128xf32>
    %cst_103 = arith.constant dense<0.000000e+00> : vector<1x128xf32>
    %573 = tpu.matmul %571, %503, %cst_103 {dimension_numbers = #tpu.dot_dimension_numbers<[1], [0], [0], [1], [0, 0, 1, 1], [], []>} : vector<1x32xf32>, vector<32x128xf32>, vector<1x128xf32> -> vector<1x128xf32>
    %574 = arith.addf %572, %573 : vector<1x128xf32>
    %575 = arith.negf %574 : vector<1x128xf32>
    %576 = math.exp %575 : vector<1x128xf32>
    %cst_104 = arith.constant 1.000000e+00 : f32
    %577 = vector.broadcast %cst_104 : f32 to vector<1x128xf32>
    %578 = arith.addf %577, %576 : vector<1x128xf32>
    %579 = arith.divf %577, %578 : vector<1x128xf32>
    %cst_105 = arith.constant 2.000000e+00 : f32
    %580 = vector.broadcast %cst_105 : f32 to vector<1x128xf32>
    %581 = arith.mulf %580, %579 : vector<1x128xf32>
    %cst_106 = arith.constant 1.000000e+00 : f32
    %582 = vector.broadcast %cst_106 : f32 to vector<1x128xf32>
    %583 = arith.subf %581, %582 : vector<1x128xf32>
    %584 = arith.select %5, %583, %579 : vector<1x128xi1>, vector<1x128xf32>
    %585 = vector.extract_strided_slice %584 {offsets = [0, 0], sizes = [1, 32], strides = [1, 1]} : vector<1x128xf32> to vector<1x32xf32>
    %586 = vector.extract_strided_slice %584 {offsets = [0, 32], sizes = [1, 32], strides = [1, 1]} : vector<1x128xf32> to vector<1x32xf32>
    %587 = vector.extract_strided_slice %584 {offsets = [0, 64], sizes = [1, 32], strides = [1, 1]} : vector<1x128xf32> to vector<1x32xf32>
    %588 = vector.extract_strided_slice %584 {offsets = [0, 96], sizes = [1, 32], strides = [1, 1]} : vector<1x128xf32> to vector<1x32xf32>
    %589 = arith.mulf %586, %569 : vector<1x32xf32>
    %590 = arith.mulf %585, %587 : vector<1x32xf32>
    %591 = arith.addf %589, %590 : vector<1x32xf32>
    %592 = math.tanh %591 : vector<1x32xf32>
    %593 = arith.mulf %588, %592 : vector<1x32xf32>
    %594 = vector.extract_strided_slice %501 {offsets = [4, 0], sizes = [1, 128], strides = [1, 1]} : vector<16x128xf32> to vector<1x128xf32>
    %cst_107 = arith.constant dense<0.000000e+00> : vector<1x128xf32>
    %595 = tpu.matmul %593, %503, %cst_107 {dimension_numbers = #tpu.dot_dimension_numbers<[1], [0], [0], [1], [0, 0, 1, 1], [], []>} : vector<1x32xf32>, vector<32x128xf32>, vector<1x128xf32> -> vector<1x128xf32>
    %596 = arith.addf %594, %595 : vector<1x128xf32>
    %597 = arith.negf %596 : vector<1x128xf32>
    %598 = math.exp %597 : vector<1x128xf32>
    %cst_108 = arith.constant 1.000000e+00 : f32
    %599 = vector.broadcast %cst_108 : f32 to vector<1x128xf32>
    %600 = arith.addf %599, %598 : vector<1x128xf32>
    %601 = arith.divf %599, %600 : vector<1x128xf32>
    %cst_109 = arith.constant 2.000000e+00 : f32
    %602 = vector.broadcast %cst_109 : f32 to vector<1x128xf32>
    %603 = arith.mulf %602, %601 : vector<1x128xf32>
    %cst_110 = arith.constant 1.000000e+00 : f32
    %604 = vector.broadcast %cst_110 : f32 to vector<1x128xf32>
    %605 = arith.subf %603, %604 : vector<1x128xf32>
    %606 = arith.select %5, %605, %601 : vector<1x128xi1>, vector<1x128xf32>
    %607 = vector.extract_strided_slice %606 {offsets = [0, 0], sizes = [1, 32], strides = [1, 1]} : vector<1x128xf32> to vector<1x32xf32>
    %608 = vector.extract_strided_slice %606 {offsets = [0, 32], sizes = [1, 32], strides = [1, 1]} : vector<1x128xf32> to vector<1x32xf32>
    %609 = vector.extract_strided_slice %606 {offsets = [0, 64], sizes = [1, 32], strides = [1, 1]} : vector<1x128xf32> to vector<1x32xf32>
    %610 = vector.extract_strided_slice %606 {offsets = [0, 96], sizes = [1, 32], strides = [1, 1]} : vector<1x128xf32> to vector<1x32xf32>
    %611 = arith.mulf %608, %591 : vector<1x32xf32>
    %612 = arith.mulf %607, %609 : vector<1x32xf32>
    %613 = arith.addf %611, %612 : vector<1x32xf32>
    %614 = math.tanh %613 : vector<1x32xf32>
    %615 = arith.mulf %610, %614 : vector<1x32xf32>
    %616 = vector.extract_strided_slice %501 {offsets = [5, 0], sizes = [1, 128], strides = [1, 1]} : vector<16x128xf32> to vector<1x128xf32>
    %cst_111 = arith.constant dense<0.000000e+00> : vector<1x128xf32>
    %617 = tpu.matmul %615, %503, %cst_111 {dimension_numbers = #tpu.dot_dimension_numbers<[1], [0], [0], [1], [0, 0, 1, 1], [], []>} : vector<1x32xf32>, vector<32x128xf32>, vector<1x128xf32> -> vector<1x128xf32>
    %618 = arith.addf %616, %617 : vector<1x128xf32>
    %619 = arith.negf %618 : vector<1x128xf32>
    %620 = math.exp %619 : vector<1x128xf32>
    %cst_112 = arith.constant 1.000000e+00 : f32
    %621 = vector.broadcast %cst_112 : f32 to vector<1x128xf32>
    %622 = arith.addf %621, %620 : vector<1x128xf32>
    %623 = arith.divf %621, %622 : vector<1x128xf32>
    %cst_113 = arith.constant 2.000000e+00 : f32
    %624 = vector.broadcast %cst_113 : f32 to vector<1x128xf32>
    %625 = arith.mulf %624, %623 : vector<1x128xf32>
    %cst_114 = arith.constant 1.000000e+00 : f32
    %626 = vector.broadcast %cst_114 : f32 to vector<1x128xf32>
    %627 = arith.subf %625, %626 : vector<1x128xf32>
    %628 = arith.select %5, %627, %623 : vector<1x128xi1>, vector<1x128xf32>
    %629 = vector.extract_strided_slice %628 {offsets = [0, 0], sizes = [1, 32], strides = [1, 1]} : vector<1x128xf32> to vector<1x32xf32>
    %630 = vector.extract_strided_slice %628 {offsets = [0, 32], sizes = [1, 32], strides = [1, 1]} : vector<1x128xf32> to vector<1x32xf32>
    %631 = vector.extract_strided_slice %628 {offsets = [0, 64], sizes = [1, 32], strides = [1, 1]} : vector<1x128xf32> to vector<1x32xf32>
    %632 = vector.extract_strided_slice %628 {offsets = [0, 96], sizes = [1, 32], strides = [1, 1]} : vector<1x128xf32> to vector<1x32xf32>
    %633 = arith.mulf %630, %613 : vector<1x32xf32>
    %634 = arith.mulf %629, %631 : vector<1x32xf32>
    %635 = arith.addf %633, %634 : vector<1x32xf32>
    %636 = math.tanh %635 : vector<1x32xf32>
    %637 = arith.mulf %632, %636 : vector<1x32xf32>
    %638 = vector.extract_strided_slice %501 {offsets = [6, 0], sizes = [1, 128], strides = [1, 1]} : vector<16x128xf32> to vector<1x128xf32>
    %cst_115 = arith.constant dense<0.000000e+00> : vector<1x128xf32>
    %639 = tpu.matmul %637, %503, %cst_115 {dimension_numbers = #tpu.dot_dimension_numbers<[1], [0], [0], [1], [0, 0, 1, 1], [], []>} : vector<1x32xf32>, vector<32x128xf32>, vector<1x128xf32> -> vector<1x128xf32>
    %640 = arith.addf %638, %639 : vector<1x128xf32>
    %641 = arith.negf %640 : vector<1x128xf32>
    %642 = math.exp %641 : vector<1x128xf32>
    %cst_116 = arith.constant 1.000000e+00 : f32
    %643 = vector.broadcast %cst_116 : f32 to vector<1x128xf32>
    %644 = arith.addf %643, %642 : vector<1x128xf32>
    %645 = arith.divf %643, %644 : vector<1x128xf32>
    %cst_117 = arith.constant 2.000000e+00 : f32
    %646 = vector.broadcast %cst_117 : f32 to vector<1x128xf32>
    %647 = arith.mulf %646, %645 : vector<1x128xf32>
    %cst_118 = arith.constant 1.000000e+00 : f32
    %648 = vector.broadcast %cst_118 : f32 to vector<1x128xf32>
    %649 = arith.subf %647, %648 : vector<1x128xf32>
    %650 = arith.select %5, %649, %645 : vector<1x128xi1>, vector<1x128xf32>
    %651 = vector.extract_strided_slice %650 {offsets = [0, 0], sizes = [1, 32], strides = [1, 1]} : vector<1x128xf32> to vector<1x32xf32>
    %652 = vector.extract_strided_slice %650 {offsets = [0, 32], sizes = [1, 32], strides = [1, 1]} : vector<1x128xf32> to vector<1x32xf32>
    %653 = vector.extract_strided_slice %650 {offsets = [0, 64], sizes = [1, 32], strides = [1, 1]} : vector<1x128xf32> to vector<1x32xf32>
    %654 = vector.extract_strided_slice %650 {offsets = [0, 96], sizes = [1, 32], strides = [1, 1]} : vector<1x128xf32> to vector<1x32xf32>
    %655 = arith.mulf %652, %635 : vector<1x32xf32>
    %656 = arith.mulf %651, %653 : vector<1x32xf32>
    %657 = arith.addf %655, %656 : vector<1x32xf32>
    %658 = math.tanh %657 : vector<1x32xf32>
    %659 = arith.mulf %654, %658 : vector<1x32xf32>
    %660 = vector.extract_strided_slice %501 {offsets = [7, 0], sizes = [1, 128], strides = [1, 1]} : vector<16x128xf32> to vector<1x128xf32>
    %cst_119 = arith.constant dense<0.000000e+00> : vector<1x128xf32>
    %661 = tpu.matmul %659, %503, %cst_119 {dimension_numbers = #tpu.dot_dimension_numbers<[1], [0], [0], [1], [0, 0, 1, 1], [], []>} : vector<1x32xf32>, vector<32x128xf32>, vector<1x128xf32> -> vector<1x128xf32>
    %662 = arith.addf %660, %661 : vector<1x128xf32>
    %663 = arith.negf %662 : vector<1x128xf32>
    %664 = math.exp %663 : vector<1x128xf32>
    %cst_120 = arith.constant 1.000000e+00 : f32
    %665 = vector.broadcast %cst_120 : f32 to vector<1x128xf32>
    %666 = arith.addf %665, %664 : vector<1x128xf32>
    %667 = arith.divf %665, %666 : vector<1x128xf32>
    %cst_121 = arith.constant 2.000000e+00 : f32
    %668 = vector.broadcast %cst_121 : f32 to vector<1x128xf32>
    %669 = arith.mulf %668, %667 : vector<1x128xf32>
    %cst_122 = arith.constant 1.000000e+00 : f32
    %670 = vector.broadcast %cst_122 : f32 to vector<1x128xf32>
    %671 = arith.subf %669, %670 : vector<1x128xf32>
    %672 = arith.select %5, %671, %667 : vector<1x128xi1>, vector<1x128xf32>
    %673 = vector.extract_strided_slice %672 {offsets = [0, 0], sizes = [1, 32], strides = [1, 1]} : vector<1x128xf32> to vector<1x32xf32>
    %674 = vector.extract_strided_slice %672 {offsets = [0, 32], sizes = [1, 32], strides = [1, 1]} : vector<1x128xf32> to vector<1x32xf32>
    %675 = vector.extract_strided_slice %672 {offsets = [0, 64], sizes = [1, 32], strides = [1, 1]} : vector<1x128xf32> to vector<1x32xf32>
    %676 = vector.extract_strided_slice %672 {offsets = [0, 96], sizes = [1, 32], strides = [1, 1]} : vector<1x128xf32> to vector<1x32xf32>
    %677 = arith.mulf %674, %657 : vector<1x32xf32>
    %678 = arith.mulf %673, %675 : vector<1x32xf32>
    %679 = arith.addf %677, %678 : vector<1x32xf32>
    %680 = math.tanh %679 : vector<1x32xf32>
    %681 = arith.mulf %676, %680 : vector<1x32xf32>
    %682 = vector.extract_strided_slice %501 {offsets = [8, 0], sizes = [1, 128], strides = [1, 1]} : vector<16x128xf32> to vector<1x128xf32>
    %cst_123 = arith.constant dense<0.000000e+00> : vector<1x128xf32>
    %683 = tpu.matmul %681, %503, %cst_123 {dimension_numbers = #tpu.dot_dimension_numbers<[1], [0], [0], [1], [0, 0, 1, 1], [], []>} : vector<1x32xf32>, vector<32x128xf32>, vector<1x128xf32> -> vector<1x128xf32>
    %684 = arith.addf %682, %683 : vector<1x128xf32>
    %685 = arith.negf %684 : vector<1x128xf32>
    %686 = math.exp %685 : vector<1x128xf32>
    %cst_124 = arith.constant 1.000000e+00 : f32
    %687 = vector.broadcast %cst_124 : f32 to vector<1x128xf32>
    %688 = arith.addf %687, %686 : vector<1x128xf32>
    %689 = arith.divf %687, %688 : vector<1x128xf32>
    %cst_125 = arith.constant 2.000000e+00 : f32
    %690 = vector.broadcast %cst_125 : f32 to vector<1x128xf32>
    %691 = arith.mulf %690, %689 : vector<1x128xf32>
    %cst_126 = arith.constant 1.000000e+00 : f32
    %692 = vector.broadcast %cst_126 : f32 to vector<1x128xf32>
    %693 = arith.subf %691, %692 : vector<1x128xf32>
    %694 = arith.select %5, %693, %689 : vector<1x128xi1>, vector<1x128xf32>
    %695 = vector.extract_strided_slice %694 {offsets = [0, 0], sizes = [1, 32], strides = [1, 1]} : vector<1x128xf32> to vector<1x32xf32>
    %696 = vector.extract_strided_slice %694 {offsets = [0, 32], sizes = [1, 32], strides = [1, 1]} : vector<1x128xf32> to vector<1x32xf32>
    %697 = vector.extract_strided_slice %694 {offsets = [0, 64], sizes = [1, 32], strides = [1, 1]} : vector<1x128xf32> to vector<1x32xf32>
    %698 = vector.extract_strided_slice %694 {offsets = [0, 96], sizes = [1, 32], strides = [1, 1]} : vector<1x128xf32> to vector<1x32xf32>
    %699 = arith.mulf %696, %679 : vector<1x32xf32>
    %700 = arith.mulf %695, %697 : vector<1x32xf32>
    %701 = arith.addf %699, %700 : vector<1x32xf32>
    %702 = math.tanh %701 : vector<1x32xf32>
    %703 = arith.mulf %698, %702 : vector<1x32xf32>
    %704 = vector.extract_strided_slice %501 {offsets = [9, 0], sizes = [1, 128], strides = [1, 1]} : vector<16x128xf32> to vector<1x128xf32>
    %cst_127 = arith.constant dense<0.000000e+00> : vector<1x128xf32>
    %705 = tpu.matmul %703, %503, %cst_127 {dimension_numbers = #tpu.dot_dimension_numbers<[1], [0], [0], [1], [0, 0, 1, 1], [], []>} : vector<1x32xf32>, vector<32x128xf32>, vector<1x128xf32> -> vector<1x128xf32>
    %706 = arith.addf %704, %705 : vector<1x128xf32>
    %707 = arith.negf %706 : vector<1x128xf32>
    %708 = math.exp %707 : vector<1x128xf32>
    %cst_128 = arith.constant 1.000000e+00 : f32
    %709 = vector.broadcast %cst_128 : f32 to vector<1x128xf32>
    %710 = arith.addf %709, %708 : vector<1x128xf32>
    %711 = arith.divf %709, %710 : vector<1x128xf32>
    %cst_129 = arith.constant 2.000000e+00 : f32
    %712 = vector.broadcast %cst_129 : f32 to vector<1x128xf32>
    %713 = arith.mulf %712, %711 : vector<1x128xf32>
    %cst_130 = arith.constant 1.000000e+00 : f32
    %714 = vector.broadcast %cst_130 : f32 to vector<1x128xf32>
    %715 = arith.subf %713, %714 : vector<1x128xf32>
    %716 = arith.select %5, %715, %711 : vector<1x128xi1>, vector<1x128xf32>
    %717 = vector.extract_strided_slice %716 {offsets = [0, 0], sizes = [1, 32], strides = [1, 1]} : vector<1x128xf32> to vector<1x32xf32>
    %718 = vector.extract_strided_slice %716 {offsets = [0, 32], sizes = [1, 32], strides = [1, 1]} : vector<1x128xf32> to vector<1x32xf32>
    %719 = vector.extract_strided_slice %716 {offsets = [0, 64], sizes = [1, 32], strides = [1, 1]} : vector<1x128xf32> to vector<1x32xf32>
    %720 = vector.extract_strided_slice %716 {offsets = [0, 96], sizes = [1, 32], strides = [1, 1]} : vector<1x128xf32> to vector<1x32xf32>
    %721 = arith.mulf %718, %701 : vector<1x32xf32>
    %722 = arith.mulf %717, %719 : vector<1x32xf32>
    %723 = arith.addf %721, %722 : vector<1x32xf32>
    %724 = math.tanh %723 : vector<1x32xf32>
    %725 = arith.mulf %720, %724 : vector<1x32xf32>
    %726 = vector.extract_strided_slice %501 {offsets = [10, 0], sizes = [1, 128], strides = [1, 1]} : vector<16x128xf32> to vector<1x128xf32>
    %cst_131 = arith.constant dense<0.000000e+00> : vector<1x128xf32>
    %727 = tpu.matmul %725, %503, %cst_131 {dimension_numbers = #tpu.dot_dimension_numbers<[1], [0], [0], [1], [0, 0, 1, 1], [], []>} : vector<1x32xf32>, vector<32x128xf32>, vector<1x128xf32> -> vector<1x128xf32>
    %728 = arith.addf %726, %727 : vector<1x128xf32>
    %729 = arith.negf %728 : vector<1x128xf32>
    %730 = math.exp %729 : vector<1x128xf32>
    %cst_132 = arith.constant 1.000000e+00 : f32
    %731 = vector.broadcast %cst_132 : f32 to vector<1x128xf32>
    %732 = arith.addf %731, %730 : vector<1x128xf32>
    %733 = arith.divf %731, %732 : vector<1x128xf32>
    %cst_133 = arith.constant 2.000000e+00 : f32
    %734 = vector.broadcast %cst_133 : f32 to vector<1x128xf32>
    %735 = arith.mulf %734, %733 : vector<1x128xf32>
    %cst_134 = arith.constant 1.000000e+00 : f32
    %736 = vector.broadcast %cst_134 : f32 to vector<1x128xf32>
    %737 = arith.subf %735, %736 : vector<1x128xf32>
    %738 = arith.select %5, %737, %733 : vector<1x128xi1>, vector<1x128xf32>
    %739 = vector.extract_strided_slice %738 {offsets = [0, 0], sizes = [1, 32], strides = [1, 1]} : vector<1x128xf32> to vector<1x32xf32>
    %740 = vector.extract_strided_slice %738 {offsets = [0, 32], sizes = [1, 32], strides = [1, 1]} : vector<1x128xf32> to vector<1x32xf32>
    %741 = vector.extract_strided_slice %738 {offsets = [0, 64], sizes = [1, 32], strides = [1, 1]} : vector<1x128xf32> to vector<1x32xf32>
    %742 = vector.extract_strided_slice %738 {offsets = [0, 96], sizes = [1, 32], strides = [1, 1]} : vector<1x128xf32> to vector<1x32xf32>
    %743 = arith.mulf %740, %723 : vector<1x32xf32>
    %744 = arith.mulf %739, %741 : vector<1x32xf32>
    %745 = arith.addf %743, %744 : vector<1x32xf32>
    %746 = math.tanh %745 : vector<1x32xf32>
    %747 = arith.mulf %742, %746 : vector<1x32xf32>
    %748 = vector.extract_strided_slice %501 {offsets = [11, 0], sizes = [1, 128], strides = [1, 1]} : vector<16x128xf32> to vector<1x128xf32>
    %cst_135 = arith.constant dense<0.000000e+00> : vector<1x128xf32>
    %749 = tpu.matmul %747, %503, %cst_135 {dimension_numbers = #tpu.dot_dimension_numbers<[1], [0], [0], [1], [0, 0, 1, 1], [], []>} : vector<1x32xf32>, vector<32x128xf32>, vector<1x128xf32> -> vector<1x128xf32>
    %750 = arith.addf %748, %749 : vector<1x128xf32>
    %751 = arith.negf %750 : vector<1x128xf32>
    %752 = math.exp %751 : vector<1x128xf32>
    %cst_136 = arith.constant 1.000000e+00 : f32
    %753 = vector.broadcast %cst_136 : f32 to vector<1x128xf32>
    %754 = arith.addf %753, %752 : vector<1x128xf32>
    %755 = arith.divf %753, %754 : vector<1x128xf32>
    %cst_137 = arith.constant 2.000000e+00 : f32
    %756 = vector.broadcast %cst_137 : f32 to vector<1x128xf32>
    %757 = arith.mulf %756, %755 : vector<1x128xf32>
    %cst_138 = arith.constant 1.000000e+00 : f32
    %758 = vector.broadcast %cst_138 : f32 to vector<1x128xf32>
    %759 = arith.subf %757, %758 : vector<1x128xf32>
    %760 = arith.select %5, %759, %755 : vector<1x128xi1>, vector<1x128xf32>
    %761 = vector.extract_strided_slice %760 {offsets = [0, 0], sizes = [1, 32], strides = [1, 1]} : vector<1x128xf32> to vector<1x32xf32>
    %762 = vector.extract_strided_slice %760 {offsets = [0, 32], sizes = [1, 32], strides = [1, 1]} : vector<1x128xf32> to vector<1x32xf32>
    %763 = vector.extract_strided_slice %760 {offsets = [0, 64], sizes = [1, 32], strides = [1, 1]} : vector<1x128xf32> to vector<1x32xf32>
    %764 = vector.extract_strided_slice %760 {offsets = [0, 96], sizes = [1, 32], strides = [1, 1]} : vector<1x128xf32> to vector<1x32xf32>
    %765 = arith.mulf %762, %745 : vector<1x32xf32>
    %766 = arith.mulf %761, %763 : vector<1x32xf32>
    %767 = arith.addf %765, %766 : vector<1x32xf32>
    %768 = math.tanh %767 : vector<1x32xf32>
    %769 = arith.mulf %764, %768 : vector<1x32xf32>
    %770 = vector.extract_strided_slice %501 {offsets = [12, 0], sizes = [1, 128], strides = [1, 1]} : vector<16x128xf32> to vector<1x128xf32>
    %cst_139 = arith.constant dense<0.000000e+00> : vector<1x128xf32>
    %771 = tpu.matmul %769, %503, %cst_139 {dimension_numbers = #tpu.dot_dimension_numbers<[1], [0], [0], [1], [0, 0, 1, 1], [], []>} : vector<1x32xf32>, vector<32x128xf32>, vector<1x128xf32> -> vector<1x128xf32>
    %772 = arith.addf %770, %771 : vector<1x128xf32>
    %773 = arith.negf %772 : vector<1x128xf32>
    %774 = math.exp %773 : vector<1x128xf32>
    %cst_140 = arith.constant 1.000000e+00 : f32
    %775 = vector.broadcast %cst_140 : f32 to vector<1x128xf32>
    %776 = arith.addf %775, %774 : vector<1x128xf32>
    %777 = arith.divf %775, %776 : vector<1x128xf32>
    %cst_141 = arith.constant 2.000000e+00 : f32
    %778 = vector.broadcast %cst_141 : f32 to vector<1x128xf32>
    %779 = arith.mulf %778, %777 : vector<1x128xf32>
    %cst_142 = arith.constant 1.000000e+00 : f32
    %780 = vector.broadcast %cst_142 : f32 to vector<1x128xf32>
    %781 = arith.subf %779, %780 : vector<1x128xf32>
    %782 = arith.select %5, %781, %777 : vector<1x128xi1>, vector<1x128xf32>
    %783 = vector.extract_strided_slice %782 {offsets = [0, 0], sizes = [1, 32], strides = [1, 1]} : vector<1x128xf32> to vector<1x32xf32>
    %784 = vector.extract_strided_slice %782 {offsets = [0, 32], sizes = [1, 32], strides = [1, 1]} : vector<1x128xf32> to vector<1x32xf32>
    %785 = vector.extract_strided_slice %782 {offsets = [0, 64], sizes = [1, 32], strides = [1, 1]} : vector<1x128xf32> to vector<1x32xf32>
    %786 = vector.extract_strided_slice %782 {offsets = [0, 96], sizes = [1, 32], strides = [1, 1]} : vector<1x128xf32> to vector<1x32xf32>
    %787 = arith.mulf %784, %767 : vector<1x32xf32>
    %788 = arith.mulf %783, %785 : vector<1x32xf32>
    %789 = arith.addf %787, %788 : vector<1x32xf32>
    %790 = math.tanh %789 : vector<1x32xf32>
    %791 = arith.mulf %786, %790 : vector<1x32xf32>
    %792 = vector.extract_strided_slice %501 {offsets = [13, 0], sizes = [1, 128], strides = [1, 1]} : vector<16x128xf32> to vector<1x128xf32>
    %cst_143 = arith.constant dense<0.000000e+00> : vector<1x128xf32>
    %793 = tpu.matmul %791, %503, %cst_143 {dimension_numbers = #tpu.dot_dimension_numbers<[1], [0], [0], [1], [0, 0, 1, 1], [], []>} : vector<1x32xf32>, vector<32x128xf32>, vector<1x128xf32> -> vector<1x128xf32>
    %794 = arith.addf %792, %793 : vector<1x128xf32>
    %795 = arith.negf %794 : vector<1x128xf32>
    %796 = math.exp %795 : vector<1x128xf32>
    %cst_144 = arith.constant 1.000000e+00 : f32
    %797 = vector.broadcast %cst_144 : f32 to vector<1x128xf32>
    %798 = arith.addf %797, %796 : vector<1x128xf32>
    %799 = arith.divf %797, %798 : vector<1x128xf32>
    %cst_145 = arith.constant 2.000000e+00 : f32
    %800 = vector.broadcast %cst_145 : f32 to vector<1x128xf32>
    %801 = arith.mulf %800, %799 : vector<1x128xf32>
    %cst_146 = arith.constant 1.000000e+00 : f32
    %802 = vector.broadcast %cst_146 : f32 to vector<1x128xf32>
    %803 = arith.subf %801, %802 : vector<1x128xf32>
    %804 = arith.select %5, %803, %799 : vector<1x128xi1>, vector<1x128xf32>
    %805 = vector.extract_strided_slice %804 {offsets = [0, 0], sizes = [1, 32], strides = [1, 1]} : vector<1x128xf32> to vector<1x32xf32>
    %806 = vector.extract_strided_slice %804 {offsets = [0, 32], sizes = [1, 32], strides = [1, 1]} : vector<1x128xf32> to vector<1x32xf32>
    %807 = vector.extract_strided_slice %804 {offsets = [0, 64], sizes = [1, 32], strides = [1, 1]} : vector<1x128xf32> to vector<1x32xf32>
    %808 = vector.extract_strided_slice %804 {offsets = [0, 96], sizes = [1, 32], strides = [1, 1]} : vector<1x128xf32> to vector<1x32xf32>
    %809 = arith.mulf %806, %789 : vector<1x32xf32>
    %810 = arith.mulf %805, %807 : vector<1x32xf32>
    %811 = arith.addf %809, %810 : vector<1x32xf32>
    %812 = math.tanh %811 : vector<1x32xf32>
    %813 = arith.mulf %808, %812 : vector<1x32xf32>
    %814 = vector.extract_strided_slice %501 {offsets = [14, 0], sizes = [1, 128], strides = [1, 1]} : vector<16x128xf32> to vector<1x128xf32>
    %cst_147 = arith.constant dense<0.000000e+00> : vector<1x128xf32>
    %815 = tpu.matmul %813, %503, %cst_147 {dimension_numbers = #tpu.dot_dimension_numbers<[1], [0], [0], [1], [0, 0, 1, 1], [], []>} : vector<1x32xf32>, vector<32x128xf32>, vector<1x128xf32> -> vector<1x128xf32>
    %816 = arith.addf %814, %815 : vector<1x128xf32>
    %817 = arith.negf %816 : vector<1x128xf32>
    %818 = math.exp %817 : vector<1x128xf32>
    %cst_148 = arith.constant 1.000000e+00 : f32
    %819 = vector.broadcast %cst_148 : f32 to vector<1x128xf32>
    %820 = arith.addf %819, %818 : vector<1x128xf32>
    %821 = arith.divf %819, %820 : vector<1x128xf32>
    %cst_149 = arith.constant 2.000000e+00 : f32
    %822 = vector.broadcast %cst_149 : f32 to vector<1x128xf32>
    %823 = arith.mulf %822, %821 : vector<1x128xf32>
    %cst_150 = arith.constant 1.000000e+00 : f32
    %824 = vector.broadcast %cst_150 : f32 to vector<1x128xf32>
    %825 = arith.subf %823, %824 : vector<1x128xf32>
    %826 = arith.select %5, %825, %821 : vector<1x128xi1>, vector<1x128xf32>
    %827 = vector.extract_strided_slice %826 {offsets = [0, 0], sizes = [1, 32], strides = [1, 1]} : vector<1x128xf32> to vector<1x32xf32>
    %828 = vector.extract_strided_slice %826 {offsets = [0, 32], sizes = [1, 32], strides = [1, 1]} : vector<1x128xf32> to vector<1x32xf32>
    %829 = vector.extract_strided_slice %826 {offsets = [0, 64], sizes = [1, 32], strides = [1, 1]} : vector<1x128xf32> to vector<1x32xf32>
    %830 = vector.extract_strided_slice %826 {offsets = [0, 96], sizes = [1, 32], strides = [1, 1]} : vector<1x128xf32> to vector<1x32xf32>
    %831 = arith.mulf %828, %811 : vector<1x32xf32>
    %832 = arith.mulf %827, %829 : vector<1x32xf32>
    %833 = arith.addf %831, %832 : vector<1x32xf32>
    %834 = math.tanh %833 : vector<1x32xf32>
    %835 = arith.mulf %830, %834 : vector<1x32xf32>
    %836 = vector.extract_strided_slice %501 {offsets = [15, 0], sizes = [1, 128], strides = [1, 1]} : vector<16x128xf32> to vector<1x128xf32>
    %cst_151 = arith.constant dense<0.000000e+00> : vector<1x128xf32>
    %837 = tpu.matmul %835, %503, %cst_151 {dimension_numbers = #tpu.dot_dimension_numbers<[1], [0], [0], [1], [0, 0, 1, 1], [], []>} : vector<1x32xf32>, vector<32x128xf32>, vector<1x128xf32> -> vector<1x128xf32>
    %838 = arith.addf %836, %837 : vector<1x128xf32>
    %839 = arith.negf %838 : vector<1x128xf32>
    %840 = math.exp %839 : vector<1x128xf32>
    %cst_152 = arith.constant 1.000000e+00 : f32
    %841 = vector.broadcast %cst_152 : f32 to vector<1x128xf32>
    %842 = arith.addf %841, %840 : vector<1x128xf32>
    %843 = arith.divf %841, %842 : vector<1x128xf32>
    %cst_153 = arith.constant 2.000000e+00 : f32
    %844 = vector.broadcast %cst_153 : f32 to vector<1x128xf32>
    %845 = arith.mulf %844, %843 : vector<1x128xf32>
    %cst_154 = arith.constant 1.000000e+00 : f32
    %846 = vector.broadcast %cst_154 : f32 to vector<1x128xf32>
    %847 = arith.subf %845, %846 : vector<1x128xf32>
    %848 = arith.select %5, %847, %843 : vector<1x128xi1>, vector<1x128xf32>
    %849 = vector.extract_strided_slice %848 {offsets = [0, 0], sizes = [1, 32], strides = [1, 1]} : vector<1x128xf32> to vector<1x32xf32>
    %850 = vector.extract_strided_slice %848 {offsets = [0, 32], sizes = [1, 32], strides = [1, 1]} : vector<1x128xf32> to vector<1x32xf32>
    %851 = vector.extract_strided_slice %848 {offsets = [0, 64], sizes = [1, 32], strides = [1, 1]} : vector<1x128xf32> to vector<1x32xf32>
    %852 = vector.extract_strided_slice %848 {offsets = [0, 96], sizes = [1, 32], strides = [1, 1]} : vector<1x128xf32> to vector<1x32xf32>
    %853 = arith.mulf %850, %833 : vector<1x32xf32>
    %854 = arith.mulf %849, %851 : vector<1x32xf32>
    %855 = arith.addf %853, %854 : vector<1x32xf32>
    %856 = math.tanh %855 : vector<1x32xf32>
    %857 = arith.mulf %852, %856 : vector<1x32xf32>
    %cst_155 = arith.constant 0.000000e+00 : f32
    %858 = vector.broadcast %cst_155 : f32 to vector<16x32xf32>
    %c0_i32_156 = arith.constant 0 : i32
    %859 = vector.broadcast %c0_i32_156 : i32 to vector<16x1xi32>
    %860 = arith.cmpi eq, %6, %859 : vector<16x1xi32>
    %861 = vector.shape_cast %860 : vector<16x1xi1> to vector<16x1xi1>
    %862 = vector.broadcast %861 : vector<16x1xi1> to vector<16x32xi1>
    %863 = vector.shape_cast %527 : vector<1x32xf32> to vector<1x32xf32>
    %864 = vector.broadcast %863 : vector<1x32xf32> to vector<16x32xf32>
    %865 = arith.select %862, %864, %858 : vector<16x32xi1>, vector<16x32xf32>
    %c1_i32_157 = arith.constant 1 : i32
    %866 = vector.broadcast %c1_i32_157 : i32 to vector<16x1xi32>
    %867 = arith.cmpi eq, %6, %866 : vector<16x1xi32>
    %868 = vector.shape_cast %867 : vector<16x1xi1> to vector<16x1xi1>
    %869 = vector.broadcast %868 : vector<16x1xi1> to vector<16x32xi1>
    %870 = vector.shape_cast %549 : vector<1x32xf32> to vector<1x32xf32>
    %871 = vector.broadcast %870 : vector<1x32xf32> to vector<16x32xf32>
    %872 = arith.select %869, %871, %865 : vector<16x32xi1>, vector<16x32xf32>
    %c2_i32_158 = arith.constant 2 : i32
    %873 = vector.broadcast %c2_i32_158 : i32 to vector<16x1xi32>
    %874 = arith.cmpi eq, %6, %873 : vector<16x1xi32>
    %875 = vector.shape_cast %874 : vector<16x1xi1> to vector<16x1xi1>
    %876 = vector.broadcast %875 : vector<16x1xi1> to vector<16x32xi1>
    %877 = vector.shape_cast %571 : vector<1x32xf32> to vector<1x32xf32>
    %878 = vector.broadcast %877 : vector<1x32xf32> to vector<16x32xf32>
    %879 = arith.select %876, %878, %872 : vector<16x32xi1>, vector<16x32xf32>
    %c3_i32_159 = arith.constant 3 : i32
    %880 = vector.broadcast %c3_i32_159 : i32 to vector<16x1xi32>
    %881 = arith.cmpi eq, %6, %880 : vector<16x1xi32>
    %882 = vector.shape_cast %881 : vector<16x1xi1> to vector<16x1xi1>
    %883 = vector.broadcast %882 : vector<16x1xi1> to vector<16x32xi1>
    %884 = vector.shape_cast %593 : vector<1x32xf32> to vector<1x32xf32>
    %885 = vector.broadcast %884 : vector<1x32xf32> to vector<16x32xf32>
    %886 = arith.select %883, %885, %879 : vector<16x32xi1>, vector<16x32xf32>
    %c4_i32_160 = arith.constant 4 : i32
    %887 = vector.broadcast %c4_i32_160 : i32 to vector<16x1xi32>
    %888 = arith.cmpi eq, %6, %887 : vector<16x1xi32>
    %889 = vector.shape_cast %888 : vector<16x1xi1> to vector<16x1xi1>
    %890 = vector.broadcast %889 : vector<16x1xi1> to vector<16x32xi1>
    %891 = vector.shape_cast %615 : vector<1x32xf32> to vector<1x32xf32>
    %892 = vector.broadcast %891 : vector<1x32xf32> to vector<16x32xf32>
    %893 = arith.select %890, %892, %886 : vector<16x32xi1>, vector<16x32xf32>
    %c5_i32_161 = arith.constant 5 : i32
    %894 = vector.broadcast %c5_i32_161 : i32 to vector<16x1xi32>
    %895 = arith.cmpi eq, %6, %894 : vector<16x1xi32>
    %896 = vector.shape_cast %895 : vector<16x1xi1> to vector<16x1xi1>
    %897 = vector.broadcast %896 : vector<16x1xi1> to vector<16x32xi1>
    %898 = vector.shape_cast %637 : vector<1x32xf32> to vector<1x32xf32>
    %899 = vector.broadcast %898 : vector<1x32xf32> to vector<16x32xf32>
    %900 = arith.select %897, %899, %893 : vector<16x32xi1>, vector<16x32xf32>
    %c6_i32_162 = arith.constant 6 : i32
    %901 = vector.broadcast %c6_i32_162 : i32 to vector<16x1xi32>
    %902 = arith.cmpi eq, %6, %901 : vector<16x1xi32>
    %903 = vector.shape_cast %902 : vector<16x1xi1> to vector<16x1xi1>
    %904 = vector.broadcast %903 : vector<16x1xi1> to vector<16x32xi1>
    %905 = vector.shape_cast %659 : vector<1x32xf32> to vector<1x32xf32>
    %906 = vector.broadcast %905 : vector<1x32xf32> to vector<16x32xf32>
    %907 = arith.select %904, %906, %900 : vector<16x32xi1>, vector<16x32xf32>
    %c7_i32_163 = arith.constant 7 : i32
    %908 = vector.broadcast %c7_i32_163 : i32 to vector<16x1xi32>
    %909 = arith.cmpi eq, %6, %908 : vector<16x1xi32>
    %910 = vector.shape_cast %909 : vector<16x1xi1> to vector<16x1xi1>
    %911 = vector.broadcast %910 : vector<16x1xi1> to vector<16x32xi1>
    %912 = vector.shape_cast %681 : vector<1x32xf32> to vector<1x32xf32>
    %913 = vector.broadcast %912 : vector<1x32xf32> to vector<16x32xf32>
    %914 = arith.select %911, %913, %907 : vector<16x32xi1>, vector<16x32xf32>
    %c8_i32_164 = arith.constant 8 : i32
    %915 = vector.broadcast %c8_i32_164 : i32 to vector<16x1xi32>
    %916 = arith.cmpi eq, %6, %915 : vector<16x1xi32>
    %917 = vector.shape_cast %916 : vector<16x1xi1> to vector<16x1xi1>
    %918 = vector.broadcast %917 : vector<16x1xi1> to vector<16x32xi1>
    %919 = vector.shape_cast %703 : vector<1x32xf32> to vector<1x32xf32>
    %920 = vector.broadcast %919 : vector<1x32xf32> to vector<16x32xf32>
    %921 = arith.select %918, %920, %914 : vector<16x32xi1>, vector<16x32xf32>
    %c9_i32_165 = arith.constant 9 : i32
    %922 = vector.broadcast %c9_i32_165 : i32 to vector<16x1xi32>
    %923 = arith.cmpi eq, %6, %922 : vector<16x1xi32>
    %924 = vector.shape_cast %923 : vector<16x1xi1> to vector<16x1xi1>
    %925 = vector.broadcast %924 : vector<16x1xi1> to vector<16x32xi1>
    %926 = vector.shape_cast %725 : vector<1x32xf32> to vector<1x32xf32>
    %927 = vector.broadcast %926 : vector<1x32xf32> to vector<16x32xf32>
    %928 = arith.select %925, %927, %921 : vector<16x32xi1>, vector<16x32xf32>
    %c10_i32_166 = arith.constant 10 : i32
    %929 = vector.broadcast %c10_i32_166 : i32 to vector<16x1xi32>
    %930 = arith.cmpi eq, %6, %929 : vector<16x1xi32>
    %931 = vector.shape_cast %930 : vector<16x1xi1> to vector<16x1xi1>
    %932 = vector.broadcast %931 : vector<16x1xi1> to vector<16x32xi1>
    %933 = vector.shape_cast %747 : vector<1x32xf32> to vector<1x32xf32>
    %934 = vector.broadcast %933 : vector<1x32xf32> to vector<16x32xf32>
    %935 = arith.select %932, %934, %928 : vector<16x32xi1>, vector<16x32xf32>
    %c11_i32_167 = arith.constant 11 : i32
    %936 = vector.broadcast %c11_i32_167 : i32 to vector<16x1xi32>
    %937 = arith.cmpi eq, %6, %936 : vector<16x1xi32>
    %938 = vector.shape_cast %937 : vector<16x1xi1> to vector<16x1xi1>
    %939 = vector.broadcast %938 : vector<16x1xi1> to vector<16x32xi1>
    %940 = vector.shape_cast %769 : vector<1x32xf32> to vector<1x32xf32>
    %941 = vector.broadcast %940 : vector<1x32xf32> to vector<16x32xf32>
    %942 = arith.select %939, %941, %935 : vector<16x32xi1>, vector<16x32xf32>
    %c12_i32_168 = arith.constant 12 : i32
    %943 = vector.broadcast %c12_i32_168 : i32 to vector<16x1xi32>
    %944 = arith.cmpi eq, %6, %943 : vector<16x1xi32>
    %945 = vector.shape_cast %944 : vector<16x1xi1> to vector<16x1xi1>
    %946 = vector.broadcast %945 : vector<16x1xi1> to vector<16x32xi1>
    %947 = vector.shape_cast %791 : vector<1x32xf32> to vector<1x32xf32>
    %948 = vector.broadcast %947 : vector<1x32xf32> to vector<16x32xf32>
    %949 = arith.select %946, %948, %942 : vector<16x32xi1>, vector<16x32xf32>
    %c13_i32_169 = arith.constant 13 : i32
    %950 = vector.broadcast %c13_i32_169 : i32 to vector<16x1xi32>
    %951 = arith.cmpi eq, %6, %950 : vector<16x1xi32>
    %952 = vector.shape_cast %951 : vector<16x1xi1> to vector<16x1xi1>
    %953 = vector.broadcast %952 : vector<16x1xi1> to vector<16x32xi1>
    %954 = vector.shape_cast %813 : vector<1x32xf32> to vector<1x32xf32>
    %955 = vector.broadcast %954 : vector<1x32xf32> to vector<16x32xf32>
    %956 = arith.select %953, %955, %949 : vector<16x32xi1>, vector<16x32xf32>
    %c14_i32_170 = arith.constant 14 : i32
    %957 = vector.broadcast %c14_i32_170 : i32 to vector<16x1xi32>
    %958 = arith.cmpi eq, %6, %957 : vector<16x1xi32>
    %959 = vector.shape_cast %958 : vector<16x1xi1> to vector<16x1xi1>
    %960 = vector.broadcast %959 : vector<16x1xi1> to vector<16x32xi1>
    %961 = vector.shape_cast %835 : vector<1x32xf32> to vector<1x32xf32>
    %962 = vector.broadcast %961 : vector<1x32xf32> to vector<16x32xf32>
    %963 = arith.select %960, %962, %956 : vector<16x32xi1>, vector<16x32xf32>
    %c15_i32_171 = arith.constant 15 : i32
    %964 = vector.broadcast %c15_i32_171 : i32 to vector<16x1xi32>
    %965 = arith.cmpi eq, %6, %964 : vector<16x1xi32>
    %966 = vector.shape_cast %965 : vector<16x1xi1> to vector<16x1xi1>
    %967 = vector.broadcast %966 : vector<16x1xi1> to vector<16x32xi1>
    %968 = vector.shape_cast %857 : vector<1x32xf32> to vector<1x32xf32>
    %969 = vector.broadcast %968 : vector<1x32xf32> to vector<16x32xf32>
    %970 = arith.select %967, %969, %963 : vector<16x32xi1>, vector<16x32xf32>
    %c0_172 = arith.constant 0 : index
    %c0_173 = arith.constant 0 : index
    %971 = vector.load %arg6[%c0_172, %c0_173] : memref<32x128xf32, #tpu.memory_space<vmem>>, vector<32x128xf32>
    %cst_174 = arith.constant dense<0.000000e+00> : vector<16x128xf32>
    %972 = tpu.matmul %970, %971, %cst_174 {dimension_numbers = #tpu.dot_dimension_numbers<[1], [0], [0], [1], [0, 0, 1, 1], [], []>} : vector<16x32xf32>, vector<32x128xf32>, vector<16x128xf32> -> vector<16x128xf32>
    %c0_175 = arith.constant 0 : index
    %c0_176 = arith.constant 0 : index
    %973 = vector.load %arg7[%c0_175, %c0_176] : memref<1x128xf32, #tpu.memory_space<vmem>>, vector<1x128xf32>
    %974 = vector.broadcast %973 : vector<1x128xf32> to vector<16x128xf32>
    %975 = arith.addf %972, %974 : vector<16x128xf32>
    %c0_177 = arith.constant 0 : index
    %c0_178 = arith.constant 0 : index
    %976 = vector.load %arg8[%c0_177, %c0_178] : memref<16x128xf32, #tpu.memory_space<vmem>>, vector<16x128xf32>
    tpu.vector_store %arg8[%c0_177, %c0_178], %975 {strides = array<i32>} : memref<16x128xf32, #tpu.memory_space<vmem>>, vector<16x128xf32>,
    return
  }
}

</mosaic_0001>

<bundles_post_ra>
// kernel: _decoder_core.1
= control target key start
LH: loop header
LB: loop body
LE: loop exit
PB: predicated region body
PF: predicated region fallthrough
CT: control target
= control target key end

     0   :  { %v5248_v2 = vmov 0   ;;  %v5249_v9 = vmov 0.0|0.0   ;;  %s6037_s0 = inlined_call_operand.vmem [shape: s32[16,1], index: 0, kind: input, shape index: {}]   ;;  %s6038_s1 = inlined_call_operand.vmem [shape: f32[1,128], index: 1, kind: input, shape index: {}]   ;;  %s6039_s2 = inlined_call_operand.vmem [shape: f32[64,128], index: 2, kind: input, shape index: {}]   ;;  %s6040_s3 = inlined_call_operand.vmem [shape: f32[1,32,128], index: 3, kind: input, shape index: {}]   ;;  %s6041_s4 = inlined_call_operand.vmem [shape: f32[2,32,128], index: 4, kind: input, shape index: {}]   ;;  %s6042_s5 = inlined_call_operand.vmem [shape: f32[1,1,128], index: 5, kind: input, shape index: {}]   ;;  %s6043_s6 = inlined_call_operand.vmem [shape: f32[32,128], index: 6, kind: input, shape index: {}]   ;;  %s6044_s7 = inlined_call_operand.vmem [shape: f32[1,128], index: 7, kind: input, shape index: {}]   ;;  %s6045_s8 = inlined_call_operand.hbm [shape: f32[16,128], index: 8, kind: output, shape index: {}]  }
   0x1   :  { %v38_v0 = vld [vmem:[%s6037_s0] sm:$0xff]  ;;  %5031 = vset.pattern.permute.xlu0 %v5248_v2  ;;  %v55_v3 = vld [vmem:[%s6039_s2 + $0x8] sm:$0xff]  ;;  %v56_v4 = vld [vmem:[%s6039_s2 + $0x10] sm:$0xff]  ;;  %4814 = vmatprep.subr.bf16.mxu1 %v5249_v9 }
   0x2   :  { %v54_v1 = vld [vmem:[%s6039_s2] sm:$0xff]  ;;  %v57_v5 = vld [vmem:[%s6039_s2 + $0x18] sm:$0xff]  ;;  %41 = vperm.xlu0 %5031, %v38_v0   ;;  %v39_v6 = vld [vmem:[%s6037_s0 + $0x8] sm:$0xff] }
   0x3   :  { %v4798_v7 = vpack.c.bf16 %v55_v3, %v54_v1  ;;  %v4802_v8 = vpack.c.bf16 %v57_v5, %v56_v4  ;;  %v153_v10 = vld [vmem:[%s6041_s4] sm:$0xff]  ;;  %v59_v12 = vld [vmem:[%s6039_s2 + $0x28] sm:$0xff]  ;;  %v155_v15 = vld [vmem:[%s6041_s4 + $0x10] sm:$0xff] }
   0x4   :  { %v58_v11 = vld [vmem:[%s6039_s2 + $0x20] sm:$0xff]  ;;  %v154_v13 = vld [vmem:[%s6041_s4 + $0x8] sm:$0xff]  ;;  %v156_v16 = vld [vmem:[%s6041_s4 + $0x18] sm:$0xff] }
   0x5   :  { %4799 = vmatprep.subr.bf16.mxu0 %v4798_v7  ;;  %v5333_v14 = vpack.c.bf16 %v154_v13, %v153_v10 }
   0x6   :  { %13 = vsyncpa [#allocation3], 0  ;;  %4801 = vmatpush3.bf16.msra.mxu0 %v4798_v7  ;;  %44 = vperm.xlu0 %5031, %v39_v6   ;;  %v4806_v17 = vpack.c.bf16 %v59_v12, %v58_v11  ;;  %v60_v18 = vld [vmem:[%s6039_s2 + $0x30] sm:$0xff]  ;;  %v61_v19 = vld [vmem:[%s6039_s2 + $0x38] sm:$0xff]  ;;  %v5348_v20 = vpack.c.bf16 %v156_v16, %v155_v15  ;;  %vm5250_vm0 = vmmov 0   ;;  %v5251_v21 = vmov 0.0  }
   0x7   :  { %4803 = vmatprep.subr.bf16.mxu0 %v4802_v8  ;;  %4816 = vmatpush3.bf16.msra.mxu1 %v5333_v14  ;;  %v4810_v22 = vpack.c.bf16 %v61_v19, %v60_v18  ;;  %v30_v23 = vlaneseq  ;;  %vm71_vm1 = vcmask 523264   ;;  %v5377_v32 = vld [vmem:[%s6038_s1] ss:$0 sm:$0xff]  ;;  %s5252_s1 = smov 64   ;;  %s5253_s11 = smov 32   ;;  %vm157_vm8 = vcmask 261120  }
   0x8   :  { %4817 = vmatprep.subr.bf16.mxu1 %v5249_v9  ;;  %4432 = vmatprep.mubr.msk.f32.mxu1 %vm5250_vm0, %v5251_v21  ;;  %v4002_v44 = vld [vmem:[%s6043_s6] sm:$0xff]  ;;  %s5254_s13 = smov [#allocation2]  }
   0x9   :  { %v31_v24 = vand.u32 127, %v30_v23  ;;  %v5371_v31 = vshrl.u32 %v30_v23, 7  ;;  %s4105_s14 = sshll.u32 %s5254_s13, 4  ;;  %s4106_s14 = int_to_ptr.vmem [resolvable:$true] %s4105_s14 }
   0xa   :  { %4805 = vmatpush3.bf16.msra.mxu0 %v4802_v8  ;;  %p5229_p1 = scmp.lt.s32.totalorder %s4106_s14, %s4106_s14 }
   0xb   :  { %4807 = vmatprep.subr.bf16.mxu0 %v4806_v17  ;;  %4819 = vmatpush3.bf16.msra.mxu1 %v5348_v20  ;;  %vm50_vm4 = vcmp.eq.s32.totalorder %v5371_v31, 0  ;;  %vm32_vm5 = vcmp.ge.s32.totalorder %v31_v24, 64  ;;  %vm33_vm6 = vcmp.lt.s32.totalorder %v31_v24, 96  ;;  %v5412_v11 = vsub.s32 0, %v5371_v31 }
   0xc   :  { %4820 = vmatprep.subr.bf16.mxu1 %v5249_v9  ;;  %v52_v33 = vsel %vm50_vm4, 1.0, %v5251_v21  ;;  %vm5388_vm7 = vmand %vm32_vm5, %vm33_vm6  ;;  %v5415_v12 = vsub.s32 1, %v5371_v31  ;;  %vm1898_vm9 = vcmp.eq.s32.totalorder %v5371_v31, 1  ;;  %vm1910_vm10 = vcmp.eq.s32.totalorder %v5371_v31, 2 }
   0xd   :  { %v69_v34 = vmul.f32 %v5377_v32, %v52_v33  ;;  %vm1922_vm11 = vcmp.eq.s32.totalorder %v5371_v31, 3  ;;  %vm1934_vm12 = vcmp.eq.s32.totalorder %v5371_v31, 4  ;;  %vm1946_vm13 = vcmp.eq.s32.totalorder %v5371_v31, 5 }
   0xe   :  { %4809 = vmatpush3.bf16.msra.mxu0 %v4806_v17  ;;  %4433 = vmatmul.mubr.f32.vlgmr.msra.gmra.mrb[0].mxu1 %v5251_v21  ;;  %vm1958_vm14 = vcmp.eq.s32.totalorder %v5371_v31, 6  ;;  %vm1970_vm15 = vcmp.eq.s32.totalorder %v5371_v31, 7 }
   0xf   :  { %4811 = vmatprep.subr.bf16.mxu0 %v4810_v22  ;;  %4822 = vmatpush3.bf16.msra.mxu1 %v5333_v14 }
  0x10   :  { %4443 = vmatprep.mubr.msk.f32.mxu1 %vm5250_vm0, %v5251_v21  ;;  %4823 = vmatprep.subr.bf16.mxu1 %v5249_v9 }
  0x12   :  { %4813 = vmatpush3.bf16.msra.mxu0 %v4810_v22 }
  0x13   :  { %4826 = vmatprep.subr.bf16.mxu0 %v5249_v9  ;;  %4825 = vmatpush3.bf16.msra.mxu1 %v5348_v20 }
  0x14   :  { %4832 = vmatprep.subr.bf16.mxu1 %v5249_v9 }
  0x81   :  { %v42_v25 = vpop.permute.xlu0 %41 }
  0x82   :  { %vm46_vm2 = vcmp.eq.s32.totalorder %v31_v24, %v42_v25 }
  0x83   :  { %v48_v26 = vsel %vm46_vm2, 1.0, %v5251_v21 }
  0x84   :  { %4421 = vmatprep.mubr.msk.f32.mxu0 %vm71_vm1, %v48_v26 }
  0x85   :  { %v45_v27 = vpop.permute.xlu0 %44 }
  0x86   :  { %vm47_vm3 = vcmp.eq.s32.totalorder %v31_v24, %v45_v27 }
  0x87   :  { %v49_v28 = vsel %vm47_vm3, 1.0, %v5251_v21 }
  0x88   :  { %4422 = vmatmul.mubr.msk.f32.vlgmr.msra.gmra.mrb[0].mxu0 %vm71_vm1, %v49_v28 }
  0x89   :  { %4828 = vmatpush3.bf16.msra.mxu0 %v5333_v14  ;;  %4454 = vmatprep.mubr.msk.f32.mxu0 %vm5250_vm0, %v5251_v21 }
  0x8a   :  { %4829 = vmatprep.subr.bf16.mxu0 %v5249_v9 }
  0x8d   :  { %4831 = vmatpush3.bf16.msra.mxu0 %v5348_v20 }
  0x8e   :  { %4838 = vmatprep.subr.bf16.mxu0 %v5249_v9 }
  0xe1   :  { %v227_v29 = vpop.f32.mrb[0].mxu1 }
  0xe2   :  { %v4434_v30 = vpop.f32.mrb[1].mxu1 }
 0x15b   :  { %v5383_v35 = vpop.f32.mrb[0].mxu0 }
 0x15c   :  { %v144_v36 = vpop.f32.mrb[1].mxu0 }
 0x15d   :  { %v5385_v37 = vadd.f32 %v144_v36, %v69_v34 }
 0x15f   :  { %v231_v38 = vadd.f32 %v227_v29, %v5385_v37 }
 0x161   :  { %v4119_v39 = vmul.f32 -1.442695, %v231_v38 }
 0x163   :  { %5032 = vpow2.f32 %v4119_v39 }
 0x16d   :  { %v5033_v40 = vpop.eup %5032 }
 0x16e   :  { %v235_v41 = vadd.f32 1.0, %v5033_v40 }
 0x170   :  { %5034 = vrcp.f32 %v235_v41 }
 0x17a   :  { %v5035_v42 = vpop.eup %5034 }
 0x17b   :  { %v238_v43 = vmul.f32 2.0, %v5035_v42 }
 0x17d   :  { %v4120_v45 = vadd.f32 -1.0, %v238_v43 }
 0x17f   :  { %v240_v46 = vsel %vm5388_vm7, %v4120_v45, %v5035_v42 }
 0x180   :  { %243 = vrot.lane.b32.xlu1 %v240_v46, %s5252_s1  ;;  %v241_v49 = vmul.f32 0.0, %v240_v46 }
 0x1f2   :  { %v244_v47 = vpop.permute.xlu1 %243 }
 0x1f3   :  { %v246_v48 = vmul.f32 %v244_v47, %v240_v46  ;;  %v5439_v47 = vsub.s32 2, %v5371_v31 }
 0x1f5   :  { %248 = vrot.lane.b32.xlu1 %v246_v48, %s5253_s11 }
 0x267   :  { %v249_v50 = vpop.permute.xlu1 %248 }
 0x268   :  { %v251_v51 = vadd.f32 %v249_v50, %v241_v49 }
 0x26a   :  { %5036 = vtanh.f32 %v251_v51  ;;  %v347_v5 = vrot.slane %v251_v51, 7 }
 0x274   :  { %v5037_v52 = vpop.eup %5036 }
 0x275   :  { %254 = vrot.lane.b32.xlu0 %v5037_v52, %s5252_s1 }
 0x2e7   :  { %v255_v53 = vpop.permute.xlu0 %254 }
 0x2e8   :  { %v257_v54 = vmul.f32 %v255_v53, %v240_v46 }
 0x2ea   :  { %259 = vrot.lane.b32.xlu1 %v257_v54, %s5253_s11  ;;  %v1895_v13 = vrot.slane %v257_v54, %v5412_v11 }
 0x2ec   :  { %v1896_v19 = vsel %vm50_vm4, %v1895_v13, 0.0 }
 0x35c   :  { %v260_v55 = vpop.permute.xlu1 %259 }
 0x35d   :  { %4444 = vmatmul.mubr.msk.f32.vlgmr.msra.gmra.mrb[2].mxu1 %vm157_vm8, %v260_v55 }
 0x35e   :  { %4834 = vmatpush3.bf16.msra.mxu1 %v5333_v14  ;;  %4465 = vmatprep.mubr.msk.f32.mxu1 %vm5250_vm0, %v5251_v21 }
 0x35f   :  { %4835 = vmatprep.subr.bf16.mxu1 %v5249_v9 }
 0x362   :  { %4837 = vmatpush3.bf16.msra.mxu1 %v5348_v20 }
 0x363   :  { %4844 = vmatprep.subr.bf16.mxu1 %v5249_v9 }
 0x430   :  { %v329_v56 = vpop.f32.mrb[2].mxu1 }
 0x431   :  { %v334_v57 = vrot.slane %v329_v56, 7  ;;  %v4445_v58 = vpop.f32.mrb[3].mxu1 }
 0x433   :  { %v336_v59 = vadd.f32 %v334_v57, %v5385_v37 }
 0x435   :  { %v4122_v60 = vmul.f32 -1.442695, %v336_v59 }
 0x437   :  { %5038 = vpow2.f32 %v4122_v60 }
 0x441   :  { %v5039_v61 = vpop.eup %5038 }
 0x442   :  { %v340_v62 = vadd.f32 1.0, %v5039_v61 }
 0x444   :  { %5040 = vrcp.f32 %v340_v62 }
 0x44e   :  { %v5041_v63 = vpop.eup %5040 }
 0x44f   :  { %v343_v0 = vmul.f32 2.0, %v5041_v63 }
 0x451   :  { %v4123_v1 = vadd.f32 -1.0, %v343_v0 }
 0x453   :  { %v345_v2 = vsel %vm5388_vm7, %v4123_v1, %v5041_v63 }
 0x454   :  { %351 = vrot.lane.b32.xlu0 %v345_v2, %s5252_s1  ;;  %v349_v6 = vmul.f32 %v347_v5, %v345_v2 }
 0x4c6   :  { %v352_v3 = vpop.permute.xlu0 %351 }
 0x4c7   :  { %v354_v4 = vmul.f32 %v352_v3, %v345_v2 }
 0x4c9   :  { %356 = vrot.lane.b32.xlu1 %v354_v4, %s5253_s11 }
 0x53b   :  { %v357_v7 = vpop.permute.xlu1 %356 }
 0x53c   :  { %v359_v8 = vadd.f32 %v357_v7, %v349_v6 }
 0x53e   :  { %5042 = vtanh.f32 %v359_v8  ;;  %v456_v41 = vrot.slane %v359_v8, 7  ;;  %v5460_v8 = vsub.s32 3, %v5371_v31 }
 0x548   :  { %v5043_v10 = vpop.eup %5042 }
 0x549   :  { %362 = vrot.lane.b32.xlu0 %v5043_v10, %s5252_s1 }
 0x5bb   :  { %v363_v15 = vpop.permute.xlu0 %362 }
 0x5bc   :  { %v365_v16 = vmul.f32 %v363_v15, %v345_v2 }
 0x5be   :  { %v367_v17 = vrot.slane %v365_v16, 1  ;;  %v1907_v18 = vrot.slane %v365_v16, %v5415_v12 }
 0x5c0   :  { %v1908_v22 = vsel %vm1898_vm9, %v1907_v18, %v1896_v19  ;;  %368 = vrot.lane.b32.xlu1 %v367_v17, %s5253_s11 }
 0x632   :  { %v369_v23 = vpop.permute.xlu1 %368 }
 0x633   :  { %4455 = vmatmul.mubr.msk.f32.vlgmr.msra.gmra.mrb[2].mxu0 %vm157_vm8, %v369_v23 }
 0x634   :  { %4840 = vmatpush3.bf16.msra.mxu0 %v5333_v14  ;;  %4476 = vmatprep.mubr.msk.f32.mxu0 %vm5250_vm0, %v5251_v21 }
 0x635   :  { %4841 = vmatprep.subr.bf16.mxu0 %v5249_v9 }
 0x638   :  { %4843 = vmatpush3.bf16.msra.mxu0 %v5348_v20 }
 0x639   :  { %4850 = vmatprep.subr.bf16.mxu0 %v5249_v9 }
 0x706   :  { %v438_v24 = vpop.f32.mrb[2].mxu0 }
 0x707   :  { %v443_v25 = vrot.slane %v438_v24, 6  ;;  %v4456_v26 = vpop.f32.mrb[3].mxu0 }
 0x709   :  { %v445_v27 = vadd.f32 %v443_v25, %v5385_v37 }
 0x70b   :  { %v4125_v28 = vmul.f32 -1.442695, %v445_v27 }
 0x70d   :  { %5044 = vpow2.f32 %v4125_v28 }
 0x717   :  { %v5045_v29 = vpop.eup %5044 }
 0x718   :  { %v449_v30 = vadd.f32 1.0, %v5045_v29 }
 0x71a   :  { %5046 = vrcp.f32 %v449_v30 }
 0x724   :  { %v5047_v33 = vpop.eup %5046 }
 0x725   :  { %v452_v34 = vmul.f32 2.0, %v5047_v33 }
 0x727   :  { %v4126_v36 = vadd.f32 -1.0, %v452_v34 }
 0x729   :  { %v454_v38 = vsel %vm5388_vm7, %v4126_v36, %v5047_v33 }
 0x72a   :  { %460 = vrot.lane.b32.xlu0 %v454_v38, %s5252_s1  ;;  %v458_v42 = vmul.f32 %v456_v41, %v454_v38 }
 0x79c   :  { %v461_v39 = vpop.permute.xlu0 %460 }
 0x79d   :  { %v463_v40 = vmul.f32 %v461_v39, %v454_v38 }
 0x79f   :  { %465 = vrot.lane.b32.xlu1 %v463_v40, %s5253_s11 }
 0x811   :  { %v466_v43 = vpop.permute.xlu1 %465 }
 0x812   :  { %v468_v45 = vadd.f32 %v466_v43, %v458_v42  ;;  %v5481_v43 = vsub.s32 4, %v5371_v31 }
 0x814   :  { %5048 = vtanh.f32 %v468_v45  ;;  %v565_v3 = vrot.slane %v468_v45, 7 }
 0x81e   :  { %v5049_v46 = vpop.eup %5048 }
 0x81f   :  { %471 = vrot.lane.b32.xlu0 %v5049_v46, %s5252_s1 }
 0x891   :  { %v472_v48 = vpop.permute.xlu0 %471 }
 0x892   :  { %v474_v49 = vmul.f32 %v472_v48, %v454_v38 }
 0x894   :  { %v476_v50 = vrot.slane %v474_v49, 2  ;;  %v1919_v51 = vrot.slane %v474_v49, %v5439_v47 }
 0x896   :  { %v1920_v52 = vsel %vm1910_vm10, %v1919_v51, %v1908_v22  ;;  %477 = vrot.lane.b32.xlu1 %v476_v50, %s5253_s11 }
 0x908   :  { %v478_v53 = vpop.permute.xlu1 %477 }
 0x909   :  { %4466 = vmatmul.mubr.msk.f32.vlgmr.msra.gmra.mrb[4].mxu1 %vm157_vm8, %v478_v53 }
 0x90a   :  { %4846 = vmatpush3.bf16.msra.mxu1 %v5333_v14  ;;  %4487 = vmatprep.mubr.msk.f32.mxu1 %vm5250_vm0, %v5251_v21 }
 0x90b   :  { %4847 = vmatprep.subr.bf16.mxu1 %v5249_v9 }
 0x90e   :  { %4849 = vmatpush3.bf16.msra.mxu1 %v5348_v20 }
 0x90f   :  { %4856 = vmatprep.subr.bf16.mxu1 %v5249_v9 }
 0x9dc   :  { %v547_v54 = vpop.f32.mrb[4].mxu1 }
 0x9dd   :  { %v552_v55 = vrot.slane %v547_v54, 5  ;;  %v4467_v56 = vpop.f32.mrb[5].mxu1 }
 0x9df   :  { %v554_v57 = vadd.f32 %v552_v55, %v5385_v37 }
 0x9e1   :  { %v4128_v58 = vmul.f32 -1.442695, %v554_v57 }
 0x9e3   :  { %5050 = vpow2.f32 %v4128_v58 }
 0x9ed   :  { %v5051_v59 = vpop.eup %5050 }
 0x9ee   :  { %v558_v60 = vadd.f32 1.0, %v5051_v59 }
 0x9f0   :  { %5052 = vrcp.f32 %v558_v60 }
 0x9fa   :  { %v5053_v61 = vpop.eup %5052 }
 0x9fb   :  { %v561_v62 = vmul.f32 2.0, %v5053_v61 }
 0x9fd   :  { %v4129_v63 = vadd.f32 -1.0, %v561_v62 }
 0x9ff   :  { %v563_v0 = vsel %vm5388_vm7, %v4129_v63, %v5053_v61 }
 0xa00   :  { %569 = vrot.lane.b32.xlu0 %v563_v0, %s5252_s1  ;;  %v567_v4 = vmul.f32 %v565_v3, %v563_v0 }
 0xa72   :  { %v570_v1 = vpop.permute.xlu0 %569 }
 0xa73   :  { %v572_v2 = vmul.f32 %v570_v1, %v563_v0 }
 0xa75   :  { %574 = vrot.lane.b32.xlu1 %v572_v2, %s5253_s11 }
 0xae7   :  { %v575_v5 = vpop.permute.xlu1 %574 }
 0xae8   :  { %v577_v6 = vadd.f32 %v575_v5, %v567_v4 }
 0xaea   :  { %5054 = vtanh.f32 %v577_v6  ;;  %v674_v38 = vrot.slane %v577_v6, 7  ;;  %v5502_v6 = vsub.s32 5, %v5371_v31 }
 0xaf4   :  { %v5055_v7 = vpop.eup %5054 }
 0xaf5   :  { %580 = vrot.lane.b32.xlu0 %v5055_v7, %s5252_s1 }
 0xb67   :  { %v581_v10 = vpop.permute.xlu0 %580 }
 0xb68   :  { %v583_v13 = vmul.f32 %v581_v10, %v563_v0 }
 0xb6a   :  { %v585_v15 = vrot.slane %v583_v13, 3  ;;  %v1931_v16 = vrot.slane %v583_v13, %v5460_v8 }
 0xb6c   :  { %v1932_v17 = vsel %vm1922_vm11, %v1931_v16, %v1920_v52  ;;  %586 = vrot.lane.b32.xlu1 %v585_v15, %s5253_s11 }
 0xbde   :  { %v587_v18 = vpop.permute.xlu1 %586 }
 0xbdf   :  { %4477 = vmatmul.mubr.msk.f32.vlgmr.msra.gmra.mrb[4].mxu0 %vm157_vm8, %v587_v18 }
 0xbe0   :  { %4852 = vmatpush3.bf16.msra.mxu0 %v5333_v14  ;;  %4498 = vmatprep.mubr.msk.f32.mxu0 %vm5250_vm0, %v5251_v21 }
 0xbe1   :  { %4853 = vmatprep.subr.bf16.mxu0 %v5249_v9 }
 0xbe4   :  { %4855 = vmatpush3.bf16.msra.mxu0 %v5348_v20 }
 0xbe5   :  { %4862 = vmatprep.subr.bf16.mxu0 %v5249_v9 }
 0xcb2   :  { %v656_v19 = vpop.f32.mrb[4].mxu0 }
 0xcb3   :  { %v661_v22 = vrot.slane %v656_v19, 4  ;;  %v4478_v23 = vpop.f32.mrb[5].mxu0 }
 0xcb5   :  { %v663_v24 = vadd.f32 %v661_v22, %v5385_v37 }
 0xcb7   :  { %v4131_v25 = vmul.f32 -1.442695, %v663_v24 }
 0xcb9   :  { %5056 = vpow2.f32 %v4131_v25 }
 0xcc3   :  { %v5057_v26 = vpop.eup %5056 }
 0xcc4   :  { %v667_v27 = vadd.f32 1.0, %v5057_v26 }
 0xcc6   :  { %5058 = vrcp.f32 %v667_v27 }
 0xcd0   :  { %v5059_v28 = vpop.eup %5058 }
 0xcd1   :  { %v670_v29 = vmul.f32 2.0, %v5059_v28 }
 0xcd3   :  { %v4132_v30 = vadd.f32 -1.0, %v670_v29 }
 0xcd5   :  { %v672_v33 = vsel %vm5388_vm7, %v4132_v30, %v5059_v28 }
 0xcd6   :  { %678 = vrot.lane.b32.xlu0 %v672_v33, %s5252_s1  ;;  %v676_v39 = vmul.f32 %v674_v38, %v672_v33 }
 0xd48   :  { %v679_v34 = vpop.permute.xlu0 %678 }
 0xd49   :  { %v681_v36 = vmul.f32 %v679_v34, %v672_v33 }
 0xd4b   :  { %683 = vrot.lane.b32.xlu1 %v681_v36, %s5253_s11 }
 0xdbd   :  { %v684_v40 = vpop.permute.xlu1 %683 }
 0xdbe   :  { %v686_v41 = vadd.f32 %v684_v40, %v676_v39 }
 0xdc0   :  { %5060 = vtanh.f32 %v686_v41  ;;  %v783_v1 = vrot.slane %v686_v41, 7 }
 0xdca   :  { %v5061_v42 = vpop.eup %5060 }
 0xdcb   :  { %689 = vrot.lane.b32.xlu0 %v5061_v42, %s5252_s1  ;;  %v5523_v42 = vsub.s32 6, %v5371_v31 }
 0xe3d   :  { %v690_v45 = vpop.permute.xlu0 %689 }
 0xe3e   :  { %v692_v46 = vmul.f32 %v690_v45, %v672_v33 }
 0xe40   :  { %v694_v48 = vrot.slane %v692_v46, 4  ;;  %v1943_v49 = vrot.slane %v692_v46, %v5481_v43 }
 0xe42   :  { %v1944_v50 = vsel %vm1934_vm12, %v1943_v49, %v1932_v17  ;;  %695 = vrot.lane.b32.xlu1 %v694_v48, %s5253_s11 }
 0xeb4   :  { %v696_v51 = vpop.permute.xlu1 %695 }
 0xeb5   :  { %4488 = vmatmul.mubr.msk.f32.vlgmr.msra.gmra.mrb[6].mxu1 %vm157_vm8, %v696_v51 }
 0xeb6   :  { %4858 = vmatpush3.bf16.msra.mxu1 %v5333_v14  ;;  %4509 = vmatprep.mubr.msk.f32.mxu1 %vm5250_vm0, %v5251_v21 }
 0xeb7   :  { %4859 = vmatprep.subr.bf16.mxu1 %v5249_v9 }
 0xeba   :  { %4861 = vmatpush3.bf16.msra.mxu1 %v5348_v20 }
 0xebb   :  { %4868 = vmatprep.subr.bf16.mxu1 %v5249_v9 }
 0xf88   :  { %v765_v52 = vpop.f32.mrb[6].mxu1 }
 0xf89   :  { %v770_v53 = vrot.slane %v765_v52, 3  ;;  %v4489_v54 = vpop.f32.mrb[7].mxu1 }
 0xf8b   :  { %v772_v55 = vadd.f32 %v770_v53, %v5385_v37 }
 0xf8d   :  { %v4134_v56 = vmul.f32 -1.442695, %v772_v55 }
 0xf8f   :  { %5062 = vpow2.f32 %v4134_v56 }
 0xf99   :  { %v5063_v57 = vpop.eup %5062 }
 0xf9a   :  { %v776_v58 = vadd.f32 1.0, %v5063_v57 }
 0xf9c   :  { %5064 = vrcp.f32 %v776_v58 }
 0xfa6   :  { %v5065_v59 = vpop.eup %5064 }
 0xfa7   :  { %v779_v60 = vmul.f32 2.0, %v5065_v59 }
 0xfa9   :  { %v4135_v61 = vadd.f32 -1.0, %v779_v60 }
 0xfab   :  { %v781_v62 = vsel %vm5388_vm7, %v4135_v61, %v5065_v59 }
 0xfac   :  { %787 = vrot.lane.b32.xlu0 %v781_v62, %s5252_s1  ;;  %v785_v2 = vmul.f32 %v783_v1, %v781_v62 }
0x101e   :  { %v788_v63 = vpop.permute.xlu0 %787 }
0x101f   :  { %v790_v0 = vmul.f32 %v788_v63, %v781_v62 }
0x1021   :  { %792 = vrot.lane.b32.xlu1 %v790_v0, %s5253_s11 }
0x1093   :  { %v793_v3 = vpop.permute.xlu1 %792 }
0x1094   :  { %v795_v4 = vadd.f32 %v793_v3, %v785_v2 }
0x1096   :  { %5066 = vtanh.f32 %v795_v4  ;;  %v892_v36 = vrot.slane %v795_v4, 7 }
0x10a0   :  { %v5067_v5 = vpop.eup %5066 }
0x10a1   :  { %798 = vrot.lane.b32.xlu0 %v5067_v5, %s5252_s1  ;;  %v5544_v5 = vsub.s32 7, %v5371_v31 }
0x1113   :  { %v799_v7 = vpop.permute.xlu0 %798 }
0x1114   :  { %v801_v10 = vmul.f32 %v799_v7, %v781_v62 }
0x1116   :  { %v803_v13 = vrot.slane %v801_v10, 5  ;;  %v1955_v15 = vrot.slane %v801_v10, %v5502_v6 }
0x1118   :  { %804 = vrot.lane.b32.xlu1 %v803_v13, %s5253_s11  ;;  %v1956_v16 = vsel %vm1946_vm13, %v1955_v15, %v1944_v50 }
0x118a   :  { %v805_v17 = vpop.permute.xlu1 %804 }
0x118b   :  { %4499 = vmatmul.mubr.msk.f32.vlgmr.msra.gmra.mrb[6].mxu0 %vm157_vm8, %v805_v17 }
0x118c   :  { %4864 = vmatpush3.bf16.msra.mxu0 %v5333_v14  ;;  %4520 = vmatprep.mubr.msk.f32.mxu0 %vm5250_vm0, %v5251_v21 }
0x118d   :  { %4865 = vmatprep.subr.bf16.mxu0 %v5249_v9 }
0x1190   :  { %4867 = vmatpush3.bf16.msra.mxu0 %v5348_v20 }
0x1191   :  { %4874 = vmatprep.subr.bf16.mxu0 %v5249_v9 }
0x125e   :  { %v874_v18 = vpop.f32.mrb[6].mxu0 }
0x125f   :  { %v879_v19 = vrot.slane %v874_v18, 2  ;;  %v4500_v22 = vpop.f32.mrb[7].mxu0  ;;  %v70_v18 = vmul.f32 0.0, %v5377_v32 }
0x1261   :  { %v881_v23 = vadd.f32 %v879_v19, %v5385_v37  ;;  %v5562_v19 = vadd.f32 %v5383_v35, %v70_v18 }
0x1263   :  { %v4137_v24 = vmul.f32 -1.442695, %v881_v23 }
0x1265   :  { %5068 = vpow2.f32 %v4137_v24 }
0x126f   :  { %v5069_v25 = vpop.eup %5068 }
0x1270   :  { %v885_v26 = vadd.f32 1.0, %v5069_v25 }
0x1272   :  { %5070 = vrcp.f32 %v885_v26 }
0x127c   :  { %v5071_v27 = vpop.eup %5070 }
0x127d   :  { %v888_v28 = vmul.f32 2.0, %v5071_v27 }
0x127f   :  { %v4138_v29 = vadd.f32 -1.0, %v888_v28 }
0x1281   :  { %v890_v30 = vsel %vm5388_vm7, %v4138_v29, %v5071_v27 }
0x1282   :  { %896 = vrot.lane.b32.xlu0 %v890_v30, %s5252_s1  ;;  %v894_v38 = vmul.f32 %v892_v36, %v890_v30 }
0x12f4   :  { %v897_v33 = vpop.permute.xlu0 %896 }
0x12f5   :  { %v899_v34 = vmul.f32 %v897_v33, %v890_v30 }
0x12f7   :  { %901 = vrot.lane.b32.xlu1 %v899_v34, %s5253_s11 }
0x1369   :  { %v902_v39 = vpop.permute.xlu1 %901 }
0x136a   :  { %v904_v40 = vadd.f32 %v902_v39, %v894_v38 }
0x136c   :  { %5072 = vtanh.f32 %v904_v40  ;;  %v1001_v1 = vrot.slane %v904_v40, 7 }
0x1376   :  { %v5073_v41 = vpop.eup %5072 }
0x1377   :  { %907 = vrot.lane.b32.xlu0 %v5073_v41, %s5252_s1 }
0x13e9   :  { %v908_v45 = vpop.permute.xlu0 %907 }
0x13ea   :  { %v910_v46 = vmul.f32 %v908_v45, %v890_v30 }
0x13ec   :  { %v912_v48 = vrot.slane %v910_v46, 6  ;;  %v1967_v49 = vrot.slane %v910_v46, %v5523_v42 }
0x13ee   :  { %913 = vrot.lane.b32.xlu1 %v912_v48, %s5253_s11  ;;  %v1968_v50 = vsel %vm1958_vm14, %v1967_v49, %v1956_v16 }
0x1460   :  { %v914_v51 = vpop.permute.xlu1 %913 }
0x1461   :  { %4510 = vmatmul.mubr.msk.f32.vlgmr.msra.gmra.mrb[8].mxu1 %vm157_vm8, %v914_v51 }
0x1462   :  { %4870 = vmatpush3.bf16.msra.mxu1 %v5333_v14  ;;  %4531 = vmatprep.mubr.msk.f32.mxu1 %vm5250_vm0, %v5251_v21 }
0x1463   :  { %4871 = vmatprep.subr.bf16.mxu1 %v5249_v9 }
0x1466   :  { %4873 = vmatpush3.bf16.msra.mxu1 %v5348_v20 }
0x1467   :  { %4880 = vmatprep.subr.bf16.mxu1 %v5249_v9 }
0x1534   :  { %v983_v52 = vpop.f32.mrb[8].mxu1 }
0x1535   :  { %v988_v53 = vrot.slane %v983_v52, 1  ;;  %v4511_v54 = vpop.f32.mrb[9].mxu1 }
0x1537   :  { %v990_v55 = vadd.f32 %v988_v53, %v5385_v37 }
0x1539   :  { %v4140_v56 = vmul.f32 -1.442695, %v990_v55 }
0x153b   :  { %5074 = vpow2.f32 %v4140_v56 }
0x1545   :  { %v5075_v57 = vpop.eup %5074 }
0x1546   :  { %v994_v58 = vadd.f32 1.0, %v5075_v57 }
0x1548   :  { %5076 = vrcp.f32 %v994_v58 }
0x1552   :  { %v5077_v59 = vpop.eup %5076 }
0x1553   :  { %v997_v60 = vmul.f32 2.0, %v5077_v59 }
0x1555   :  { %v4141_v61 = vadd.f32 -1.0, %v997_v60 }
0x1557   :  { %v999_v62 = vsel %vm5388_vm7, %v4141_v61, %v5077_v59 }
0x1558   :  { %1005 = vrot.lane.b32.xlu0 %v999_v62, %s5252_s1  ;;  %v1003_v2 = vmul.f32 %v1001_v1, %v999_v62 }
0x15ca   :  { %v1006_v63 = vpop.permute.xlu0 %1005 }
0x15cb   :  { %v1008_v0 = vmul.f32 %v1006_v63, %v999_v62 }
0x15cd   :  { %1010 = vrot.lane.b32.xlu1 %v1008_v0, %s5253_s11 }
0x163f   :  { %v1011_v37 = vpop.permute.xlu1 %1010 }
0x1640   :  { %v1013_v3 = vadd.f32 %v1011_v37, %v1003_v2  ;;  %v5585_v2 = vadd.s32 8, %v5371_v31 }
0x1642   :  { %5078 = vtanh.f32 %v1013_v3  ;;  %v1107_v34 = vrot.slane %v1013_v3, 7  ;;  %vm1983_vm1 = vcmp.eq.s32.totalorder %v5585_v2, 8  ;;  %vm1995_vm2 = vcmp.eq.s32.totalorder %v5585_v2, 9 }
0x1643   :  { %vm2007_vm3 = vcmp.eq.s32.totalorder %v5585_v2, 10  ;;  %vm2019_vm5 = vcmp.eq.s32.totalorder %v5585_v2, 11  ;;  %vm6046_vm6 = vcmp.eq.s32.totalorder %v5585_v2, 12 }
0x164c   :  { %v5079_v4 = vpop.eup %5078 }
0x164d   :  { %1016 = vrot.lane.b32.xlu0 %v5079_v4, %s5252_s1 }
0x16bf   :  { %v1017_v7 = vpop.permute.xlu0 %1016 }
0x16c0   :  { %v1019_v10 = vmul.f32 %v1017_v7, %v999_v62 }
0x16c2   :  { %v1021_v13 = vrot.slane %v1019_v10, 7  ;;  %v1979_v15 = vrot.slane %v1019_v10, %v5544_v5 }
0x16c4   :  { %1022 = vrot.lane.b32.xlu1 %v1021_v13, %s5253_s11  ;;  %v5551_v16 = vsel %vm1970_vm15, %v1979_v15, %v1968_v50 }
0x1736   :  { %v1023_v17 = vpop.permute.xlu1 %1022 }
0x1737   :  { %4521 = vmatmul.mubr.msk.f32.vlgmr.msra.gmra.mrb[8].mxu0 %vm157_vm8, %v1023_v17 }
0x1738   :  { %4876 = vmatpush3.bf16.msra.mxu0 %v5333_v14  ;;  %4542 = vmatprep.mubr.msk.f32.mxu0 %vm5250_vm0, %v5251_v21 }
0x1739   :  { %4877 = vmatprep.subr.bf16.mxu0 %v5249_v9 }
0x173c   :  { %4879 = vmatpush3.bf16.msra.mxu0 %v5348_v20 }
0x173d   :  { %4886 = vmatprep.subr.bf16.mxu0 %v5249_v9 }
0x180a   :  { %v1092_v22 = vpop.f32.mrb[8].mxu0 }
0x180b   :  { %v1096_v23 = vadd.f32 %v1092_v22, %v5562_v19  ;;  %v4522_v24 = vpop.f32.mrb[9].mxu0 }
0x180d   :  { %v4143_v25 = vmul.f32 -1.442695, %v1096_v23 }
0x180f   :  { %5080 = vpow2.f32 %v4143_v25 }
0x1819   :  { %v5081_v26 = vpop.eup %5080 }
0x181a   :  { %v1100_v27 = vadd.f32 1.0, %v5081_v26 }
0x181c   :  { %5082 = vrcp.f32 %v1100_v27 }
0x1826   :  { %v5083_v28 = vpop.eup %5082 }
0x1827   :  { %v1103_v29 = vmul.f32 2.0, %v5083_v28 }
0x1829   :  { %v4144_v30 = vadd.f32 -1.0, %v1103_v29 }
0x182b   :  { %v1105_v33 = vsel %vm5388_vm7, %v4144_v30, %v5083_v28 }
0x182c   :  { %1111 = vrot.lane.b32.xlu0 %v1105_v33, %s5252_s1  ;;  %v1109_v36 = vmul.f32 %v1107_v34, %v1105_v33 }
0x189e   :  { %v1112_v32 = vpop.permute.xlu0 %1111 }
0x189f   :  { %v1114_v35 = vmul.f32 %v1112_v32, %v1105_v33 }
0x18a1   :  { %1116 = vrot.lane.b32.xlu1 %v1114_v35, %s5253_s11 }
0x1913   :  { %v1117_v38 = vpop.permute.xlu1 %1116 }
0x1914   :  { %v1119_v39 = vadd.f32 %v1117_v38, %v1109_v36 }
0x1916   :  { %5084 = vtanh.f32 %v1119_v39  ;;  %v1215_v61 = vrot.slane %v1119_v39, 7 }
0x1920   :  { %v5085_v40 = vpop.eup %5084 }
0x1921   :  { %1122 = vrot.lane.b32.xlu0 %v5085_v40, %s5252_s1 }
0x1993   :  { %v1123_v41 = vpop.permute.xlu0 %1122 }
0x1994   :  { %v1125_v45 = vmul.f32 %v1123_v41, %v1105_v33 }
0x1996   :  { %1127 = vrot.lane.b32.xlu1 %v1125_v45, %s5253_s11  ;;  %v1991_v37 = vrot.slane %v1125_v45, %v5412_v11 }
0x1998   :  { %v1993_v13 = vsel %vm1983_vm1, %v1991_v37, 0.0 }
0x1a08   :  { %v1128_v46 = vpop.permute.xlu1 %1127 }
0x1a09   :  { %4532 = vmatmul.mubr.msk.f32.vlgmr.msra.gmra.mrb[10].mxu1 %vm157_vm8, %v1128_v46 }
0x1a0a   :  { %4882 = vmatpush3.bf16.msra.mxu1 %v5333_v14  ;;  %4553 = vmatprep.mubr.msk.f32.mxu1 %vm5250_vm0, %v5251_v21 }
0x1a0b   :  { %4883 = vmatprep.subr.bf16.mxu1 %v5249_v9 }
0x1a0e   :  { %4885 = vmatpush3.bf16.msra.mxu1 %v5348_v20 }
0x1a0f   :  { %4892 = vmatprep.subr.bf16.mxu1 %v5249_v9 }
0x1adc   :  { %v1197_v48 = vpop.f32.mrb[10].mxu1 }
0x1add   :  { %v1202_v49 = vrot.slane %v1197_v48, 7  ;;  %v4533_v50 = vpop.f32.mrb[11].mxu1 }
0x1adf   :  { %v1204_v51 = vadd.f32 %v1202_v49, %v5562_v19 }
0x1ae1   :  { %v4146_v52 = vmul.f32 -1.442695, %v1204_v51 }
0x1ae3   :  { %5086 = vpow2.f32 %v4146_v52 }
0x1aed   :  { %v5087_v53 = vpop.eup %5086 }
0x1aee   :  { %v1208_v54 = vadd.f32 1.0, %v5087_v53 }
0x1af0   :  { %5088 = vrcp.f32 %v1208_v54 }
0x1afa   :  { %v5089_v55 = vpop.eup %5088 }
0x1afb   :  { %v1211_v56 = vmul.f32 2.0, %v5089_v55 }
0x1afd   :  { %v4147_v57 = vadd.f32 -1.0, %v1211_v56 }
0x1aff   :  { %v1213_v58 = vsel %vm5388_vm7, %v4147_v57, %v5089_v55 }
0x1b00   :  { %1219 = vrot.lane.b32.xlu0 %v1213_v58, %s5252_s1  ;;  %v1217_v62 = vmul.f32 %v1215_v61, %v1213_v58 }
0x1b72   :  { %v1220_v59 = vpop.permute.xlu0 %1219 }
0x1b73   :  { %v1222_v60 = vmul.f32 %v1220_v59, %v1213_v58 }
0x1b75   :  { %1224 = vrot.lane.b32.xlu1 %v1222_v60, %s5253_s11 }
0x1be7   :  { %v1225_v63 = vpop.permute.xlu1 %1224 }
0x1be8   :  { %v1227_v0 = vadd.f32 %v1225_v63, %v1217_v62 }
0x1bea   :  { %5090 = vtanh.f32 %v1227_v0  ;;  %v1324_v34 = vrot.slane %v1227_v0, 7 }
0x1bf4   :  { %v5091_v1 = vpop.eup %5090 }
0x1bf5   :  { %1230 = vrot.lane.b32.xlu0 %v5091_v1, %s5252_s1 }
0x1c67   :  { %v1231_v3 = vpop.permute.xlu0 %1230 }
0x1c68   :  { %v1233_v4 = vmul.f32 %v1231_v3, %v1213_v58 }
0x1c6a   :  { %v1235_v7 = vrot.slane %v1233_v4, 1  ;;  %v2003_v10 = vrot.slane %v1233_v4, %v5415_v12 }
0x1c6c   :  { %v2005_v15 = vsel %vm1995_vm2, %v2003_v10, %v1993_v13  ;;  %1236 = vrot.lane.b32.xlu1 %v1235_v7, %s5253_s11 }
0x1cde   :  { %v1237_v17 = vpop.permute.xlu1 %1236 }
0x1cdf   :  { %4543 = vmatmul.mubr.msk.f32.vlgmr.msra.gmra.mrb[10].mxu0 %vm157_vm8, %v1237_v17 }
0x1ce0   :  { %4888 = vmatpush3.bf16.msra.mxu0 %v5333_v14  ;;  %4564 = vmatprep.mubr.msk.f32.mxu0 %vm5250_vm0, %v5251_v21 }
0x1ce1   :  { %4889 = vmatprep.subr.bf16.mxu0 %v5249_v9 }
0x1ce4   :  { %4891 = vmatpush3.bf16.msra.mxu0 %v5348_v20 }
0x1ce5   :  { %4898 = vmatprep.subr.bf16.mxu0 %v5249_v9 }
0x1db2   :  { %v1306_v18 = vpop.f32.mrb[10].mxu0 }
0x1db3   :  { %v1311_v22 = vrot.slane %v1306_v18, 6  ;;  %v4544_v23 = vpop.f32.mrb[11].mxu0 }
0x1db5   :  { %v1313_v24 = vadd.f32 %v1311_v22, %v5562_v19 }
0x1db7   :  { %v4149_v25 = vmul.f32 -1.442695, %v1313_v24 }
0x1db9   :  { %5092 = vpow2.f32 %v4149_v25 }
0x1dc3   :  { %v5093_v26 = vpop.eup %5092 }
0x1dc4   :  { %v1317_v27 = vadd.f32 1.0, %v5093_v26 }
0x1dc6   :  { %5094 = vrcp.f32 %v1317_v27 }
0x1dd0   :  { %v5095_v28 = vpop.eup %5094 }
0x1dd1   :  { %v1320_v29 = vmul.f32 2.0, %v5095_v28 }
0x1dd3   :  { %v4150_v30 = vadd.f32 -1.0, %v1320_v29 }
0x1dd5   :  { %v1322_v33 = vsel %vm5388_vm7, %v4150_v30, %v5095_v28 }
0x1dd6   :  { %1328 = vrot.lane.b32.xlu0 %v1322_v33, %s5252_s1  ;;  %v1326_v36 = vmul.f32 %v1324_v34, %v1322_v33 }
0x1e48   :  { %v1329_v32 = vpop.permute.xlu0 %1328 }
0x1e49   :  { %v1331_v35 = vmul.f32 %v1329_v32, %v1322_v33 }
0x1e4b   :  { %1333 = vrot.lane.b32.xlu1 %v1331_v35, %s5253_s11 }
0x1ebd   :  { %v1334_v38 = vpop.permute.xlu1 %1333 }
0x1ebe   :  { %v1336_v39 = vadd.f32 %v1334_v38, %v1326_v36 }
0x1ec0   :  { %5096 = vtanh.f32 %v1336_v39  ;;  %v1433_v0 = vrot.slane %v1336_v39, 7 }
0x1eca   :  { %v5097_v40 = vpop.eup %5096 }
0x1ecb   :  { %1339 = vrot.lane.b32.xlu0 %v5097_v40, %s5252_s1 }
0x1f3d   :  { %v1340_v41 = vpop.permute.xlu0 %1339 }
0x1f3e   :  { %v1342_v45 = vmul.f32 %v1340_v41, %v1322_v33 }
0x1f40   :  { %v1344_v46 = vrot.slane %v1342_v45, 2  ;;  %v2015_v48 = vrot.slane %v1342_v45, %v5439_v47 }
0x1f42   :  { %v2017_v49 = vsel %vm2007_vm3, %v2015_v48, %v2005_v15  ;;  %1345 = vrot.lane.b32.xlu1 %v1344_v46, %s5253_s11 }
0x1fb4   :  { %v1346_v50 = vpop.permute.xlu1 %1345 }
0x1fb5   :  { %4554 = vmatmul.mubr.msk.f32.vlgmr.msra.gmra.mrb[12].mxu1 %vm157_vm8, %v1346_v50 }
0x1fb6   :  { %4894 = vmatpush3.bf16.msra.mxu1 %v5333_v14  ;;  %4575 = vmatprep.mubr.msk.f32.mxu1 %vm5250_vm0, %v5251_v21 }
0x1fb7   :  { %4895 = vmatprep.subr.bf16.mxu1 %v5249_v9 }
0x1fba   :  { %4897 = vmatpush3.bf16.msra.mxu1 %v5348_v20 }
0x1fbb   :  { %4904 = vmatprep.subr.bf16.mxu1 %v5249_v9 }
0x2088   :  { %v1415_v51 = vpop.f32.mrb[12].mxu1 }
0x2089   :  { %v1420_v52 = vrot.slane %v1415_v51, 5  ;;  %v4555_v53 = vpop.f32.mrb[13].mxu1 }
0x208b   :  { %v1422_v54 = vadd.f32 %v1420_v52, %v5562_v19 }
0x208d   :  { %v4152_v55 = vmul.f32 -1.442695, %v1422_v54 }
0x208f   :  { %5098 = vpow2.f32 %v4152_v55 }
0x2099   :  { %v5099_v56 = vpop.eup %5098 }
0x209a   :  { %v1426_v57 = vadd.f32 1.0, %v5099_v56 }
0x209c   :  { %5100 = vrcp.f32 %v1426_v57 }
0x20a6   :  { %v5101_v58 = vpop.eup %5100 }
0x20a7   :  { %v1429_v59 = vmul.f32 2.0, %v5101_v58 }
0x20a9   :  { %v4153_v60 = vadd.f32 -1.0, %v1429_v59 }
0x20ab   :  { %v1431_v61 = vsel %vm5388_vm7, %v4153_v60, %v5101_v58 }
0x20ac   :  { %1437 = vrot.lane.b32.xlu0 %v1431_v61, %s5252_s1  ;;  %v1435_v1 = vmul.f32 %v1433_v0, %v1431_v61 }
0x211e   :  { %v1438_v62 = vpop.permute.xlu0 %1437 }
0x211f   :  { %v1440_v63 = vmul.f32 %v1438_v62, %v1431_v61 }
0x2121   :  { %1442 = vrot.lane.b32.xlu1 %v1440_v63, %s5253_s11 }
0x2193   :  { %v1443_v37 = vpop.permute.xlu1 %1442 }
0x2194   :  { %v1445_v3 = vadd.f32 %v1443_v37, %v1435_v1 }
0x2196   :  { %5102 = vtanh.f32 %v1445_v3  ;;  %v1542_v36 = vrot.slane %v1445_v3, 7 }
0x21a0   :  { %v5103_v4 = vpop.eup %5102 }
0x21a1   :  { %1448 = vrot.lane.b32.xlu0 %v5103_v4, %s5252_s1 }
0x2213   :  { %v1449_v7 = vpop.permute.xlu0 %1448 }
0x2214   :  { %v1451_v10 = vmul.f32 %v1449_v7, %v1431_v61 }
0x2216   :  { %v1453_v13 = vrot.slane %v1451_v10, 3  ;;  %v2027_v15 = vrot.slane %v1451_v10, %v5460_v8 }
0x2218   :  { %v2029_v17 = vsel %vm2019_vm5, %v2027_v15, %v2017_v49  ;;  %1454 = vrot.lane.b32.xlu1 %v1453_v13, %s5253_s11 }
0x228a   :  { %v1455_v18 = vpop.permute.xlu1 %1454 }
0x228b   :  { %4565 = vmatmul.mubr.msk.f32.vlgmr.msra.gmra.mrb[12].mxu0 %vm157_vm8, %v1455_v18 }
0x228c   :  { %4900 = vmatpush3.bf16.msra.mxu0 %v5333_v14  ;;  %4586 = vmatprep.mubr.msk.f32.mxu0 %vm5250_vm0, %v5251_v21 }
0x228d   :  { %4901 = vmatprep.subr.bf16.mxu0 %v5249_v9 }
0x2290   :  { %4903 = vmatpush3.bf16.msra.mxu0 %v5348_v20 }
0x235e   :  { %v1524_v22 = vpop.f32.mrb[12].mxu0 }
0x235f   :  { %v1529_v23 = vrot.slane %v1524_v22, 4  ;;  %v4566_v24 = vpop.f32.mrb[13].mxu0 }
0x2361   :  { %v1531_v25 = vadd.f32 %v1529_v23, %v5562_v19 }
0x2363   :  { %v4155_v26 = vmul.f32 -1.442695, %v1531_v25 }
0x2365   :  { %5104 = vpow2.f32 %v4155_v26 }
0x236f   :  { %v5105_v27 = vpop.eup %5104 }
0x2370   :  { %v1535_v28 = vadd.f32 1.0, %v5105_v27 }
0x2372   :  { %5106 = vrcp.f32 %v1535_v28 }
0x237c   :  { %v5107_v29 = vpop.eup %5106 }
0x237d   :  { %v1538_v30 = vmul.f32 2.0, %v5107_v29 }
0x237f   :  { %v4156_v33 = vadd.f32 -1.0, %v1538_v30 }
0x2381   :  { %v1540_v32 = vsel %vm5388_vm7, %v4156_v33, %v5107_v29 }
0x2382   :  { %1546 = vrot.lane.b32.xlu0 %v1540_v32, %s5252_s1  ;;  %v1544_v38 = vmul.f32 %v1542_v36, %v1540_v32 }
0x23f4   :  { %v1547_v35 = vpop.permute.xlu0 %1546 }
0x23f5   :  { %v1549_v34 = vmul.f32 %v1547_v35, %v1540_v32 }
0x23f7   :  { %1551 = vrot.lane.b32.xlu1 %v1549_v34, %s5253_s11 }
0x2469   :  { %v1552_v39 = vpop.permute.xlu1 %1551 }
0x246a   :  { %v1554_v40 = vadd.f32 %v1552_v39, %v1544_v38 }
0x246c   :  { %5108 = vtanh.f32 %v1554_v40  ;;  %v1651_v63 = vrot.slane %v1554_v40, 7 }
0x2476   :  { %v5109_v41 = vpop.eup %5108 }
0x2477   :  { %1557 = vrot.lane.b32.xlu0 %v5109_v41, %s5252_s1 }
0x24e9   :  { %v1558_v45 = vpop.permute.xlu0 %1557 }
0x24ea   :  { %v1560_v46 = vmul.f32 %v1558_v45, %v1540_v32 }
0x24ec   :  { %v1562_v48 = vrot.slane %v1560_v46, 4  ;;  %v2039_v49 = vrot.slane %v1560_v46, %v5481_v43 }
0x24ee   :  { %v2041_v50 = vsel %vm6046_vm6, %v2039_v49, %v2029_v17  ;;  %1563 = vrot.lane.b32.xlu1 %v1562_v48, %s5253_s11  ;;  %vm6047_vm6 = vcmp.eq.s32.totalorder %v5585_v2, 13 }
0x2560   :  { %v1564_v51 = vpop.permute.xlu1 %1563 }
0x2561   :  { %4576 = vmatmul.mubr.msk.f32.vlgmr.msra.gmra.mrb[14].mxu1 %vm157_vm8, %v1564_v51 }
0x2562   :  { %4906 = vmatpush3.bf16.msra.mxu1 %v5333_v14  ;;  %4597 = vmatprep.mubr.msk.f32.mxu1 %vm5250_vm0, %v5251_v21 }
0x2563   :  { %4907 = vmatprep.subr.bf16.mxu1 %v5249_v9 }
0x2566   :  { %4909 = vmatpush3.bf16.msra.mxu1 %v5348_v20 }
0x2567   :  { %4918 = vmatprep.subr.bf16.mxu1 %v5249_v9 }
0x2634   :  { %v1633_v52 = vpop.f32.mrb[14].mxu1 }
0x2635   :  { %v1638_v53 = vrot.slane %v1633_v52, 3  ;;  %v4577_v54 = vpop.f32.mrb[15].mxu1 }
0x2637   :  { %v1640_v55 = vadd.f32 %v1638_v53, %v5562_v19 }
0x2639   :  { %v4158_v56 = vmul.f32 -1.442695, %v1640_v55 }
0x263b   :  { %5110 = vpow2.f32 %v4158_v56 }
0x2645   :  { %v5111_v57 = vpop.eup %5110 }
0x2646   :  { %v1644_v58 = vadd.f32 1.0, %v5111_v57 }
0x2648   :  { %5112 = vrcp.f32 %v1644_v58 }
0x2652   :  { %v5113_v14 = vpop.eup %5112 }
0x2653   :  { %v1647_v59 = vmul.f32 2.0, %v5113_v14 }
0x2655   :  { %v4159_v60 = vadd.f32 -1.0, %v1647_v59 }
0x2657   :  { %v1649_v61 = vsel %vm5388_vm7, %v4159_v60, %v5113_v14 }
0x2658   :  { %1655 = vrot.lane.b32.xlu0 %v1649_v61, %s5252_s1  ;;  %v1653_v0 = vmul.f32 %v1651_v63, %v1649_v61 }
0x26ca   :  { %v1656_v20 = vpop.permute.xlu0 %1655 }
0x26cb   :  { %v1658_v62 = vmul.f32 %v1656_v20, %v1649_v61 }
0x26cd   :  { %1660 = vrot.lane.b32.xlu1 %v1658_v62, %s5253_s11 }
0x273f   :  { %v1661_v1 = vpop.permute.xlu1 %1660 }
0x2740   :  { %v1663_v37 = vadd.f32 %v1661_v1, %v1653_v0 }
0x2742   :  { %5114 = vtanh.f32 %v1663_v37  ;;  %v1760_v34 = vrot.slane %v1663_v37, 7  ;;  %v2078_v37 = vld [vmem:[%s6040_s3] sm:$0xff] }
0x274c   :  { %v5115_v3 = vpop.eup %5114 }
0x274d   :  { %1666 = vrot.lane.b32.xlu0 %v5115_v3, %s5252_s1  ;;  %v2079_v3 = vld [vmem:[%s6040_s3 + $0x8] sm:$0xff] }
0x27bf   :  { %v1667_v4 = vpop.permute.xlu0 %1666 }
0x27c0   :  { %v1669_v7 = vmul.f32 %v1667_v4, %v1649_v61  ;;  %v4910_v4 = vpack.c.bf16 %v2079_v3, %v2078_v37 }
0x27c2   :  { %v1671_v10 = vrot.slane %v1669_v7, 5  ;;  %v2051_v13 = vrot.slane %v1669_v7, %v5502_v6  ;;  %v4170_v7 = vld [vmem:[%s6041_s4 + $0x28] sm:$0xff]  ;;  %4911 = vmatprep.subr.bf16.mxu0 %v4910_v4 }
0x27c4   :  { %1672 = vrot.lane.b32.xlu1 %v1671_v10, %s5253_s11  ;;  %v2053_v15 = vsel %vm6047_vm6, %v2051_v13, %v2041_v50  ;;  %vm6048_vm6 = vcmp.eq.s32.totalorder %v5585_v2, 14  ;;  %v2080_v10 = vld [vmem:[%s6040_s3 + $0x10] sm:$0xff]  ;;  %v2081_v13 = vld [vmem:[%s6040_s3 + $0x18] sm:$0xff] }
0x2836   :  { %v1673_v17 = vpop.permute.xlu1 %1672 }
0x2837   :  { %4587 = vmatmul.mubr.msk.f32.vlgmr.msra.gmra.mrb[14].mxu0 %vm157_vm8, %v1673_v17  ;;  %v4914_v17 = vpack.c.bf16 %v2081_v13, %v2080_v10 }
0x2838   :  { %4913 = vmatpush3.bf16.msra.mxu0 %v4910_v4 }
0x2839   :  { %4915 = vmatprep.subr.bf16.mxu0 %v4914_v17 }
0x283c   :  { %4917 = vmatpush3.bf16.msra.mxu0 %v4914_v17 }
0x283d   :  { %4924 = vmatprep.subr.bf16.mxu0 %v5249_v9 }
0x290a   :  { %v1742_v18 = vpop.f32.mrb[14].mxu0 }
0x290b   :  { %v1747_v22 = vrot.slane %v1742_v18, 2  ;;  %v4588_v23 = vpop.f32.mrb[15].mxu0  ;;  %v4171_v18 = vld [vmem:[%s6041_s4 + $0x30] sm:$0xff] }
0x290d   :  { %v1749_v24 = vadd.f32 %v1747_v22, %v5562_v19  ;;  %v4172_v22 = vld [vmem:[%s6041_s4 + $0x38] sm:$0xff] }
0x290e   :  { %v5720_v23 = vpack.c.bf16 %v4172_v22, %v4171_v18 }
0x290f   :  { %v4161_v25 = vmul.f32 -1.442695, %v1749_v24 }
0x2911   :  { %5116 = vpow2.f32 %v4161_v25 }
0x291b   :  { %v5117_v26 = vpop.eup %5116 }
0x291c   :  { %v1753_v27 = vadd.f32 1.0, %v5117_v26 }
0x291e   :  { %5118 = vrcp.f32 %v1753_v27 }
0x2928   :  { %v5119_v28 = vpop.eup %5118 }
0x2929   :  { %v1756_v29 = vmul.f32 2.0, %v5119_v28 }
0x292b   :  { %v4162_v30 = vadd.f32 -1.0, %v1756_v29 }
0x292d   :  { %v1758_v33 = vsel %vm5388_vm7, %v4162_v30, %v5119_v28 }
0x292e   :  { %1764 = vrot.lane.b32.xlu0 %v1758_v33, %s5252_s1  ;;  %v1762_v36 = vmul.f32 %v1760_v34, %v1758_v33 }
0x29a0   :  { %v1765_v32 = vpop.permute.xlu0 %1764 }
0x29a1   :  { %v1767_v35 = vmul.f32 %v1765_v32, %v1758_v33  ;;  %v4166_v32 = vld [vmem:[%s6042_s5] ss:$0 sm:$0xff] }
0x29a3   :  { %1769 = vrot.lane.b32.xlu1 %v1767_v35, %s5253_s11 }
0x2a15   :  { %v1770_v38 = vpop.permute.xlu1 %1769 }
0x2a16   :  { %v1772_v39 = vadd.f32 %v1770_v38, %v1762_v36 }
0x2a18   :  { %5120 = vtanh.f32 %v1772_v39 }
0x2a22   :  { %v5121_v40 = vpop.eup %5120 }
0x2a23   :  { %1775 = vrot.lane.b32.xlu0 %v5121_v40, %s5252_s1 }
0x2a95   :  { %v1776_v41 = vpop.permute.xlu0 %1775 }
0x2a96   :  { %v1778_v45 = vmul.f32 %v1776_v41, %v1758_v33 }
0x2a98   :  { %v1780_v46 = vrot.slane %v1778_v45, 6  ;;  %v2063_v48 = vrot.slane %v1778_v45, %v5523_v42 }
0x2a9a   :  { %1781 = vrot.lane.b32.xlu1 %v1780_v46, %s5253_s11  ;;  %v5679_v49 = vsel %vm6048_vm6, %v2063_v48, %v2053_v15  ;;  %vm2067_vm6 = vcmp.eq.s32.totalorder %v5585_v2, 15 }
0x2b0c   :  { %v1782_v50 = vpop.permute.xlu1 %1781 }
0x2b0d   :  { %4598 = vmatmul.mubr.msk.f32.vlgmr.msra.gmra.mrb[16].mxu1 %vm157_vm8, %v1782_v50 }
0x2b0e   :  { %4619 = vmatprep.mubr.msk.f32.mxu1 %vm5250_vm0, %v5251_v21 }
0x2be0   :  { %v1851_v51 = vpop.f32.mrb[16].mxu1 }
0x2be1   :  { %v1856_v52 = vrot.slane %v1851_v51, 1  ;;  %v4599_v53 = vpop.f32.mrb[17].mxu1 }
0x2be3   :  { %v1858_v54 = vadd.f32 %v1856_v52, %v5562_v19  ;;  %v1869_v19 = vrot.slane %v1772_v39, 7 }
0x2be5   :  { %v4164_v55 = vmul.f32 -1.442695, %v1858_v54 }
0x2be7   :  { %5122 = vpow2.f32 %v4164_v55 }
0x2bf1   :  { %v5123_v56 = vpop.eup %5122 }
0x2bf2   :  { %v1862_v57 = vadd.f32 1.0, %v5123_v56 }
0x2bf4   :  { %5124 = vrcp.f32 %v1862_v57 }
0x2bfe   :  { %v5125_v58 = vpop.eup %5124 }
0x2bff   :  { %v1865_v14 = vmul.f32 2.0, %v5125_v58 }
0x2c01   :  { %v4165_v59 = vadd.f32 -1.0, %v1865_v14 }
0x2c03   :  { %v1867_v60 = vsel %vm5388_vm7, %v4165_v59, %v5125_v58 }
0x2c04   :  { %1873 = vrot.lane.b32.xlu0 %v1867_v60, %s5252_s1  ;;  %v1871_v62 = vmul.f32 %v1869_v19, %v1867_v60 }
0x2c76   :  { %v1874_v61 = vpop.permute.xlu0 %1873 }
0x2c77   :  { %v1876_v20 = vmul.f32 %v1874_v61, %v1867_v60 }
0x2c79   :  { %1878 = vrot.lane.b32.xlu1 %v1876_v20, %s5253_s11 }
0x2c7d   :  { %2091 = vrot.lane.b32.xlu1 %v5551_v16, %s5253_s11  ;;  %v4169_v16 = vld [vmem:[%s6041_s4 + $0x20] sm:$0xff] }
0x2c7e   :  { %v5710_v15 = vpack.c.bf16 %v4170_v7, %v4169_v16 }
0x2c80   :  { %4920 = vmatpush3.bf16.msra.mxu1 %v5710_v15 }
0x2c81   :  { %4921 = vmatprep.subr.bf16.mxu1 %v5249_v9 }
0x2c84   :  { %4923 = vmatpush3.bf16.msra.mxu1 %v5720_v23 }
0x2c85   :  { %4930 = vmatprep.subr.bf16.mxu1 %v5249_v9 }
0x2c87   :  { %4620 = vmatmul.mubr.f32.vlgmr.msra.gmra.mrb[18].mxu1 %v5251_v21 }
0x2c88   :  { %4932 = vmatpush3.bf16.msra.mxu1 %v5710_v15  ;;  %4641 = vmatprep.mubr.msk.f32.mxu1 %vm5250_vm0, %v5251_v21 }
0x2c89   :  { %4933 = vmatprep.subr.bf16.mxu1 %v5249_v9 }
0x2c8c   :  { %4935 = vmatpush3.bf16.msra.mxu1 %v5720_v23 }
0x2c8d   :  { %4942 = vmatprep.subr.bf16.mxu1 %v5249_v9 }
0x2ceb   :  { %v1879_v63 = vpop.permute.xlu1 %1878 }
0x2cec   :  { %v1881_v0 = vadd.f32 %v1879_v63, %v1871_v62 }
0x2cee   :  { %5126 = vtanh.f32 %v1881_v0 }
0x2cef   :  { %v2092_v1 = vpop.permute.xlu1 %2091 }
0x2cf0   :  { %4608 = vmatprep.mubr.msk.f32.mxu0 %vm157_vm8, %v2092_v1 }
0x2cf8   :  { %v5127_v24 = vpop.eup %5126 }
0x2cf9   :  { %1884 = vrot.lane.b32.xlu0 %v5127_v24, %s5252_s1 }
0x2d5a   :  { %v2245_v30 = vpop.f32.mrb[18].mxu1 }
0x2d5b   :  { %v4621_v33 = vpop.f32.mrb[19].mxu1 }
0x2d6b   :  { %v1885_v25 = vpop.permute.xlu0 %1884 }
0x2d6c   :  { %v1887_v26 = vmul.f32 %v1885_v25, %v1867_v60 }
0x2d6e   :  { %v2075_v27 = vrot.slane %v1887_v26, %v5544_v5 }
0x2d70   :  { %v2077_v28 = vsel %vm2067_vm6, %v2075_v27, %v5679_v49 }
0x2d71   :  { %2093 = vrot.lane.b32.xlu0 %v2077_v28, %s5253_s11 }
0x2de3   :  { %v2094_v29 = vpop.permute.xlu0 %2093 }
0x2de4   :  { %4609 = vmatmul.mubr.msk.f32.vlgmr.msra.gmra.mrb[16].mxu0 %vm157_vm8, %v2094_v29 }
0x2de5   :  { %4926 = vmatpush3.bf16.msra.mxu0 %v5710_v15  ;;  %4630 = vmatprep.mubr.msk.f32.mxu0 %vm5250_vm0, %v5251_v21 }
0x2de6   :  { %4927 = vmatprep.subr.bf16.mxu0 %v5249_v9 }
0x2de9   :  { %4929 = vmatpush3.bf16.msra.mxu0 %v5720_v23 }
0x2dea   :  { %4936 = vmatprep.subr.bf16.mxu0 %v5249_v9 }
0x2eb7   :  { %v4610_v35 = vpop.f32.mrb[16].mxu0 }
0x2eb8   :  { %v5749_v34 = vadd.f32 %v4610_v35, %v4166_v32  ;;  %v2165_v36 = vpop.f32.mrb[17].mxu0 }
0x2eb9   :  { %v5751_v38 = vadd.f32 %v4166_v32, %v2165_v36 }
0x2ebb   :  { %v2249_v39 = vadd.f32 %v2245_v30, %v5751_v38 }
0x2ebd   :  { %v4173_v40 = vmul.f32 -1.442695, %v2249_v39 }
0x2ebf   :  { %5128 = vpow2.f32 %v4173_v40 }
0x2ec9   :  { %v5129_v41 = vpop.eup %5128 }
0x2eca   :  { %v2253_v45 = vadd.f32 1.0, %v5129_v41 }
0x2ecc   :  { %5130 = vrcp.f32 %v2253_v45 }
0x2ed6   :  { %v5131_v46 = vpop.eup %5130 }
0x2ed7   :  { %v2256_v48 = vmul.f32 2.0, %v5131_v46 }
0x2ed9   :  { %v4174_v49 = vadd.f32 -1.0, %v2256_v48 }
0x2edb   :  { %v2258_v50 = vsel %vm5388_vm7, %v4174_v49, %v5131_v46 }
0x2edc   :  { %2261 = vrot.lane.b32.xlu1 %v2258_v50, %s5252_s1  ;;  %v2259_v53 = vmul.f32 0.0, %v2258_v50 }
0x2f4e   :  { %v2262_v51 = vpop.permute.xlu1 %2261 }
0x2f4f   :  { %v2264_v52 = vmul.f32 %v2262_v51, %v2258_v50 }
0x2f51   :  { %2266 = vrot.lane.b32.xlu0 %v2264_v52, %s5253_s11 }
0x2fc3   :  { %v2267_v54 = vpop.permute.xlu0 %2266 }
0x2fc4   :  { %v2269_v55 = vadd.f32 %v2267_v54, %v2259_v53 }
0x2fc6   :  { %5132 = vtanh.f32 %v2269_v55  ;;  %v2365_v7 = vrot.slane %v2269_v55, 7 }
0x2fd0   :  { %v5133_v56 = vpop.eup %5132 }
0x2fd1   :  { %2272 = vrot.lane.b32.xlu1 %v5133_v56, %s5252_s1 }
0x3043   :  { %v2273_v57 = vpop.permute.xlu1 %2272 }
0x3044   :  { %v2275_v58 = vmul.f32 %v2273_v57, %v2258_v50 }
0x3046   :  { %2277 = vrot.lane.b32.xlu0 %v2275_v58, %s5253_s11  ;;  %v3909_v22 = vrot.slane %v2275_v58, %v5412_v11 }
0x3048   :  { %v3910_v28 = vsel %vm50_vm4, %v3909_v22, 0.0  ;;  %vm6051_vm4 = vcmp.eq.s32.totalorder %v5585_v2, 12 }
0x30b8   :  { %v2278_v14 = vpop.permute.xlu0 %2277 }
0x30b9   :  { %4631 = vmatmul.mubr.msk.f32.vlgmr.msra.gmra.mrb[18].mxu0 %vm157_vm8, %v2278_v14 }
0x30ba   :  { %4938 = vmatpush3.bf16.msra.mxu0 %v5710_v15  ;;  %4652 = vmatprep.mubr.msk.f32.mxu0 %vm5250_vm0, %v5251_v21 }
0x30bb   :  { %4939 = vmatprep.subr.bf16.mxu0 %v5249_v9 }
0x30be   :  { %4941 = vmatpush3.bf16.msra.mxu0 %v5720_v23 }
0x30bf   :  { %4948 = vmatprep.subr.bf16.mxu0 %v5249_v9 }
0x318c   :  { %v2347_v59 = vpop.f32.mrb[18].mxu0 }
0x318d   :  { %v2352_v60 = vrot.slane %v2347_v59, 7  ;;  %v4632_v61 = vpop.f32.mrb[19].mxu0 }
0x318f   :  { %v2354_v20 = vadd.f32 %v2352_v60, %v5751_v38 }
0x3191   :  { %v4176_v19 = vmul.f32 -1.442695, %v2354_v20 }
0x3193   :  { %5134 = vpow2.f32 %v4176_v19 }
0x319d   :  { %v5135_v62 = vpop.eup %5134 }
0x319e   :  { %v2358_v63 = vadd.f32 1.0, %v5135_v62 }
0x31a0   :  { %5136 = vrcp.f32 %v2358_v63 }
0x31aa   :  { %v5137_v0 = vpop.eup %5136 }
0x31ab   :  { %v2361_v1 = vmul.f32 2.0, %v5137_v0 }
0x31ad   :  { %v4177_v37 = vadd.f32 -1.0, %v2361_v1 }
0x31af   :  { %v2363_v3 = vsel %vm5388_vm7, %v4177_v37, %v5137_v0 }
0x31b0   :  { %2369 = vrot.lane.b32.xlu1 %v2363_v3, %s5252_s1  ;;  %v2367_v10 = vmul.f32 %v2365_v7, %v2363_v3 }
0x3222   :  { %v2370_v16 = vpop.permute.xlu1 %2369 }
0x3223   :  { %v2372_v4 = vmul.f32 %v2370_v16, %v2363_v3 }
0x3225   :  { %2374 = vrot.lane.b32.xlu0 %v2372_v4, %s5253_s11 }
0x3297   :  { %v2375_v13 = vpop.permute.xlu0 %2374 }
0x3298   :  { %v2377_v17 = vadd.f32 %v2375_v13, %v2367_v10 }
0x329a   :  { %5138 = vtanh.f32 %v2377_v17  ;;  %v2474_v52 = vrot.slane %v2377_v17, 7 }
0x32a4   :  { %v5139_v18 = vpop.eup %5138 }
0x32a5   :  { %2380 = vrot.lane.b32.xlu1 %v5139_v18, %s5252_s1 }
0x3317   :  { %v2381_v24 = vpop.permute.xlu1 %2380 }
0x3318   :  { %v2383_v25 = vmul.f32 %v2381_v24, %v2363_v3 }
0x331a   :  { %v2385_v26 = vrot.slane %v2383_v25, 1  ;;  %v3915_v27 = vrot.slane %v2383_v25, %v5415_v12 }
0x331c   :  { %v3916_v29 = vsel %vm1898_vm9, %v3915_v27, %v3910_v28  ;;  %2386 = vrot.lane.b32.xlu0 %v2385_v26, %s5253_s11  ;;  %vm6053_vm9 = vcmp.eq.s32.totalorder %v5585_v2, 14 }
0x338e   :  { %v2387_v30 = vpop.permute.xlu0 %2386 }
0x338f   :  { %4642 = vmatmul.mubr.msk.f32.vlgmr.msra.gmra.mrb[20].mxu1 %vm157_vm8, %v2387_v30 }
0x3390   :  { %4944 = vmatpush3.bf16.msra.mxu1 %v5710_v15  ;;  %4663 = vmatprep.mubr.msk.f32.mxu1 %vm5250_vm0, %v5251_v21 }
0x3391   :  { %4945 = vmatprep.subr.bf16.mxu1 %v5249_v9 }
0x3394   :  { %4947 = vmatpush3.bf16.msra.mxu1 %v5720_v23 }
0x3395   :  { %4954 = vmatprep.subr.bf16.mxu1 %v5249_v9 }
0x3462   :  { %v2456_v33 = vpop.f32.mrb[20].mxu1 }
0x3463   :  { %v2461_v32 = vrot.slane %v2456_v33, 6  ;;  %v4643_v35 = vpop.f32.mrb[21].mxu1 }
0x3465   :  { %v2463_v36 = vadd.f32 %v2461_v32, %v5751_v38 }
0x3467   :  { %v4179_v39 = vmul.f32 -1.442695, %v2463_v36 }
0x3469   :  { %5140 = vpow2.f32 %v4179_v39 }
0x3473   :  { %v5141_v40 = vpop.eup %5140 }
0x3474   :  { %v2467_v41 = vadd.f32 1.0, %v5141_v40 }
0x3476   :  { %5142 = vrcp.f32 %v2467_v41 }
0x3480   :  { %v5143_v45 = vpop.eup %5142 }
0x3481   :  { %v2470_v46 = vmul.f32 2.0, %v5143_v45 }
0x3483   :  { %v4180_v48 = vadd.f32 -1.0, %v2470_v46 }
0x3485   :  { %v2472_v49 = vsel %vm5388_vm7, %v4180_v48, %v5143_v45 }
0x3486   :  { %2478 = vrot.lane.b32.xlu1 %v2472_v49, %s5252_s1  ;;  %v2476_v53 = vmul.f32 %v2474_v52, %v2472_v49 }
0x34f8   :  { %v2479_v50 = vpop.permute.xlu1 %2478 }
0x34f9   :  { %v2481_v51 = vmul.f32 %v2479_v50, %v2472_v49 }
0x34fb   :  { %2483 = vrot.lane.b32.xlu0 %v2481_v51, %s5253_s11 }
0x356d   :  { %v2484_v54 = vpop.permute.xlu0 %2483 }
0x356e   :  { %v2486_v55 = vadd.f32 %v2484_v54, %v2476_v53 }
0x3570   :  { %5144 = vtanh.f32 %v2486_v55  ;;  %v2583_v17 = vrot.slane %v2486_v55, 7 }
0x357a   :  { %v5145_v56 = vpop.eup %5144 }
0x357b   :  { %2489 = vrot.lane.b32.xlu1 %v5145_v56, %s5252_s1 }
0x35ed   :  { %v2490_v57 = vpop.permute.xlu1 %2489 }
0x35ee   :  { %v2492_v58 = vmul.f32 %v2490_v57, %v2472_v49 }
0x35f0   :  { %v2494_v14 = vrot.slane %v2492_v58, 2  ;;  %v3921_v59 = vrot.slane %v2492_v58, %v5439_v47 }
0x35f2   :  { %v3922_v60 = vsel %vm1910_vm10, %v3921_v59, %v3916_v29  ;;  %2495 = vrot.lane.b32.xlu0 %v2494_v14, %s5253_s11 }
0x3664   :  { %v2496_v61 = vpop.permute.xlu0 %2495 }
0x3665   :  { %4653 = vmatmul.mubr.msk.f32.vlgmr.msra.gmra.mrb[20].mxu0 %vm157_vm8, %v2496_v61 }
0x3666   :  { %4950 = vmatpush3.bf16.msra.mxu0 %v5710_v15  ;;  %4674 = vmatprep.mubr.msk.f32.mxu0 %vm5250_vm0, %v5251_v21 }
0x3667   :  { %4951 = vmatprep.subr.bf16.mxu0 %v5249_v9 }
0x366a   :  { %4953 = vmatpush3.bf16.msra.mxu0 %v5720_v23 }
0x366b   :  { %4960 = vmatprep.subr.bf16.mxu0 %v5249_v9 }
0x3738   :  { %v2565_v20 = vpop.f32.mrb[20].mxu0 }
0x3739   :  { %v2570_v19 = vrot.slane %v2565_v20, 5  ;;  %v4654_v62 = vpop.f32.mrb[21].mxu0 }
0x373b   :  { %v2572_v63 = vadd.f32 %v2570_v19, %v5751_v38 }
0x373d   :  { %v4182_v0 = vmul.f32 -1.442695, %v2572_v63 }
0x373f   :  { %5146 = vpow2.f32 %v4182_v0 }
0x3749   :  { %v5147_v1 = vpop.eup %5146 }
0x374a   :  { %v2576_v37 = vadd.f32 1.0, %v5147_v1 }
0x374c   :  { %5148 = vrcp.f32 %v2576_v37 }
0x3756   :  { %v5149_v3 = vpop.eup %5148 }
0x3757   :  { %v2579_v16 = vmul.f32 2.0, %v5149_v3 }
0x3759   :  { %v4183_v4 = vadd.f32 -1.0, %v2579_v16 }
0x375b   :  { %v2581_v7 = vsel %vm5388_vm7, %v4183_v4, %v5149_v3 }
0x375c   :  { %2587 = vrot.lane.b32.xlu1 %v2581_v7, %s5252_s1  ;;  %v2585_v18 = vmul.f32 %v2583_v17, %v2581_v7 }
0x37ce   :  { %v2588_v10 = vpop.permute.xlu1 %2587 }
0x37cf   :  { %v2590_v13 = vmul.f32 %v2588_v10, %v2581_v7 }
0x37d1   :  { %2592 = vrot.lane.b32.xlu0 %v2590_v13, %s5253_s11 }
0x3843   :  { %v2593_v22 = vpop.permute.xlu0 %2592 }
0x3844   :  { %v2595_v24 = vadd.f32 %v2593_v22, %v2585_v18 }
0x3846   :  { %5150 = vtanh.f32 %v2595_v24  ;;  %v2692_v53 = vrot.slane %v2595_v24, 7 }
0x3850   :  { %v5151_v25 = vpop.eup %5150 }
0x3851   :  { %2598 = vrot.lane.b32.xlu1 %v5151_v25, %s5252_s1 }
0x38c3   :  { %v2599_v26 = vpop.permute.xlu1 %2598 }
0x38c4   :  { %v2601_v27 = vmul.f32 %v2599_v26, %v2581_v7 }
0x38c6   :  { %v2603_v28 = vrot.slane %v2601_v27, 3  ;;  %v3927_v29 = vrot.slane %v2601_v27, %v5460_v8 }
0x38c8   :  { %v3928_v30 = vsel %vm1922_vm11, %v3927_v29, %v3922_v60  ;;  %2604 = vrot.lane.b32.xlu0 %v2603_v28, %s5253_s11 }
0x393a   :  { %v2605_v33 = vpop.permute.xlu0 %2604 }
0x393b   :  { %4664 = vmatmul.mubr.msk.f32.vlgmr.msra.gmra.mrb[22].mxu1 %vm157_vm8, %v2605_v33 }
0x393c   :  { %4956 = vmatpush3.bf16.msra.mxu1 %v5710_v15  ;;  %4685 = vmatprep.mubr.msk.f32.mxu1 %vm5250_vm0, %v5251_v21 }
0x393d   :  { %4957 = vmatprep.subr.bf16.mxu1 %v5249_v9 }
0x3940   :  { %4959 = vmatpush3.bf16.msra.mxu1 %v5720_v23 }
0x3941   :  { %4966 = vmatprep.subr.bf16.mxu1 %v5249_v9 }
0x3a0e   :  { %v2674_v32 = vpop.f32.mrb[22].mxu1 }
0x3a0f   :  { %v2679_v35 = vrot.slane %v2674_v32, 4  ;;  %v4665_v36 = vpop.f32.mrb[23].mxu1 }
0x3a11   :  { %v2681_v39 = vadd.f32 %v2679_v35, %v5751_v38 }
0x3a13   :  { %v4185_v40 = vmul.f32 -1.442695, %v2681_v39 }
0x3a15   :  { %5152 = vpow2.f32 %v4185_v40 }
0x3a1f   :  { %v5153_v41 = vpop.eup %5152 }
0x3a20   :  { %v2685_v45 = vadd.f32 1.0, %v5153_v41 }
0x3a22   :  { %5154 = vrcp.f32 %v2685_v45 }
0x3a2c   :  { %v5155_v46 = vpop.eup %5154 }
0x3a2d   :  { %v2688_v48 = vmul.f32 2.0, %v5155_v46 }
0x3a2f   :  { %v4186_v49 = vadd.f32 -1.0, %v2688_v48 }
0x3a31   :  { %v2690_v50 = vsel %vm5388_vm7, %v4186_v49, %v5155_v46 }
0x3a32   :  { %2696 = vrot.lane.b32.xlu1 %v2690_v50, %s5252_s1  ;;  %v2694_v54 = vmul.f32 %v2692_v53, %v2690_v50 }
0x3aa4   :  { %v2697_v51 = vpop.permute.xlu1 %2696 }
0x3aa5   :  { %v2699_v52 = vmul.f32 %v2697_v51, %v2690_v50 }
0x3aa7   :  { %2701 = vrot.lane.b32.xlu0 %v2699_v52, %s5253_s11 }
0x3b19   :  { %v2702_v55 = vpop.permute.xlu0 %2701 }
0x3b1a   :  { %v2704_v56 = vadd.f32 %v2702_v55, %v2694_v54 }
0x3b1c   :  { %5156 = vtanh.f32 %v2704_v56  ;;  %v2801_v18 = vrot.slane %v2704_v56, 7 }
0x3b26   :  { %v5157_v57 = vpop.eup %5156 }
0x3b27   :  { %2707 = vrot.lane.b32.xlu1 %v5157_v57, %s5252_s1 }
0x3b99   :  { %v2708_v58 = vpop.permute.xlu1 %2707 }
0x3b9a   :  { %v2710_v14 = vmul.f32 %v2708_v58, %v2690_v50 }
0x3b9c   :  { %v2712_v59 = vrot.slane %v2710_v14, 4  ;;  %v3933_v60 = vrot.slane %v2710_v14, %v5481_v43 }
0x3b9e   :  { %v3934_v61 = vsel %vm1934_vm12, %v3933_v60, %v3928_v30  ;;  %2713 = vrot.lane.b32.xlu0 %v2712_v59, %s5253_s11 }
0x3c10   :  { %v2714_v20 = vpop.permute.xlu0 %2713 }
0x3c11   :  { %4675 = vmatmul.mubr.msk.f32.vlgmr.msra.gmra.mrb[22].mxu0 %vm157_vm8, %v2714_v20 }
0x3c12   :  { %4962 = vmatpush3.bf16.msra.mxu0 %v5710_v15  ;;  %4696 = vmatprep.mubr.msk.f32.mxu0 %vm5250_vm0, %v5251_v21 }
0x3c13   :  { %4963 = vmatprep.subr.bf16.mxu0 %v5249_v9 }
0x3c16   :  { %4965 = vmatpush3.bf16.msra.mxu0 %v5720_v23 }
0x3c17   :  { %4972 = vmatprep.subr.bf16.mxu0 %v5249_v9 }
0x3ce4   :  { %v2783_v19 = vpop.f32.mrb[22].mxu0 }
0x3ce5   :  { %v2788_v62 = vrot.slane %v2783_v19, 3  ;;  %v4676_v63 = vpop.f32.mrb[23].mxu0 }
0x3ce7   :  { %v2790_v0 = vadd.f32 %v2788_v62, %v5751_v38 }
0x3ce9   :  { %v4188_v1 = vmul.f32 -1.442695, %v2790_v0 }
0x3ceb   :  { %5158 = vpow2.f32 %v4188_v1 }
0x3cf5   :  { %v5159_v37 = vpop.eup %5158 }
0x3cf6   :  { %v2794_v3 = vadd.f32 1.0, %v5159_v37 }
0x3cf8   :  { %5160 = vrcp.f32 %v2794_v3 }
0x3d02   :  { %v5161_v16 = vpop.eup %5160 }
0x3d03   :  { %v2797_v4 = vmul.f32 2.0, %v5161_v16 }
0x3d05   :  { %v4189_v7 = vadd.f32 -1.0, %v2797_v4 }
0x3d07   :  { %v2799_v10 = vsel %vm5388_vm7, %v4189_v7, %v5161_v16 }
0x3d08   :  { %2805 = vrot.lane.b32.xlu1 %v2799_v10, %s5252_s1  ;;  %v2803_v22 = vmul.f32 %v2801_v18, %v2799_v10 }
0x3d7a   :  { %v2806_v13 = vpop.permute.xlu1 %2805 }
0x3d7b   :  { %v2808_v17 = vmul.f32 %v2806_v13, %v2799_v10 }
0x3d7d   :  { %2810 = vrot.lane.b32.xlu0 %v2808_v17, %s5253_s11 }
0x3def   :  { %v2811_v24 = vpop.permute.xlu0 %2810 }
0x3df0   :  { %v2813_v25 = vadd.f32 %v2811_v24, %v2803_v22 }
0x3df2   :  { %5162 = vtanh.f32 %v2813_v25  ;;  %v2910_v54 = vrot.slane %v2813_v25, 7 }
0x3dfc   :  { %v5163_v26 = vpop.eup %5162 }
0x3dfd   :  { %2816 = vrot.lane.b32.xlu1 %v5163_v26, %s5252_s1 }
0x3e6f   :  { %v2817_v27 = vpop.permute.xlu1 %2816 }
0x3e70   :  { %v2819_v28 = vmul.f32 %v2817_v27, %v2799_v10 }
0x3e72   :  { %v2821_v29 = vrot.slane %v2819_v28, 5  ;;  %v3939_v30 = vrot.slane %v2819_v28, %v5502_v6 }
0x3e74   :  { %v3940_v33 = vsel %vm1946_vm13, %v3939_v30, %v3934_v61  ;;  %2822 = vrot.lane.b32.xlu0 %v2821_v29, %s5253_s11 }
0x3ee6   :  { %v2823_v32 = vpop.permute.xlu0 %2822 }
0x3ee7   :  { %4686 = vmatmul.mubr.msk.f32.vlgmr.msra.gmra.mrb[24].mxu1 %vm157_vm8, %v2823_v32 }
0x3ee8   :  { %4968 = vmatpush3.bf16.msra.mxu1 %v5710_v15  ;;  %4707 = vmatprep.mubr.msk.f32.mxu1 %vm5250_vm0, %v5251_v21 }
0x3ee9   :  { %4969 = vmatprep.subr.bf16.mxu1 %v5249_v9 }
0x3eec   :  { %4971 = vmatpush3.bf16.msra.mxu1 %v5720_v23 }
0x3eed   :  { %4978 = vmatprep.subr.bf16.mxu1 %v5249_v9 }
0x3fba   :  { %v2892_v35 = vpop.f32.mrb[24].mxu1 }
0x3fbb   :  { %v2897_v36 = vrot.slane %v2892_v35, 2  ;;  %v4687_v39 = vpop.f32.mrb[25].mxu1 }
0x3fbd   :  { %v2899_v40 = vadd.f32 %v2897_v36, %v5751_v38 }
0x3fbf   :  { %v4191_v41 = vmul.f32 -1.442695, %v2899_v40 }
0x3fc1   :  { %5164 = vpow2.f32 %v4191_v41 }
0x3fcb   :  { %v5165_v45 = vpop.eup %5164 }
0x3fcc   :  { %v2903_v46 = vadd.f32 1.0, %v5165_v45 }
0x3fce   :  { %5166 = vrcp.f32 %v2903_v46 }
0x3fd8   :  { %v5167_v48 = vpop.eup %5166 }
0x3fd9   :  { %v2906_v49 = vmul.f32 2.0, %v5167_v48 }
0x3fdb   :  { %v4192_v50 = vadd.f32 -1.0, %v2906_v49 }
0x3fdd   :  { %v2908_v51 = vsel %vm5388_vm7, %v4192_v50, %v5167_v48 }
0x3fde   :  { %2914 = vrot.lane.b32.xlu1 %v2908_v51, %s5252_s1  ;;  %v2912_v55 = vmul.f32 %v2910_v54, %v2908_v51 }
0x4050   :  { %v2915_v52 = vpop.permute.xlu1 %2914 }
0x4051   :  { %v2917_v53 = vmul.f32 %v2915_v52, %v2908_v51 }
0x4053   :  { %2919 = vrot.lane.b32.xlu0 %v2917_v53, %s5253_s11 }
0x40c5   :  { %v2920_v56 = vpop.permute.xlu0 %2919 }
0x40c6   :  { %v2922_v57 = vadd.f32 %v2920_v56, %v2912_v55 }
0x40c8   :  { %5168 = vtanh.f32 %v2922_v57  ;;  %v3019_v22 = vrot.slane %v2922_v57, 7 }
0x40d2   :  { %v5169_v58 = vpop.eup %5168 }
0x40d3   :  { %2925 = vrot.lane.b32.xlu1 %v5169_v58, %s5252_s1 }
0x4145   :  { %v2926_v14 = vpop.permute.xlu1 %2925 }
0x4146   :  { %v2928_v59 = vmul.f32 %v2926_v14, %v2908_v51 }
0x4148   :  { %v2930_v60 = vrot.slane %v2928_v59, 6  ;;  %v3945_v61 = vrot.slane %v2928_v59, %v5523_v42 }
0x414a   :  { %2931 = vrot.lane.b32.xlu0 %v2930_v60, %s5253_s11  ;;  %v3946_v20 = vsel %vm1958_vm14, %v3945_v61, %v3940_v33 }
0x41bc   :  { %v2932_v19 = vpop.permute.xlu0 %2931 }
0x41bd   :  { %4697 = vmatmul.mubr.msk.f32.vlgmr.msra.gmra.mrb[24].mxu0 %vm157_vm8, %v2932_v19 }
0x41be   :  { %4974 = vmatpush3.bf16.msra.mxu0 %v5710_v15  ;;  %4718 = vmatprep.mubr.msk.f32.mxu0 %vm5250_vm0, %v5251_v21 }
0x41bf   :  { %4975 = vmatprep.subr.bf16.mxu0 %v5249_v9 }
0x41c2   :  { %4977 = vmatpush3.bf16.msra.mxu0 %v5720_v23 }
0x41c3   :  { %4984 = vmatprep.subr.bf16.mxu0 %v5249_v9 }
0x4290   :  { %v3001_v62 = vpop.f32.mrb[24].mxu0 }
0x4291   :  { %v3006_v63 = vrot.slane %v3001_v62, 1  ;;  %v4698_v0 = vpop.f32.mrb[25].mxu0 }
0x4293   :  { %v3008_v1 = vadd.f32 %v3006_v63, %v5751_v38 }
0x4295   :  { %v4194_v37 = vmul.f32 -1.442695, %v3008_v1 }
0x4297   :  { %5170 = vpow2.f32 %v4194_v37 }
0x42a1   :  { %v5171_v3 = vpop.eup %5170 }
0x42a2   :  { %v3012_v16 = vadd.f32 1.0, %v5171_v3 }
0x42a4   :  { %5172 = vrcp.f32 %v3012_v16 }
0x42ae   :  { %v5173_v4 = vpop.eup %5172 }
0x42af   :  { %v3015_v7 = vmul.f32 2.0, %v5173_v4 }
0x42b1   :  { %v4195_v10 = vadd.f32 -1.0, %v3015_v7 }
0x42b3   :  { %v3017_v13 = vsel %vm5388_vm7, %v4195_v10, %v5173_v4 }
0x42b4   :  { %3023 = vrot.lane.b32.xlu1 %v3017_v13, %s5252_s1  ;;  %v3021_v24 = vmul.f32 %v3019_v22, %v3017_v13 }
0x4326   :  { %v3024_v17 = vpop.permute.xlu1 %3023 }
0x4327   :  { %v3026_v18 = vmul.f32 %v3024_v17, %v3017_v13 }
0x4329   :  { %3028 = vrot.lane.b32.xlu0 %v3026_v18, %s5253_s11 }
0x439b   :  { %v3029_v38 = vpop.permute.xlu0 %3028 }
0x439c   :  { %v3031_v25 = vadd.f32 %v3029_v38, %v3021_v24 }
0x439e   :  { %5174 = vtanh.f32 %v3031_v25  ;;  %v3125_v52 = vrot.slane %v3031_v25, 7 }
0x43a8   :  { %v5175_v26 = vpop.eup %5174 }
0x43a9   :  { %3034 = vrot.lane.b32.xlu1 %v5175_v26, %s5252_s1 }
0x441b   :  { %v3035_v27 = vpop.permute.xlu1 %3034 }
0x441c   :  { %v3037_v28 = vmul.f32 %v3035_v27, %v3017_v13 }
0x441e   :  { %v3039_v29 = vrot.slane %v3037_v28, 7  ;;  %v3951_v30 = vrot.slane %v3037_v28, %v5544_v5 }
0x4420   :  { %3040 = vrot.lane.b32.xlu0 %v3039_v29, %s5253_s11  ;;  %v5882_v33 = vsel %vm1970_vm15, %v3951_v30, %v3946_v20 }
0x4492   :  { %v3041_v32 = vpop.permute.xlu0 %3040 }
0x4493   :  { %4708 = vmatmul.mubr.msk.f32.vlgmr.msra.gmra.mrb[26].mxu1 %vm157_vm8, %v3041_v32 }
0x4494   :  { %4980 = vmatpush3.bf16.msra.mxu1 %v5710_v15  ;;  %4729 = vmatprep.mubr.msk.f32.mxu1 %vm5250_vm0, %v5251_v21 }
0x4495   :  { %4981 = vmatprep.subr.bf16.mxu1 %v5249_v9 }
0x4498   :  { %4983 = vmatpush3.bf16.msra.mxu1 %v5720_v23 }
0x4499   :  { %4990 = vmatprep.subr.bf16.mxu1 %v5249_v9 }
0x4566   :  { %v3110_v35 = vpop.f32.mrb[26].mxu1 }
0x4567   :  { %v3114_v36 = vadd.f32 %v3110_v35, %v5749_v34  ;;  %v4709_v31 = vpop.f32.mrb[27].mxu1 }
0x4569   :  { %v4197_v39 = vmul.f32 -1.442695, %v3114_v36 }
0x456b   :  { %5176 = vpow2.f32 %v4197_v39 }
0x4575   :  { %v5177_v40 = vpop.eup %5176 }
0x4576   :  { %v3118_v41 = vadd.f32 1.0, %v5177_v40 }
0x4578   :  { %5178 = vrcp.f32 %v3118_v41 }
0x4582   :  { %v5179_v45 = vpop.eup %5178 }
0x4583   :  { %v3121_v46 = vmul.f32 2.0, %v5179_v45 }
0x4585   :  { %v4198_v48 = vadd.f32 -1.0, %v3121_v46 }
0x4587   :  { %v3123_v49 = vsel %vm5388_vm7, %v4198_v48, %v5179_v45 }
0x4588   :  { %3129 = vrot.lane.b32.xlu1 %v3123_v49, %s5252_s1  ;;  %v3127_v53 = vmul.f32 %v3125_v52, %v3123_v49 }
0x45fa   :  { %v3130_v50 = vpop.permute.xlu1 %3129 }
0x45fb   :  { %v3132_v51 = vmul.f32 %v3130_v50, %v3123_v49 }
0x45fd   :  { %3134 = vrot.lane.b32.xlu0 %v3132_v51, %s5253_s11 }
0x466f   :  { %v3135_v54 = vpop.permute.xlu0 %3134 }
0x4670   :  { %v3137_v55 = vadd.f32 %v3135_v54, %v3127_v53 }
0x4672   :  { %5180 = vtanh.f32 %v3137_v55  ;;  %v3233_v7 = vrot.slane %v3137_v55, 7 }
0x467c   :  { %v5181_v56 = vpop.eup %5180 }
0x467d   :  { %3140 = vrot.lane.b32.xlu1 %v5181_v56, %s5252_s1 }
0x46ef   :  { %v3141_v57 = vpop.permute.xlu1 %3140 }
0x46f0   :  { %v3143_v58 = vmul.f32 %v3141_v57, %v3123_v49 }
0x46f2   :  { %3145 = vrot.lane.b32.xlu0 %v3143_v58, %s5253_s11  ;;  %v3957_v22 = vrot.slane %v3143_v58, %v5412_v11 }
0x46f4   :  { %v3959_v27 = vsel %vm1983_vm1, %v3957_v22, 0.0 }
0x4764   :  { %v3146_v14 = vpop.permute.xlu0 %3145 }
0x4765   :  { %4719 = vmatmul.mubr.msk.f32.vlgmr.msra.gmra.mrb[26].mxu0 %vm157_vm8, %v3146_v14 }
0x4766   :  { %4986 = vmatpush3.bf16.msra.mxu0 %v5710_v15  ;;  %4740 = vmatprep.mubr.msk.f32.mxu0 %vm5250_vm0, %v5251_v21 }
0x4767   :  { %4987 = vmatprep.subr.bf16.mxu0 %v5249_v9 }
0x476a   :  { %4989 = vmatpush3.bf16.msra.mxu0 %v5720_v23 }
0x476b   :  { %4996 = vmatprep.subr.bf16.mxu0 %v5249_v9 }
0x4838   :  { %v3215_v59 = vpop.f32.mrb[26].mxu0 }
0x4839   :  { %v3220_v60 = vrot.slane %v3215_v59, 7  ;;  %v4720_v61 = vpop.f32.mrb[27].mxu0 }
0x483b   :  { %v3222_v20 = vadd.f32 %v3220_v60, %v5749_v34 }
0x483d   :  { %v4200_v19 = vmul.f32 -1.442695, %v3222_v20 }
0x483f   :  { %5182 = vpow2.f32 %v4200_v19 }
0x4849   :  { %v5183_v62 = vpop.eup %5182 }
0x484a   :  { %v3226_v63 = vadd.f32 1.0, %v5183_v62 }
0x484c   :  { %5184 = vrcp.f32 %v3226_v63 }
0x4856   :  { %v5185_v0 = vpop.eup %5184 }
0x4857   :  { %v3229_v1 = vmul.f32 2.0, %v5185_v0 }
0x4859   :  { %v4201_v37 = vadd.f32 -1.0, %v3229_v1 }
0x485b   :  { %v3231_v3 = vsel %vm5388_vm7, %v4201_v37, %v5185_v0 }
0x485c   :  { %3237 = vrot.lane.b32.xlu1 %v3231_v3, %s5252_s1  ;;  %v3235_v10 = vmul.f32 %v3233_v7, %v3231_v3 }
0x48ce   :  { %v3238_v16 = vpop.permute.xlu1 %3237 }
0x48cf   :  { %v3240_v4 = vmul.f32 %v3238_v16, %v3231_v3 }
0x48d1   :  { %3242 = vrot.lane.b32.xlu0 %v3240_v4, %s5253_s11 }
0x4943   :  { %v3243_v13 = vpop.permute.xlu0 %3242 }
0x4944   :  { %v3245_v17 = vadd.f32 %v3243_v13, %v3235_v10 }
0x4946   :  { %5186 = vtanh.f32 %v3245_v17  ;;  %v3342_v49 = vrot.slane %v3245_v17, 7 }
0x4950   :  { %v5187_v18 = vpop.eup %5186 }
0x4951   :  { %3248 = vrot.lane.b32.xlu1 %v5187_v18, %s5252_s1 }
0x49c3   :  { %v3249_v24 = vpop.permute.xlu1 %3248 }
0x49c4   :  { %v3251_v38 = vmul.f32 %v3249_v24, %v3231_v3 }
0x49c6   :  { %v3253_v25 = vrot.slane %v3251_v38, 1  ;;  %v3963_v26 = vrot.slane %v3251_v38, %v5415_v12 }
0x49c8   :  { %v3965_v28 = vsel %vm1995_vm2, %v3963_v26, %v3959_v27  ;;  %3254 = vrot.lane.b32.xlu0 %v3253_v25, %s5253_s11 }
0x4a3a   :  { %v3255_v29 = vpop.permute.xlu0 %3254 }
0x4a3b   :  { %4730 = vmatmul.mubr.msk.f32.vlgmr.msra.gmra.mrb[28].mxu1 %vm157_vm8, %v3255_v29 }
0x4a3c   :  { %4992 = vmatpush3.bf16.msra.mxu1 %v5710_v15  ;;  %4751 = vmatprep.mubr.msk.f32.mxu1 %vm5250_vm0, %v5251_v21 }
0x4a3d   :  { %4993 = vmatprep.subr.bf16.mxu1 %v5249_v9 }
0x4a40   :  { %4995 = vmatpush3.bf16.msra.mxu1 %v5720_v23 }
0x4a41   :  { %5002 = vmatprep.subr.bf16.mxu1 %v5249_v9 }
0x4b0e   :  { %v3324_v11 = vpop.f32.mrb[28].mxu1 }
0x4b0f   :  { %v3329_v12 = vrot.slane %v3324_v11, 6  ;;  %v4731_v30 = vpop.f32.mrb[29].mxu1 }
0x4b11   :  { %v3331_v32 = vadd.f32 %v3329_v12, %v5749_v34 }
0x4b13   :  { %v4203_v35 = vmul.f32 -1.442695, %v3331_v32 }
0x4b15   :  { %5188 = vpow2.f32 %v4203_v35 }
0x4b1f   :  { %v5189_v36 = vpop.eup %5188 }
0x4b20   :  { %v3335_v31 = vadd.f32 1.0, %v5189_v36 }
0x4b22   :  { %5190 = vrcp.f32 %v3335_v31 }
0x4b2c   :  { %v5191_v39 = vpop.eup %5190 }
0x4b2d   :  { %v3338_v40 = vmul.f32 2.0, %v5191_v39 }
0x4b2f   :  { %v4204_v41 = vadd.f32 -1.0, %v3338_v40 }
0x4b31   :  { %v3340_v45 = vsel %vm5388_vm7, %v4204_v41, %v5191_v39 }
0x4b32   :  { %3346 = vrot.lane.b32.xlu1 %v3340_v45, %s5252_s1  ;;  %v3344_v50 = vmul.f32 %v3342_v49, %v3340_v45 }
0x4ba4   :  { %v3347_v46 = vpop.permute.xlu1 %3346 }
0x4ba5   :  { %v3349_v48 = vmul.f32 %v3347_v46, %v3340_v45 }
0x4ba7   :  { %3351 = vrot.lane.b32.xlu0 %v3349_v48, %s5253_s11 }
0x4c19   :  { %v3352_v51 = vpop.permute.xlu0 %3351 }
0x4c1a   :  { %v3354_v52 = vadd.f32 %v3352_v51, %v3344_v50 }
0x4c1c   :  { %5192 = vtanh.f32 %v3354_v52  ;;  %v3451_v4 = vrot.slane %v3354_v52, 7 }
0x4c26   :  { %v5193_v53 = vpop.eup %5192 }
0x4c27   :  { %3357 = vrot.lane.b32.xlu1 %v5193_v53, %s5252_s1 }
0x4c99   :  { %v3358_v54 = vpop.permute.xlu1 %3357 }
0x4c9a   :  { %v3360_v55 = vmul.f32 %v3358_v54, %v3340_v45 }
0x4c9c   :  { %v3362_v56 = vrot.slane %v3360_v55, 2  ;;  %v3969_v57 = vrot.slane %v3360_v55, %v5439_v47 }
0x4c9e   :  { %v3971_v58 = vsel %vm2007_vm3, %v3969_v57, %v3965_v28  ;;  %3363 = vrot.lane.b32.xlu0 %v3362_v56, %s5253_s11 }
0x4d10   :  { %v3364_v14 = vpop.permute.xlu0 %3363 }
0x4d11   :  { %4741 = vmatmul.mubr.msk.f32.vlgmr.msra.gmra.mrb[28].mxu0 %vm157_vm8, %v3364_v14 }
0x4d12   :  { %4998 = vmatpush3.bf16.msra.mxu0 %v5710_v15  ;;  %4762 = vmatprep.mubr.msk.f32.mxu0 %vm5250_vm0, %v5251_v21 }
0x4d13   :  { %4999 = vmatprep.subr.bf16.mxu0 %v5249_v9 }
0x4d16   :  { %5001 = vmatpush3.bf16.msra.mxu0 %v5720_v23 }
0x4d17   :  { %5008 = vmatprep.subr.bf16.mxu0 %v5249_v9 }
0x4de4   :  { %v3433_v47 = vpop.f32.mrb[28].mxu0 }
0x4de5   :  { %v3438_v59 = vrot.slane %v3433_v47, 5  ;;  %v4742_v60 = vpop.f32.mrb[29].mxu0 }
0x4de7   :  { %v3440_v61 = vadd.f32 %v3438_v59, %v5749_v34 }
0x4de9   :  { %v4206_v20 = vmul.f32 -1.442695, %v3440_v61 }
0x4deb   :  { %5194 = vpow2.f32 %v4206_v20 }
0x4df5   :  { %v5195_v19 = vpop.eup %5194 }
0x4df6   :  { %v3444_v62 = vadd.f32 1.0, %v5195_v19 }
0x4df8   :  { %5196 = vrcp.f32 %v3444_v62 }
0x4e02   :  { %v5197_v63 = vpop.eup %5196 }
0x4e03   :  { %v3447_v0 = vmul.f32 2.0, %v5197_v63 }
0x4e05   :  { %v4207_v1 = vadd.f32 -1.0, %v3447_v0 }
0x4e07   :  { %v3449_v37 = vsel %vm5388_vm7, %v4207_v1, %v5197_v63 }
0x4e08   :  { %3455 = vrot.lane.b32.xlu1 %v3449_v37, %s5252_s1  ;;  %v3453_v7 = vmul.f32 %v3451_v4, %v3449_v37 }
0x4e7a   :  { %v3456_v3 = vpop.permute.xlu1 %3455 }
0x4e7b   :  { %v3458_v16 = vmul.f32 %v3456_v3, %v3449_v37 }
0x4e7d   :  { %3460 = vrot.lane.b32.xlu0 %v3458_v16, %s5253_s11 }
0x4eef   :  { %v3461_v10 = vpop.permute.xlu0 %3460 }
0x4ef0   :  { %v3463_v13 = vadd.f32 %v3461_v10, %v3453_v7 }
0x4ef2   :  { %5198 = vtanh.f32 %v3463_v13  ;;  %v3560_v41 = vrot.slane %v3463_v13, 7 }
0x4efc   :  { %v5199_v17 = vpop.eup %5198 }
0x4efd   :  { %3466 = vrot.lane.b32.xlu1 %v5199_v17, %s5252_s1 }
0x4f6f   :  { %v3467_v18 = vpop.permute.xlu1 %3466 }
0x4f70   :  { %v3469_v22 = vmul.f32 %v3467_v18, %v3449_v37 }
0x4f72   :  { %v3471_v24 = vrot.slane %v3469_v22, 3  ;;  %v3975_v38 = vrot.slane %v3469_v22, %v5460_v8 }
0x4f74   :  { %v3977_v25 = vsel %vm2019_vm5, %v3975_v38, %v3971_v58  ;;  %3472 = vrot.lane.b32.xlu0 %v3471_v24, %s5253_s11 }
0x4fe6   :  { %v3473_v26 = vpop.permute.xlu0 %3472 }
0x4fe7   :  { %4752 = vmatmul.mubr.msk.f32.vlgmr.msra.gmra.mrb[30].mxu1 %vm157_vm8, %v3473_v26 }
0x4fe8   :  { %5004 = vmatpush3.bf16.msra.mxu1 %v5710_v15  ;;  %4773 = vmatprep.mubr.msk.f32.mxu1 %vm5250_vm0, %v5251_v21 }
0x4fe9   :  { %5005 = vmatprep.subr.bf16.mxu1 %v5249_v9 }
0x4fec   :  { %5007 = vmatpush3.bf16.msra.mxu1 %v5720_v23 }
0x50ba   :  { %v3542_v27 = vpop.f32.mrb[30].mxu1 }
0x50bb   :  { %v3547_v28 = vrot.slane %v3542_v27, 4  ;;  %v4753_v8 = vpop.f32.mrb[31].mxu1 }
0x50bd   :  { %v3549_v29 = vadd.f32 %v3547_v28, %v5749_v34 }
0x50bf   :  { %v4209_v11 = vmul.f32 -1.442695, %v3549_v29 }
0x50c1   :  { %5200 = vpow2.f32 %v4209_v11 }
0x50cb   :  { %v5201_v12 = vpop.eup %5200 }
0x50cc   :  { %v3553_v30 = vadd.f32 1.0, %v5201_v12 }
0x50ce   :  { %5202 = vrcp.f32 %v3553_v30 }
0x50d8   :  { %v5203_v32 = vpop.eup %5202 }
0x50d9   :  { %v3556_v35 = vmul.f32 2.0, %v5203_v32 }
0x50db   :  { %v4210_v36 = vadd.f32 -1.0, %v3556_v35 }
0x50dd   :  { %v3558_v31 = vsel %vm5388_vm7, %v4210_v36, %v5203_v32 }
0x50de   :  { %3564 = vrot.lane.b32.xlu1 %v3558_v31, %s5252_s1  ;;  %v3562_v45 = vmul.f32 %v3560_v41, %v3558_v31 }
0x5150   :  { %v3565_v39 = vpop.permute.xlu1 %3564 }
0x5151   :  { %v3567_v40 = vmul.f32 %v3565_v39, %v3558_v31 }
0x5153   :  { %3569 = vrot.lane.b32.xlu0 %v3567_v40, %s5253_s11 }
0x51c5   :  { %v3570_v46 = vpop.permute.xlu0 %3569 }
0x51c6   :  { %v3572_v48 = vadd.f32 %v3570_v46, %v3562_v45 }
0x51c8   :  { %5204 = vtanh.f32 %v3572_v48  ;;  %v3669_v20 = vrot.slane %v3572_v48, 7 }
0x51d2   :  { %v5205_v49 = vpop.eup %5204 }
0x51d3   :  { %3575 = vrot.lane.b32.xlu1 %v5205_v49, %s5252_s1 }
0x5245   :  { %v3576_v50 = vpop.permute.xlu1 %3575 }
0x5246   :  { %v3578_v51 = vmul.f32 %v3576_v50, %v3558_v31 }
0x5248   :  { %v3580_v52 = vrot.slane %v3578_v51, 4  ;;  %v3981_v53 = vrot.slane %v3578_v51, %v5481_v43 }
0x524a   :  { %v3983_v54 = vsel %vm6051_vm4, %v3981_v53, %v3977_v25  ;;  %3581 = vrot.lane.b32.xlu0 %v3580_v52, %s5253_s11 }
0x52bc   :  { %v3582_v55 = vpop.permute.xlu0 %3581 }
0x52bd   :  { %4763 = vmatmul.mubr.msk.f32.vlgmr.msra.gmra.mrb[30].mxu0 %vm157_vm8, %v3582_v55 }
0x52be   :  { %5010 = vmatpush3.bf16.msra.mxu0 %v5710_v15  ;;  %4784 = vmatprep.mubr.msk.f32.mxu0 %vm5250_vm0, %v5251_v21  ;;  %vm6052_vm0 = vcmp.eq.s32.totalorder %v5585_v2, 13 }
0x52bf   :  { %5011 = vmatprep.subr.bf16.mxu0 %v5249_v9 }
0x52c2   :  { %5013 = vmatpush3.bf16.msra.mxu0 %v5720_v23 }
0x5390   :  { %v3651_v56 = vpop.f32.mrb[30].mxu0 }
0x5391   :  { %v3656_v57 = vrot.slane %v3651_v56, 3  ;;  %v4764_v43 = vpop.f32.mrb[31].mxu0 }
0x5393   :  { %v3658_v58 = vadd.f32 %v3656_v57, %v5749_v34 }
0x5395   :  { %v4212_v14 = vmul.f32 -1.442695, %v3658_v58 }
0x5397   :  { %5206 = vpow2.f32 %v4212_v14 }
0x53a1   :  { %v5207_v47 = vpop.eup %5206 }
0x53a2   :  { %v3662_v59 = vadd.f32 1.0, %v5207_v47 }
0x53a4   :  { %5208 = vrcp.f32 %v3662_v59  ;;  %v4003_v59 = vld [vmem:[%s6043_s6 + $0x8] sm:$0xff] }
0x53ae   :  { %v5209_v60 = vpop.eup %5208 }
0x53af   :  { %v3665_v61 = vmul.f32 2.0, %v5209_v60 }
0x53b1   :  { %v4213_v15 = vadd.f32 -1.0, %v3665_v61  ;;  %v4005_v61 = vld [vmem:[%s6043_s6 + $0x18] sm:$0xff] }
0x53b3   :  { %v3667_v21 = vsel %vm5388_vm7, %v4213_v15, %v5209_v60  ;;  %v5014_v60 = vpack.c.bf16 %v4003_v59, %v4002_v44 }
0x53b4   :  { %3673 = vrot.lane.b32.xlu1 %v3667_v21, %s5252_s1  ;;  %v3671_v19 = vmul.f32 %v3669_v20, %v3667_v21 }
0x53b5   :  { %5015 = vmatprep.subr.bf16.mxu1 %v5014_v60 }
0x5426   :  { %v3674_v9 = vpop.permute.xlu1 %3673 }
0x5427   :  { %v3676_v23 = vmul.f32 %v3674_v9, %v3667_v21 }
0x5429   :  { %3678 = vrot.lane.b32.xlu0 %v3676_v23, %s5253_s11 }
0x549b   :  { %v3679_v62 = vpop.permute.xlu0 %3678 }
0x549c   :  { %v3681_v63 = vadd.f32 %v3679_v62, %v3671_v19 }
0x549e   :  { %5210 = vtanh.f32 %v3681_v63  ;;  %v3778_v29 = vrot.slane %v3681_v63, 7  ;;  %v4220_v63 = vld [vmem:[%s6044_s7] ss:$0 sm:$0xff] }
0x54a8   :  { %v5211_v0 = vpop.eup %5210 }
0x54a9   :  { %3684 = vrot.lane.b32.xlu1 %v5211_v0, %s5252_s1 }
0x551b   :  { %v3685_v1 = vpop.permute.xlu1 %3684 }
0x551c   :  { %v3687_v37 = vmul.f32 %v3685_v1, %v3667_v21 }
0x551e   :  { %v3689_v3 = vrot.slane %v3687_v37, 5  ;;  %v3987_v16 = vrot.slane %v3687_v37, %v5502_v6 }
0x5520   :  { %v3989_v4 = vsel %vm6052_vm0, %v3987_v16, %v3983_v54  ;;  %3690 = vrot.lane.b32.xlu0 %v3689_v3, %s5253_s11 }
0x5592   :  { %v3691_v7 = vpop.permute.xlu0 %3690 }
0x5593   :  { %4774 = vmatmul.mubr.msk.f32.vlgmr.msra.gmra.mrb[32].mxu1 %vm157_vm8, %v3691_v7 }
0x5594   :  { %5017 = vmatpush3.bf16.msra.mxu1 %v5014_v60 }
0x5666   :  { %v3760_v10 = vpop.f32.mrb[32].mxu1 }
0x5667   :  { %v3765_v13 = vrot.slane %v3760_v10, 2  ;;  %v4775_v17 = vpop.f32.mrb[33].mxu1 }
0x5669   :  { %v3767_v18 = vadd.f32 %v3765_v13, %v5749_v34 }
0x566b   :  { %v4215_v22 = vmul.f32 -1.442695, %v3767_v18 }
0x566d   :  { %5212 = vpow2.f32 %v4215_v22 }
0x5677   :  { %v5213_v24 = vpop.eup %5212 }
0x5678   :  { %v3771_v38 = vadd.f32 1.0, %v5213_v24 }
0x567a   :  { %5214 = vrcp.f32 %v3771_v38 }
0x5684   :  { %v5215_v25 = vpop.eup %5214 }
0x5685   :  { %v3774_v6 = vmul.f32 2.0, %v5215_v25 }
0x5687   :  { %v4216_v26 = vadd.f32 -1.0, %v3774_v6 }
0x5689   :  { %v3776_v27 = vsel %vm5388_vm7, %v4216_v26, %v5215_v25 }
0x568a   :  { %3782 = vrot.lane.b32.xlu1 %v3776_v27, %s5252_s1  ;;  %v3780_v11 = vmul.f32 %v3778_v29, %v3776_v27 }
0x56fc   :  { %v3783_v28 = vpop.permute.xlu1 %3782 }
0x56fd   :  { %v3785_v8 = vmul.f32 %v3783_v28, %v3776_v27 }
0x56ff   :  { %3787 = vrot.lane.b32.xlu0 %v3785_v8, %s5253_s11 }
0x5771   :  { %v3788_v12 = vpop.permute.xlu0 %3787 }
0x5772   :  { %v3790_v30 = vadd.f32 %v3788_v12, %v3780_v11 }
0x5774   :  { %5216 = vtanh.f32 %v3790_v30 }
0x577e   :  { %v5217_v32 = vpop.eup %5216 }
0x577f   :  { %3793 = vrot.lane.b32.xlu1 %v5217_v32, %s5252_s1 }
0x57f1   :  { %v3794_v35 = vpop.permute.xlu1 %3793 }
0x57f2   :  { %v3796_v36 = vmul.f32 %v3794_v35, %v3776_v27 }
0x57f4   :  { %v3798_v31 = vrot.slane %v3796_v36, 6  ;;  %v3993_v39 = vrot.slane %v3796_v36, %v5523_v42 }
0x57f6   :  { %3799 = vrot.lane.b32.xlu0 %v3798_v31, %s5253_s11  ;;  %v3995_v40 = vsel %vm6053_vm9, %v3993_v39, %v3989_v4 }
0x5868   :  { %v3800_v41 = vpop.permute.xlu0 %3799 }
0x5869   :  { %4785 = vmatmul.mubr.msk.f32.vlgmr.msra.gmra.mrb[32].mxu0 %vm157_vm8, %v3800_v41 }
0x593c   :  { %v3869_v45 = vpop.f32.mrb[32].mxu0 }
0x593d   :  { %v3874_v46 = vrot.slane %v3869_v45, 1  ;;  %v4786_v48 = vpop.f32.mrb[33].mxu0 }
0x593f   :  { %v3876_v49 = vadd.f32 %v3874_v46, %v5749_v34  ;;  %v3887_v34 = vrot.slane %v3790_v30, 7 }
0x5941   :  { %v4218_v50 = vmul.f32 -1.442695, %v3876_v49 }
0x5943   :  { %5218 = vpow2.f32 %v4218_v50 }
0x594d   :  { %v5219_v51 = vpop.eup %5218 }
0x594e   :  { %v3880_v52 = vadd.f32 1.0, %v5219_v51 }
0x5950   :  { %5220 = vrcp.f32 %v3880_v52 }
0x595a   :  { %v5221_v53 = vpop.eup %5220 }
0x595b   :  { %v3883_v42 = vmul.f32 2.0, %v5221_v53 }
0x595d   :  { %v4219_v54 = vadd.f32 -1.0, %v3883_v42 }
0x595f   :  { %v3885_v55 = vsel %vm5388_vm7, %v4219_v54, %v5221_v53 }
0x5960   :  { %3891 = vrot.lane.b32.xlu1 %v3885_v55, %s5252_s1  ;;  %v3889_v43 = vmul.f32 %v3887_v34, %v3885_v55 }
0x59d2   :  { %v3892_v56 = vpop.permute.xlu1 %3891 }
0x59d3   :  { %v3894_v57 = vmul.f32 %v3892_v56, %v3885_v55 }
0x59d5   :  { %3896 = vrot.lane.b32.xlu0 %v3894_v57, %s5253_s11 }
0x59d9   :  { %4015 = vrot.lane.b32.xlu0 %v5882_v33, %s5253_s11  ;;  %v4004_v33 = vld [vmem:[%s6043_s6 + $0x10] sm:$0xff] }
0x59da   :  { %v5018_v15 = vpack.c.bf16 %v4005_v61, %v4004_v33 }
0x59dc   :  { %5019 = vmatprep.subr.bf16.mxu1 %v5018_v15 }
0x59dd   :  { %5021 = vmatpush3.bf16.msra.mxu1 %v5018_v15 }
0x5a47   :  { %v3897_v58 = vpop.permute.xlu0 %3896 }
0x5a48   :  { %v3899_v14 = vadd.f32 %v3897_v58, %v3889_v43 }
0x5a4a   :  { %5222 = vtanh.f32 %v3899_v14 }
0x5a4b   :  { %v4016_v47 = vpop.permute.xlu0 %4015 }
0x5a4c   :  { %4795 = vmatprep.mubr.msk.f32.mxu1 %vm157_vm8, %v4016_v47 }
0x5a54   :  { %v5223_v21 = vpop.eup %5222 }
0x5a55   :  { %3902 = vrot.lane.b32.xlu1 %v5223_v21, %s5252_s1  ;;  %s5224_s1 = scalar_lea.vmem %s4106_s14, 256 }
0x5a56   :  { %p5225_p0 = scmp.ne.s32.totalorder %s4106_s14, %s5224_s1  ;;  %p5230_p2 = scmp.lt.s32.totalorder %s5224_s1, %s5224_s1 }
0x5a58   :  { %p5231_p3 = por %p5230_p2, %p5229_p1 }
0x5a5a   :  { %p5232_p4 = pnand %p5231_p3, %p5225_p0 }
0x5ac7   :  { %v3903_v9 = vpop.permute.xlu1 %3902 }
0x5ac8   :  { %v3905_v23 = vmul.f32 %v3903_v9, %v3885_v55 }
0x5aca   :  { %v3999_v20 = vrot.slane %v3905_v23, %v5544_v5 }
0x5acc   :  { %v4001_v19 = vsel %vm2067_vm6, %v3999_v20, %v3995_v40 }
0x5acd   :  { %4017 = vrot.lane.b32.xlu1 %v4001_v19, %s5253_s11 }
0x5b3f   :  { %v4018_v62 = vpop.permute.xlu1 %4017 }
0x5b40   :  { %4796 = vmatmul.mubr.msk.f32.vlgmr.msra.gmra.mrb[34].mxu1 %vm157_vm8, %v4018_v62 }
0x5c13   :  { %v4797_v0 = vpop.f32.mrb[34].mxu1 }
0x5c14   :  { %v4095_v1 = vadd.f32 %v4797_v0, %v4220_v63  ;;  %v4089_v37 = vpop.f32.mrb[35].mxu1 }
0x5c15   :  { %v4090_v3 = vadd.f32 %v4220_v63, %v4089_v37 }
0x5c16   :  { %4099 = vst [vmem:[#allocation2 + $0x8] sm:$0xff] %v4095_v1 }
0x5c17   :  { %4098 = vst [vmem:[#allocation2] sm:$0xff] %v4090_v3 }
0x5c18   :  { %5235 = shalt.err (!%p5232_p4)
}
0x5c19   :  { %s5236_s7 = scalar_lea.hbm %s6045_s8, 256 }
0x5c1a   :  { %p5237_p5 = scmp.ne.s32.totalorder %s6045_s8, %s5236_s7  ;;  %p5240_p6 = scmp.lt.u32.totalorder %s5236_s7, %s6045_s8 }
0x5c1c   :  { %p5242_p7 = pnand %p5240_p6, %p5237_p5 }
0x5c1e   :  { %5245 = shalt.err (!%p5242_p7)
}
0x5c1f   :  { %s5255_s20 = smov 128   ;;  %s5256_s21 = smov 8  }
0x5c20   :  { %4111 = dma.vmem_to_hbm [thread:$0]  %s4106_s14, 256, %s6045_s8, [#allocation3], %s5255_s20, %s5255_s20, %s5256_s21  }
0x5c21   :  { %5246 = dma.done.wait [#allocation3], 256  }
0x5c22   :  { %5247 = vsyncadd [#allocation3], 4294967040 }
0x5c23   :  { %4115 = vsyncpa [#allocation3], 1 }

</bundles_post_ra>
